<compile_context>
chip_gen: v7x
topology: tpu7x:2x2x1
jax: 0.10.0
libtpu: 0.0.40
codegen_flags: <defaults>
</compile_context>

<pallas_src>
import functools

import jax
import jax.numpy as jnp
from jax.experimental import pallas as pl
from jax.experimental.pallas import tpu as pltpu

# ----------------------------- config (small synthetic shapes) ---------------
BATCH = 2
IMG_C, IMG_H, IMG_W = 3, 16, 16          # NCHW image
PATCH = 8                                 # patch-embed "conv" stride/kernel
IMAGE_LENGTH = (IMG_H // PATCH) * (IMG_W // PATCH)   # 4 visual tokens
D_VIS = 128                               # vision hidden (lane-dense)
D_LM = 128                                # language hidden (lane-dense)
N_HEADS = 4                               # head_dim = 32
VOCAB = 128                               # lane-dense vocab
PRE_IMAGE_LEN = 3                         # tokens before the image slot
POST_LEN = 5                              # tokens after the image slot
SEQ = PRE_IMAGE_LEN + IMAGE_LENGTH + POST_LEN   # 12
PAD_ID = 0
ACT_DTYPE = jnp.bfloat16
NEG_INF = -1e30                           # fp32-safe additive mask value
ROW_PAD = 16                              # bf16 sublane packing (16 rows/vreg)


def _round_up(x, m):
    return (x + m - 1) // m * m


def _vmem_specs(n):
    return [pl.BlockSpec(memory_space=pltpu.MemorySpace.VMEM) for _ in range(n)]


# ----------------------------- in-kernel helpers ------------------------------
def _ln(x_f32, g, b, eps=1e-5):
    """LayerNorm with fp32 statistics; returns fp32."""
    mean = jnp.mean(x_f32, axis=-1, keepdims=True)
    var = jnp.mean(jnp.square(x_f32 - mean), axis=-1, keepdims=True)
    y = (x_f32 - mean) * jax.lax.rsqrt(var + eps)
    return y * g.astype(jnp.float32) + b.astype(jnp.float32)


def _attn_bias(m_rows, seq, causal):
    """Additive mask: block-diagonal over samples of length `seq` (+causal).

    Sample id computed with a float multiply + floor (+0.5 to stay clear of
    rounding at multiples of seq) -- avoids vector integer division and the
    per-batch Python loop of the previous version.
    """
    rows = jax.lax.broadcasted_iota(jnp.int32, (m_rows, m_rows), 0)
    cols = jax.lax.broadcasted_iota(jnp.int32, (m_rows, m_rows), 1)
    inv = 1.0 / float(seq)
    r_sid = jnp.floor((rows.astype(jnp.float32) + 0.5) * inv)
    c_sid = jnp.floor((cols.astype(jnp.float32) + 0.5) * inv)
    allowed = r_sid == c_sid
    if causal:
        # TODO(synk): ChatGLM uses a prefix-LM mask (bidirectional prompt,
        # causal only for generated positions); plain causal used here.
        allowed = allowed & (rows >= cols)
    return jnp.where(allowed, jnp.float32(0.0), jnp.float32(NEG_INF))


def _transformer_block(x, ln1_g, ln1_b, qkv_w, qkv_b, proj_w, proj_b,
                       ln2_g, ln2_b, w1, b1, w2, b2, *, seq, n_heads, causal):
    """Fused pre-LN block on a [M, D] fp32 residual stream (M = padded rows).

    All intermediates stay in VMEM/vregs.  Per-head attention outputs are
    lane-concatenated and hit proj_w with a single K=D matmul.
    """
    m_rows, d = x.shape
    dh = d // n_heads
    scale = 1.0 / (float(dh) ** 0.5)

    # --- LN1 -> fused QKV projection (bf16 MXU, f32 accumulate) ---
    h = _ln(x, ln1_g, ln1_b).astype(jnp.bfloat16)
    qkv = jnp.dot(h, qkv_w, preferred_element_type=jnp.float32)
    qkv = (qkv + qkv_b.astype(jnp.float32)).astype(jnp.bfloat16)     # [M, 3D]

    bias = _attn_bias(m_rows, seq, causal)                           # [M, M] f32

    # --- multi-head attention; heads as static lane slices of the QKV tile ---
    heads = []
    for hh in range(n_heads):                                        # static
        qh = qkv[:, hh * dh:(hh + 1) * dh]                           # [M, dh]
        kh = qkv[:, d + hh * dh:d + (hh + 1) * dh]
        vh = qkv[:, 2 * d + hh * dh:2 * d + (hh + 1) * dh]
        s = jax.lax.dot_general(qh, kh, (((1,), (1,)), ((), ())),
                                preferred_element_type=jnp.float32)
        s = s * scale + bias                                         # [M, M]
        mx = jnp.max(s, axis=-1, keepdims=True)
        p = jnp.exp(s - mx)
        denom = jnp.sum(p, axis=-1, keepdims=True)
        p = p * pl.reciprocal(denom, approx=True)                    # EUP slot
        heads.append(jnp.dot(p.astype(jnp.bfloat16), vh,
                             preferred_element_type=jnp.float32))    # [M, dh]
    attn = jnp.concatenate(heads, axis=-1).astype(jnp.bfloat16)      # [M, D]
    attn = jnp.dot(attn, proj_w, preferred_element_type=jnp.float32)  # one K=D matmul
    x = x + attn + proj_b.astype(jnp.float32)

    # --- LN2 -> MLP (gelu) -> residual ---
    h2 = _ln(x, ln2_g, ln2_b).astype(jnp.bfloat16)
    m1 = jnp.dot(h2, w1, preferred_element_type=jnp.float32) + b1.astype(jnp.float32)
    m1 = jax.nn.gelu(m1, approximate=True).astype(jnp.bfloat16)
    m2 = jnp.dot(m1, w2, preferred_element_type=jnp.float32) + b2.astype(jnp.float32)
    return x + m2


# ----------------------------- Pallas kernels --------------------------------
def _vision_kernel(patches_ref, pw_ref, pb_ref, pos_ref,
                   ln1g_ref, ln1b_ref, qkvw_ref, qkvb_ref, projw_ref, projb_ref,
                   ln2g_ref, ln2b_ref, w1_ref, b1_ref, w2_ref, b2_ref,
                   glmw_ref, glmb_ref, o_ref, *, p_tokens, n_heads):
    """patch-embed + vision transformer block + GLM projection, fully fused."""
    m_rows = patches_ref.shape[0]
    reps = m_rows // p_tokens

    # patch-embed "conv" as matmul + bias + positional embedding (broadcast
    # pos_emb [P, D] across samples in-kernel; no jnp.tile / extra HBM buffer)
    acc = jnp.dot(patches_ref[...], pw_ref[...], preferred_element_type=jnp.float32)
    pos = pos_ref[...].astype(jnp.float32)
    pos_full = jnp.concatenate([pos] * reps, axis=0)                 # [M, D]
    x = acc + pb_ref[...].astype(jnp.float32) + pos_full

    # fused vision transformer block (bidirectional within each sample)
    x = _transformer_block(x, ln1g_ref[...], ln1b_ref[...],
                           qkvw_ref[...], qkvb_ref[...],
                           projw_ref[...], projb_ref[...],
                           ln2g_ref[...], ln2b_ref[...],
                           w1_ref[...], b1_ref[...], w2_ref[...], b2_ref[...],
                           seq=p_tokens, n_heads=n_heads, causal=False)

    # GLM projection: visual tokens -> language hidden
    feats = jnp.dot(x.astype(jnp.bfloat16), glmw_ref[...],
                    preferred_element_type=jnp.float32)
    o_ref[...] = (feats + glmb_ref[...].astype(jnp.float32)).astype(o_ref.dtype)


def _lm_kernel(emb_ref,
               ln1g_ref, ln1b_ref, qkvw_ref, qkvb_ref, projw_ref, projb_ref,
               ln2g_ref, ln2b_ref, w1_ref, b1_ref, w2_ref, b2_ref,
               flng_ref, flnb_ref, lmw_ref, lmb_ref,
               logits_ref, ntok_ref, *, batch, seq, n_heads):
    """GLM transformer block + final LN + LM head (last token) + greedy argmax."""
    x = emb_ref[...].astype(jnp.float32)                             # [M_pad, D]

    x = _transformer_block(x, ln1g_ref[...], ln1b_ref[...],
                           qkvw_ref[...], qkvb_ref[...],
                           projw_ref[...], projb_ref[...],
                           ln2g_ref[...], ln2b_ref[...],
                           w1_ref[...], b1_ref[...], w2_ref[...], b2_ref[...],
                           seq=seq, n_heads=n_heads, causal=True)

    # last real token of each sample (static row slices; pad rows never read)
    last = jnp.concatenate(
        [x[b * seq + seq - 1:b * seq + seq, :] for b in range(batch)], axis=0)

    h = _ln(last, flng_ref[...], flnb_ref[...]).astype(jnp.bfloat16)
    logits = jnp.dot(h, lmw_ref[...], preferred_element_type=jnp.float32)
    logits = logits + lmb_ref[...].astype(jnp.float32)               # [B, V] f32
    logits_ref[...] = logits

    # fused greedy argmax (first max index, matching jnp.argmax tie-break)
    vocab = logits.shape[-1]
    idx = jax.lax.broadcasted_iota(jnp.int32, logits.shape, 1).astype(jnp.float32)
    mx = jnp.max(logits, axis=-1, keepdims=True)
    cand = jnp.where(logits >= mx, idx, jnp.float32(vocab))
    ntok_ref[...] = jnp.min(cand, axis=-1, keepdims=True).astype(jnp.int32)


# ----------------------------- pallas_call wrappers ---------------------------
def vision_encode(patches_pad, params):
    m_rows = patches_pad.shape[0]
    kernel = functools.partial(_vision_kernel, p_tokens=IMAGE_LENGTH,
                               n_heads=N_HEADS)
    return pl.pallas_call(
        kernel,
        out_shape=jax.ShapeDtypeStruct((m_rows, D_LM), ACT_DTYPE),
        in_specs=_vmem_specs(18),
        out_specs=pl.BlockSpec(memory_space=pltpu.MemorySpace.VMEM),
    )(patches_pad,
      params['patch_w'], params['patch_b'], params['pos_emb'],
      params['v_ln1_g'], params['v_ln1_b'],
      params['v_qkv_w'], params['v_qkv_b'],
      params['v_proj_w'], params['v_proj_b'],
      params['v_ln2_g'], params['v_ln2_b'],
      params['v_mlp_w1'], params['v_mlp_b1'],
      params['v_mlp_w2'], params['v_mlp_b2'],
      params['glm_w'], params['glm_b'])


def lm_decode(emb_pad, params, *, batch, seq):
    kernel = functools.partial(_lm_kernel, batch=batch, seq=seq, n_heads=N_HEADS)
    return pl.pallas_call(
        kernel,
        out_shape=(jax.ShapeDtypeStruct((batch, VOCAB), jnp.float32),
                   jax.ShapeDtypeStruct((batch, 1), jnp.int32)),
        in_specs=_vmem_specs(17),
        out_specs=(pl.BlockSpec(memory_space=pltpu.MemorySpace.VMEM),
                   pl.BlockSpec(memory_space=pltpu.MemorySpace.VMEM)),
    )(emb_pad,
      params['l_ln1_g'], params['l_ln1_b'],
      params['l_qkv_w'], params['l_qkv_b'],
      params['l_proj_w'], params['l_proj_b'],
      params['l_ln2_g'], params['l_ln2_b'],
      params['l_mlp_w1'], params['l_mlp_b1'],
      params['l_mlp_w2'], params['l_mlp_b2'],
      params['f_ln_g'], params['f_ln_b'],
      params['lm_w'], params['lm_b'])


# ----------------------------- model forward ----------------------------------
def visualglm_forward(params, images, input_ids, pre_image_len):
    """images: [B, C, H, W] (NCHW, bf16); input_ids: [B, SEQ] int32."""
    B, C, H, W = images.shape
    gh, gw = H // PATCH, W // PATCH
    P = gh * gw

    # --- patchify (XLA data prep), pad rows to a multiple of 16 (bf16 pack) ---
    x = images.reshape(B, C, gh, PATCH, gw, PATCH)
    x = x.transpose(0, 2, 4, 1, 3, 5).reshape(B * P, C * PATCH * PATCH)
    mv = _round_up(B * P, ROW_PAD)
    x = jnp.pad(x, ((0, mv - B * P), (0, 0)))

    # --- kernel 1: patch-embed + vision block + GLM projection, one launch ---
    img_feats = vision_encode(x, params)[:B * P].reshape(B, P, D_LM)

    # --- language side: token embeddings, splice image features ---
    # TODO(synk): at real dims do the embedding gather + image splice in-kernel
    # via PrefetchScalarGridSpec (input_ids scalar-prefetch + pl.Element gather).
    tok_emb = jnp.take(params['tok_emb'], input_ids, axis=0)          # [B, S, D]
    inputs_embeds = jax.lax.dynamic_update_slice(
        tok_emb, img_feats.astype(tok_emb.dtype), (0, pre_image_len, 0))
    S = inputs_embeds.shape[1]
    emb2d = inputs_embeds.reshape(B * S, D_LM)
    ml = _round_up(B * S, ROW_PAD)
    emb2d = jnp.pad(emb2d, ((0, ml - B * S), (0, 0)))

    # --- kernel 2: GLM block + final LN + LM head + greedy argmax, one launch ---
    logits, ntok = lm_decode(emb2d, params, batch=B, seq=S)
    # TODO(synk): the HF `.generate()` autoregressive loop / tokenizer decode is
    # host-side; we return last-token logits and one greedy next-token step.
    return logits, ntok[:, 0]


# ----------------------------- parameter init --------------------------------
def init_params(key):
    keys = jax.random.split(key, 16)

    def w(k, shape, scale=0.02):
        return (scale * jax.random.normal(k, shape, jnp.float32)).astype(ACT_DTYPE)

    def zeros(shape):
        return jnp.zeros(shape, ACT_DTYPE)

    def ones(shape):
        return jnp.ones(shape, ACT_DTYPE)

    p = {}
    # vision patch embed (Conv2d(C, D_VIS, kernel=stride=PATCH) as matmul)
    p['patch_w'] = w(keys[0], (IMG_C * PATCH * PATCH, D_VIS))
    p['patch_b'] = zeros((1, D_VIS))
    p['pos_emb'] = w(keys[1], (IMAGE_LENGTH, D_VIS))
    # vision transformer block
    p['v_ln1_g'], p['v_ln1_b'] = ones((1, D_VIS)), zeros((1, D_VIS))
    p['v_qkv_w'], p['v_qkv_b'] = w(keys[2], (D_VIS, 3 * D_VIS)), zeros((1, 3 * D_VIS))
    p['v_proj_w'], p['v_proj_b'] = w(keys[3], (D_VIS, D_VIS)), zeros((1, D_VIS))
    p['v_ln2_g'], p['v_ln2_b'] = ones((1, D_VIS)), zeros((1, D_VIS))
    p['v_mlp_w1'], p['v_mlp_b1'] = w(keys[4], (D_VIS, 4 * D_VIS)), zeros((1, 4 * D_VIS))
    p['v_mlp_w2'], p['v_mlp_b2'] = w(keys[5], (4 * D_VIS, D_VIS)), zeros((1, D_VIS))
    # glm projection
    p['glm_w'], p['glm_b'] = w(keys[6], (D_VIS, D_LM)), zeros((1, D_LM))
    # language model
    p['tok_emb'] = w(keys[7], (VOCAB, D_LM))
    p['l_ln1_g'], p['l_ln1_b'] = ones((1, D_LM)), zeros((1, D_LM))
    p['l_qkv_w'], p['l_qkv_b'] = w(keys[8], (D_LM, 3 * D_LM)), zeros((1, 3 * D_LM))
    p['l_proj_w'], p['l_proj_b'] = w(keys[9], (D_LM, D_LM)), zeros((1, D_LM))
    p['l_ln2_g'], p['l_ln2_b'] = ones((1, D_LM)), zeros((1, D_LM))
    p['l_mlp_w1'], p['l_mlp_b1'] = w(keys[10], (D_LM, 4 * D_LM)), zeros((1, 4 * D_LM))
    p['l_mlp_w2'], p['l_mlp_b2'] = w(keys[11], (4 * D_LM, D_LM)), zeros((1, D_LM))
    p['f_ln_g'], p['f_ln_b'] = ones((1, D_LM)), zeros((1, D_LM))
    p['lm_w'], p['lm_b'] = w(keys[12], (D_LM, VOCAB)), zeros((1, VOCAB))
    return p


# ----------------------------- main -------------------------------------------
if __name__ == "__main__":
    key = jax.random.PRNGKey(0)
    k_param, k_img, k_pre, k_post = jax.random.split(key, 4)

    params = init_params(k_param)

    # images: NCHW, cast to model dtype (analogue of `.to(self.model.dtype)`)
    images = jax.random.normal(k_img, (BATCH, IMG_C, IMG_H, IMG_W),
                               jnp.float32).astype(ACT_DTYPE)

    # input ids: [pre tokens][IMAGE_LENGTH pad slots][post tokens]
    pre_ids = jax.random.randint(k_pre, (BATCH, PRE_IMAGE_LEN), 1, VOCAB, jnp.int32)
    post_ids = jax.random.randint(k_post, (BATCH, POST_LEN), 1, VOCAB, jnp.int32)
    img_pad = jnp.full((BATCH, IMAGE_LENGTH), PAD_ID, jnp.int32)
    input_ids = jnp.concatenate([pre_ids, img_pad, post_ids], axis=1)

    fwd = jax.jit(functools.partial(visualglm_forward, pre_image_len=PRE_IMAGE_LEN))
    logits, next_token = fwd(params, images, input_ids)
    jax.block_until_ready((logits, next_token))

    assert logits.shape == (BATCH, VOCAB)
    assert logits.dtype == jnp.float32
    assert next_token.shape == (BATCH,)
    assert next_token.dtype == jnp.int32
    assert bool(jnp.all(jnp.isfinite(logits)))
    assert bool(jnp.all((next_token >= 0) & (next_token < VOCAB)))
    print("KERNEL_OK")
</pallas_src>

<mosaic_0001>
module attributes {stable_mosaic.version = 11 : i64} {
  func.func @_vision_kernel(%arg0: memref<16x192xbf16, #tpu.memory_space<vmem>>, %arg1: memref<192x128xbf16, #tpu.memory_space<vmem>>, %arg2: memref<1x128xbf16, #tpu.memory_space<vmem>>, %arg3: memref<4x128xbf16, #tpu.memory_space<vmem>>, %arg4: memref<1x128xbf16, #tpu.memory_space<vmem>>, %arg5: memref<1x128xbf16, #tpu.memory_space<vmem>>, %arg6: memref<128x384xbf16, #tpu.memory_space<vmem>>, %arg7: memref<1x384xbf16, #tpu.memory_space<vmem>>, %arg8: memref<128x128xbf16, #tpu.memory_space<vmem>>, %arg9: memref<1x128xbf16, #tpu.memory_space<vmem>>, %arg10: memref<1x128xbf16, #tpu.memory_space<vmem>>, %arg11: memref<1x128xbf16, #tpu.memory_space<vmem>>, %arg12: memref<128x512xbf16, #tpu.memory_space<vmem>>, %arg13: memref<1x512xbf16, #tpu.memory_space<vmem>>, %arg14: memref<512x128xbf16, #tpu.memory_space<vmem>>, %arg15: memref<1x128xbf16, #tpu.memory_space<vmem>>, %arg16: memref<128x128xbf16, #tpu.memory_space<vmem>>, %arg17: memref<1x128xbf16, #tpu.memory_space<vmem>>, %arg18: memref<16x128xbf16, #tpu.memory_space<vmem>>) attributes {dimension_semantics = [], scalar_prefetch = 0 : i64, scratch_operands = 0 : i64, tpu.core_type = #tpu.core_type<tc>} {
    %c0 = arith.constant 0 : index
    %c0_0 = arith.constant 0 : index
    %0 = vector.load %arg0[%c0, %c0_0] : memref<16x192xbf16, #tpu.memory_space<vmem>>, vector<16x192xbf16>
    %c0_1 = arith.constant 0 : index
    %c0_2 = arith.constant 0 : index
    %1 = vector.load %arg1[%c0_1, %c0_2] : memref<192x128xbf16, #tpu.memory_space<vmem>>, vector<192x128xbf16>
    %cst = arith.constant dense<0.000000e+00> : vector<16x128xf32>
    %2 = tpu.matmul %0, %1, %cst {dimension_numbers = #tpu.dot_dimension_numbers<[1], [0], [0], [1], [0, 0, 1, 1], [], []>} : vector<16x192xbf16>, vector<192x128xbf16>, vector<16x128xf32> -> vector<16x128xf32>
    %c0_3 = arith.constant 0 : index
    %c0_4 = arith.constant 0 : index
    %3 = vector.load %arg3[%c0_3, %c0_4] : memref<4x128xbf16, #tpu.memory_space<vmem>>, vector<4x128xbf16>
    %4 = arith.extf %3 : vector<4x128xbf16> to vector<4x128xf32>
    %5 = tpu.concatenate %4, %4, %4, %4 in 0 : vector<4x128xf32>, vector<4x128xf32>, vector<4x128xf32>, vector<4x128xf32> -> vector<16x128xf32>
    %c0_5 = arith.constant 0 : index
    %c0_6 = arith.constant 0 : index
    %6 = vector.load %arg2[%c0_5, %c0_6] : memref<1x128xbf16, #tpu.memory_space<vmem>>, vector<1x128xbf16>
    %7 = arith.extf %6 : vector<1x128xbf16> to vector<1x128xf32>
    %8 = vector.broadcast %7 : vector<1x128xf32> to vector<16x128xf32>
    %9 = arith.addf %2, %8 : vector<16x128xf32>
    %10 = arith.addf %9, %5 : vector<16x128xf32>
    %c0_7 = arith.constant 0 : index
    %c0_8 = arith.constant 0 : index
    %11 = vector.load %arg4[%c0_7, %c0_8] : memref<1x128xbf16, #tpu.memory_space<vmem>>, vector<1x128xbf16>
    %c0_9 = arith.constant 0 : index
    %c0_10 = arith.constant 0 : index
    %12 = vector.load %arg5[%c0_9, %c0_10] : memref<1x128xbf16, #tpu.memory_space<vmem>>, vector<1x128xbf16>
    %c0_11 = arith.constant 0 : index
    %c0_12 = arith.constant 0 : index
    %13 = vector.load %arg6[%c0_11, %c0_12] : memref<128x384xbf16, #tpu.memory_space<vmem>>, vector<128x384xbf16>
    %c0_13 = arith.constant 0 : index
    %c0_14 = arith.constant 0 : index
    %14 = vector.load %arg7[%c0_13, %c0_14] : memref<1x384xbf16, #tpu.memory_space<vmem>>, vector<1x384xbf16>
    %c0_15 = arith.constant 0 : index
    %c0_16 = arith.constant 0 : index
    %15 = vector.load %arg8[%c0_15, %c0_16] : memref<128x128xbf16, #tpu.memory_space<vmem>>, vector<128x128xbf16>
    %c0_17 = arith.constant 0 : index
    %c0_18 = arith.constant 0 : index
    %16 = vector.load %arg9[%c0_17, %c0_18] : memref<1x128xbf16, #tpu.memory_space<vmem>>, vector<1x128xbf16>
    %c0_19 = arith.constant 0 : index
    %c0_20 = arith.constant 0 : index
    %17 = vector.load %arg10[%c0_19, %c0_20] : memref<1x128xbf16, #tpu.memory_space<vmem>>, vector<1x128xbf16>
    %c0_21 = arith.constant 0 : index
    %c0_22 = arith.constant 0 : index
    %18 = vector.load %arg11[%c0_21, %c0_22] : memref<1x128xbf16, #tpu.memory_space<vmem>>, vector<1x128xbf16>
    %c0_23 = arith.constant 0 : index
    %c0_24 = arith.constant 0 : index
    %19 = vector.load %arg12[%c0_23, %c0_24] : memref<128x512xbf16, #tpu.memory_space<vmem>>, vector<128x512xbf16>
    %c0_25 = arith.constant 0 : index
    %c0_26 = arith.constant 0 : index
    %20 = vector.load %arg13[%c0_25, %c0_26] : memref<1x512xbf16, #tpu.memory_space<vmem>>, vector<1x512xbf16>
    %c0_27 = arith.constant 0 : index
    %c0_28 = arith.constant 0 : index
    %21 = vector.load %arg14[%c0_27, %c0_28] : memref<512x128xbf16, #tpu.memory_space<vmem>>, vector<512x128xbf16>
    %c0_29 = arith.constant 0 : index
    %c0_30 = arith.constant 0 : index
    %22 = vector.load %arg15[%c0_29, %c0_30] : memref<1x128xbf16, #tpu.memory_space<vmem>>, vector<1x128xbf16>
    %cst_31 = arith.constant dense<0.000000e+00> : vector<16xf32>
    %23 = vector.multi_reduction <add>, %10, %cst_31 [1] : vector<16x128xf32> to vector<16xf32>
    %24 = vector.shape_cast %23 : vector<16xf32> to vector<16x1xf32>
    %cst_32 = arith.constant 1.280000e+02 : f32
    %25 = vector.broadcast %cst_32 : f32 to vector<16x1xf32>
    %26 = arith.divf %24, %25 : vector<16x1xf32>
    %27 = vector.broadcast %26 : vector<16x1xf32> to vector<16x128xf32>
    %28 = arith.subf %10, %27 : vector<16x128xf32>
    %29 = arith.mulf %28, %28 : vector<16x128xf32>
    %cst_33 = arith.constant dense<0.000000e+00> : vector<16xf32>
    %30 = vector.multi_reduction <add>, %29, %cst_33 [1] : vector<16x128xf32> to vector<16xf32>
    %31 = vector.shape_cast %30 : vector<16xf32> to vector<16x1xf32>
    %cst_34 = arith.constant 1.280000e+02 : f32
    %32 = vector.broadcast %cst_34 : f32 to vector<16x1xf32>
    %33 = arith.divf %31, %32 : vector<16x1xf32>
    %34 = vector.broadcast %26 : vector<16x1xf32> to vector<16x128xf32>
    %35 = arith.subf %10, %34 : vector<16x128xf32>
    %cst_35 = arith.constant 9.99999974E-6 : f32
    %36 = vector.broadcast %cst_35 : f32 to vector<16x1xf32>
    %37 = arith.addf %33, %36 : vector<16x1xf32>
    %38 = math.rsqrt %37 : vector<16x1xf32>
    %39 = vector.broadcast %38 : vector<16x1xf32> to vector<16x128xf32>
    %40 = arith.mulf %35, %39 : vector<16x128xf32>
    %41 = arith.extf %11 : vector<1x128xbf16> to vector<1x128xf32>
    %42 = vector.broadcast %41 : vector<1x128xf32> to vector<16x128xf32>
    %43 = arith.mulf %40, %42 : vector<16x128xf32>
    %44 = arith.extf %12 : vector<1x128xbf16> to vector<1x128xf32>
    %45 = vector.broadcast %44 : vector<1x128xf32> to vector<16x128xf32>
    %46 = arith.addf %43, %45 : vector<16x128xf32>
    %47 = arith.truncf %46 : vector<16x128xf32> to vector<16x128xbf16>
    %cst_36 = arith.constant dense<0.000000e+00> : vector<16x384xf32>
    %48 = tpu.matmul %47, %13, %cst_36 {dimension_numbers = #tpu.dot_dimension_numbers<[1], [0], [0], [1], [0, 0, 1, 1], [], []>} : vector<16x128xbf16>, vector<128x384xbf16>, vector<16x384xf32> -> vector<16x384xf32>
    %49 = arith.extf %14 : vector<1x384xbf16> to vector<1x384xf32>
    %50 = vector.broadcast %49 : vector<1x384xf32> to vector<16x384xf32>
    %51 = arith.addf %48, %50 : vector<16x384xf32>
    %52 = arith.truncf %51 : vector<16x384xf32> to vector<16x384xbf16>
    %53 = tpu.iota {dimensions = array<i32: 0>} : vector<16x16xi32>
    %54 = tpu.iota {dimensions = array<i32: 1>} : vector<16x16xi32>
    %55 = arith.sitofp %53 : vector<16x16xi32> to vector<16x16xf32>
    %cst_37 = arith.constant 5.000000e-01 : f32
    %56 = vector.broadcast %cst_37 : f32 to vector<16x16xf32>
    %57 = arith.addf %55, %56 : vector<16x16xf32>
    %cst_38 = arith.constant 2.500000e-01 : f32
    %58 = vector.broadcast %cst_38 : f32 to vector<16x16xf32>
    %59 = arith.mulf %57, %58 : vector<16x16xf32>
    %60 = math.floor %59 : vector<16x16xf32>
    %61 = arith.sitofp %54 : vector<16x16xi32> to vector<16x16xf32>
    %cst_39 = arith.constant 5.000000e-01 : f32
    %62 = vector.broadcast %cst_39 : f32 to vector<16x16xf32>
    %63 = arith.addf %61, %62 : vector<16x16xf32>
    %cst_40 = arith.constant 2.500000e-01 : f32
    %64 = vector.broadcast %cst_40 : f32 to vector<16x16xf32>
    %65 = arith.mulf %63, %64 : vector<16x16xf32>
    %66 = math.floor %65 : vector<16x16xf32>
    %67 = arith.cmpf oeq, %60, %66 : vector<16x16xf32>
    %cst_41 = arith.constant 0.000000e+00 : f32
    %cst_42 = arith.constant -1.000000e+30 : f32
    %68 = vector.broadcast %cst_41 : f32 to vector<16x16xf32>
    %69 = vector.broadcast %cst_42 : f32 to vector<16x16xf32>
    %70 = arith.select %67, %68, %69 : vector<16x16xi1>, vector<16x16xf32>
    %71 = vector.extract_strided_slice %52 {offsets = [0, 0], sizes = [16, 32], strides = [1, 1]} : vector<16x384xbf16> to vector<16x32xbf16>
    %72 = vector.extract_strided_slice %52 {offsets = [0, 128], sizes = [16, 32], strides = [1, 1]} : vector<16x384xbf16> to vector<16x32xbf16>
    %73 = vector.extract_strided_slice %52 {offsets = [0, 256], sizes = [16, 32], strides = [1, 1]} : vector<16x384xbf16> to vector<16x32xbf16>
    %cst_43 = arith.constant dense<0.000000e+00> : vector<16x16xf32>
    %74 = tpu.matmul %71, %72, %cst_43 {dimension_numbers = #tpu.dot_dimension_numbers<[1], [1], [0], [0], [0, 0, 1, 0], [], []>} : vector<16x32xbf16>, vector<16x32xbf16>, vector<16x16xf32> -> vector<16x16xf32>
    %cst_44 = arith.constant 0.176776692 : f32
    %75 = vector.broadcast %cst_44 : f32 to vector<16x16xf32>
    %76 = arith.mulf %74, %75 : vector<16x16xf32>
    %77 = arith.addf %76, %70 : vector<16x16xf32>
    %cst_45 = arith.constant dense<0xFF800000> : vector<16xf32>
    %78 = vector.multi_reduction <maximumf>, %77, %cst_45 [1] : vector<16x16xf32> to vector<16xf32>
    %79 = vector.shape_cast %78 : vector<16xf32> to vector<16x1xf32>
    %80 = vector.broadcast %79 : vector<16x1xf32> to vector<16x16xf32>
    %81 = arith.subf %77, %80 : vector<16x16xf32>
    %82 = math.exp %81 : vector<16x16xf32>
    %cst_46 = arith.constant dense<0.000000e+00> : vector<16xf32>
    %83 = vector.multi_reduction <add>, %82, %cst_46 [1] : vector<16x16xf32> to vector<16xf32>
    %84 = vector.shape_cast %83 : vector<16xf32> to vector<16x1xf32>
    %85 = tpu.reciprocal %84 {approx = true} : vector<16x1xf32> -> vector<16x1xf32>
    %86 = vector.broadcast %85 : vector<16x1xf32> to vector<16x16xf32>
    %87 = arith.mulf %82, %86 : vector<16x16xf32>
    %88 = arith.truncf %87 : vector<16x16xf32> to vector<16x16xbf16>
    %cst_47 = arith.constant dense<0.000000e+00> : vector<16x32xf32>
    %89 = tpu.matmul %88, %73, %cst_47 {dimension_numbers = #tpu.dot_dimension_numbers<[1], [0], [0], [1], [0, 0, 1, 1], [], []>} : vector<16x16xbf16>, vector<16x32xbf16>, vector<16x32xf32> -> vector<16x32xf32>
    %90 = vector.extract_strided_slice %52 {offsets = [0, 32], sizes = [16, 32], strides = [1, 1]} : vector<16x384xbf16> to vector<16x32xbf16>
    %91 = vector.extract_strided_slice %52 {offsets = [0, 160], sizes = [16, 32], strides = [1, 1]} : vector<16x384xbf16> to vector<16x32xbf16>
    %92 = vector.extract_strided_slice %52 {offsets = [0, 288], sizes = [16, 32], strides = [1, 1]} : vector<16x384xbf16> to vector<16x32xbf16>
    %cst_48 = arith.constant dense<0.000000e+00> : vector<16x16xf32>
    %93 = tpu.matmul %90, %91, %cst_48 {dimension_numbers = #tpu.dot_dimension_numbers<[1], [1], [0], [0], [0, 0, 1, 0], [], []>} : vector<16x32xbf16>, vector<16x32xbf16>, vector<16x16xf32> -> vector<16x16xf32>
    %cst_49 = arith.constant 0.176776692 : f32
    %94 = vector.broadcast %cst_49 : f32 to vector<16x16xf32>
    %95 = arith.mulf %93, %94 : vector<16x16xf32>
    %96 = arith.addf %95, %70 : vector<16x16xf32>
    %cst_50 = arith.constant dense<0xFF800000> : vector<16xf32>
    %97 = vector.multi_reduction <maximumf>, %96, %cst_50 [1] : vector<16x16xf32> to vector<16xf32>
    %98 = vector.shape_cast %97 : vector<16xf32> to vector<16x1xf32>
    %99 = vector.broadcast %98 : vector<16x1xf32> to vector<16x16xf32>
    %100 = arith.subf %96, %99 : vector<16x16xf32>
    %101 = math.exp %100 : vector<16x16xf32>
    %cst_51 = arith.constant dense<0.000000e+00> : vector<16xf32>
    %102 = vector.multi_reduction <add>, %101, %cst_51 [1] : vector<16x16xf32> to vector<16xf32>
    %103 = vector.shape_cast %102 : vector<16xf32> to vector<16x1xf32>
    %104 = tpu.reciprocal %103 {approx = true} : vector<16x1xf32> -> vector<16x1xf32>
    %105 = vector.broadcast %104 : vector<16x1xf32> to vector<16x16xf32>
    %106 = arith.mulf %101, %105 : vector<16x16xf32>
    %107 = arith.truncf %106 : vector<16x16xf32> to vector<16x16xbf16>
    %cst_52 = arith.constant dense<0.000000e+00> : vector<16x32xf32>
    %108 = tpu.matmul %107, %92, %cst_52 {dimension_numbers = #tpu.dot_dimension_numbers<[1], [0], [0], [1], [0, 0, 1, 1], [], []>} : vector<16x16xbf16>, vector<16x32xbf16>, vector<16x32xf32> -> vector<16x32xf32>
    %109 = vector.extract_strided_slice %52 {offsets = [0, 64], sizes = [16, 32], strides = [1, 1]} : vector<16x384xbf16> to vector<16x32xbf16>
    %110 = vector.extract_strided_slice %52 {offsets = [0, 192], sizes = [16, 32], strides = [1, 1]} : vector<16x384xbf16> to vector<16x32xbf16>
    %111 = vector.extract_strided_slice %52 {offsets = [0, 320], sizes = [16, 32], strides = [1, 1]} : vector<16x384xbf16> to vector<16x32xbf16>
    %cst_53 = arith.constant dense<0.000000e+00> : vector<16x16xf32>
    %112 = tpu.matmul %109, %110, %cst_53 {dimension_numbers = #tpu.dot_dimension_numbers<[1], [1], [0], [0], [0, 0, 1, 0], [], []>} : vector<16x32xbf16>, vector<16x32xbf16>, vector<16x16xf32> -> vector<16x16xf32>
    %cst_54 = arith.constant 0.176776692 : f32
    %113 = vector.broadcast %cst_54 : f32 to vector<16x16xf32>
    %114 = arith.mulf %112, %113 : vector<16x16xf32>
    %115 = arith.addf %114, %70 : vector<16x16xf32>
    %cst_55 = arith.constant dense<0xFF800000> : vector<16xf32>
    %116 = vector.multi_reduction <maximumf>, %115, %cst_55 [1] : vector<16x16xf32> to vector<16xf32>
    %117 = vector.shape_cast %116 : vector<16xf32> to vector<16x1xf32>
    %118 = vector.broadcast %117 : vector<16x1xf32> to vector<16x16xf32>
    %119 = arith.subf %115, %118 : vector<16x16xf32>
    %120 = math.exp %119 : vector<16x16xf32>
    %cst_56 = arith.constant dense<0.000000e+00> : vector<16xf32>
    %121 = vector.multi_reduction <add>, %120, %cst_56 [1] : vector<16x16xf32> to vector<16xf32>
    %122 = vector.shape_cast %121 : vector<16xf32> to vector<16x1xf32>
    %123 = tpu.reciprocal %122 {approx = true} : vector<16x1xf32> -> vector<16x1xf32>
    %124 = vector.broadcast %123 : vector<16x1xf32> to vector<16x16xf32>
    %125 = arith.mulf %120, %124 : vector<16x16xf32>
    %126 = arith.truncf %125 : vector<16x16xf32> to vector<16x16xbf16>
    %cst_57 = arith.constant dense<0.000000e+00> : vector<16x32xf32>
    %127 = tpu.matmul %126, %111, %cst_57 {dimension_numbers = #tpu.dot_dimension_numbers<[1], [0], [0], [1], [0, 0, 1, 1], [], []>} : vector<16x16xbf16>, vector<16x32xbf16>, vector<16x32xf32> -> vector<16x32xf32>
    %128 = vector.extract_strided_slice %52 {offsets = [0, 96], sizes = [16, 32], strides = [1, 1]} : vector<16x384xbf16> to vector<16x32xbf16>
    %129 = vector.extract_strided_slice %52 {offsets = [0, 224], sizes = [16, 32], strides = [1, 1]} : vector<16x384xbf16> to vector<16x32xbf16>
    %130 = vector.extract_strided_slice %52 {offsets = [0, 352], sizes = [16, 32], strides = [1, 1]} : vector<16x384xbf16> to vector<16x32xbf16>
    %cst_58 = arith.constant dense<0.000000e+00> : vector<16x16xf32>
    %131 = tpu.matmul %128, %129, %cst_58 {dimension_numbers = #tpu.dot_dimension_numbers<[1], [1], [0], [0], [0, 0, 1, 0], [], []>} : vector<16x32xbf16>, vector<16x32xbf16>, vector<16x16xf32> -> vector<16x16xf32>
    %cst_59 = arith.constant 0.176776692 : f32
    %132 = vector.broadcast %cst_59 : f32 to vector<16x16xf32>
    %133 = arith.mulf %131, %132 : vector<16x16xf32>
    %134 = arith.addf %133, %70 : vector<16x16xf32>
    %cst_60 = arith.constant dense<0xFF800000> : vector<16xf32>
    %135 = vector.multi_reduction <maximumf>, %134, %cst_60 [1] : vector<16x16xf32> to vector<16xf32>
    %136 = vector.shape_cast %135 : vector<16xf32> to vector<16x1xf32>
    %137 = vector.broadcast %136 : vector<16x1xf32> to vector<16x16xf32>
    %138 = arith.subf %134, %137 : vector<16x16xf32>
    %139 = math.exp %138 : vector<16x16xf32>
    %cst_61 = arith.constant dense<0.000000e+00> : vector<16xf32>
    %140 = vector.multi_reduction <add>, %139, %cst_61 [1] : vector<16x16xf32> to vector<16xf32>
    %141 = vector.shape_cast %140 : vector<16xf32> to vector<16x1xf32>
    %142 = tpu.reciprocal %141 {approx = true} : vector<16x1xf32> -> vector<16x1xf32>
    %143 = vector.broadcast %142 : vector<16x1xf32> to vector<16x16xf32>
    %144 = arith.mulf %139, %143 : vector<16x16xf32>
    %145 = arith.truncf %144 : vector<16x16xf32> to vector<16x16xbf16>
    %cst_62 = arith.constant dense<0.000000e+00> : vector<16x32xf32>
    %146 = tpu.matmul %145, %130, %cst_62 {dimension_numbers = #tpu.dot_dimension_numbers<[1], [0], [0], [1], [0, 0, 1, 1], [], []>} : vector<16x16xbf16>, vector<16x32xbf16>, vector<16x32xf32> -> vector<16x32xf32>
    %147 = tpu.concatenate %89, %108, %127, %146 in 1 : vector<16x32xf32>, vector<16x32xf32>, vector<16x32xf32>, vector<16x32xf32> -> vector<16x128xf32>
    %148 = arith.truncf %147 : vector<16x128xf32> to vector<16x128xbf16>
    %cst_63 = arith.constant dense<0.000000e+00> : vector<16x128xf32>
    %149 = tpu.matmul %148, %15, %cst_63 {dimension_numbers = #tpu.dot_dimension_numbers<[1], [0], [0], [1], [0, 0, 1, 1], [], []>} : vector<16x128xbf16>, vector<128x128xbf16>, vector<16x128xf32> -> vector<16x128xf32>
    %150 = arith.addf %10, %149 : vector<16x128xf32>
    %151 = arith.extf %16 : vector<1x128xbf16> to vector<1x128xf32>
    %152 = vector.broadcast %151 : vector<1x128xf32> to vector<16x128xf32>
    %153 = arith.addf %150, %152 : vector<16x128xf32>
    %cst_64 = arith.constant dense<0.000000e+00> : vector<16xf32>
    %154 = vector.multi_reduction <add>, %153, %cst_64 [1] : vector<16x128xf32> to vector<16xf32>
    %155 = vector.shape_cast %154 : vector<16xf32> to vector<16x1xf32>
    %cst_65 = arith.constant 1.280000e+02 : f32
    %156 = vector.broadcast %cst_65 : f32 to vector<16x1xf32>
    %157 = arith.divf %155, %156 : vector<16x1xf32>
    %158 = vector.broadcast %157 : vector<16x1xf32> to vector<16x128xf32>
    %159 = arith.subf %153, %158 : vector<16x128xf32>
    %160 = arith.mulf %159, %159 : vector<16x128xf32>
    %cst_66 = arith.constant dense<0.000000e+00> : vector<16xf32>
    %161 = vector.multi_reduction <add>, %160, %cst_66 [1] : vector<16x128xf32> to vector<16xf32>
    %162 = vector.shape_cast %161 : vector<16xf32> to vector<16x1xf32>
    %cst_67 = arith.constant 1.280000e+02 : f32
    %163 = vector.broadcast %cst_67 : f32 to vector<16x1xf32>
    %164 = arith.divf %162, %163 : vector<16x1xf32>
    %165 = vector.broadcast %157 : vector<16x1xf32> to vector<16x128xf32>
    %166 = arith.subf %153, %165 : vector<16x128xf32>
    %cst_68 = arith.constant 9.99999974E-6 : f32
    %167 = vector.broadcast %cst_68 : f32 to vector<16x1xf32>
    %168 = arith.addf %164, %167 : vector<16x1xf32>
    %169 = math.rsqrt %168 : vector<16x1xf32>
    %170 = vector.broadcast %169 : vector<16x1xf32> to vector<16x128xf32>
    %171 = arith.mulf %166, %170 : vector<16x128xf32>
    %172 = arith.extf %17 : vector<1x128xbf16> to vector<1x128xf32>
    %173 = vector.broadcast %172 : vector<1x128xf32> to vector<16x128xf32>
    %174 = arith.mulf %171, %173 : vector<16x128xf32>
    %175 = arith.extf %18 : vector<1x128xbf16> to vector<1x128xf32>
    %176 = vector.broadcast %175 : vector<1x128xf32> to vector<16x128xf32>
    %177 = arith.addf %174, %176 : vector<16x128xf32>
    %178 = arith.truncf %177 : vector<16x128xf32> to vector<16x128xbf16>
    %cst_69 = arith.constant dense<0.000000e+00> : vector<16x512xf32>
    %179 = tpu.matmul %178, %19, %cst_69 {dimension_numbers = #tpu.dot_dimension_numbers<[1], [0], [0], [1], [0, 0, 1, 1], [], []>} : vector<16x128xbf16>, vector<128x512xbf16>, vector<16x512xf32> -> vector<16x512xf32>
    %180 = arith.extf %20 : vector<1x512xbf16> to vector<1x512xf32>
    %181 = vector.broadcast %180 : vector<1x512xf32> to vector<16x512xf32>
    %182 = arith.addf %179, %181 : vector<16x512xf32>
    %183 = arith.mulf %182, %182 : vector<16x512xf32>
    %184 = arith.mulf %182, %183 : vector<16x512xf32>
    %cst_70 = arith.constant 4.471500e-02 : f32
    %185 = vector.broadcast %cst_70 : f32 to vector<16x512xf32>
    %186 = arith.mulf %185, %184 : vector<16x512xf32>
    %187 = arith.addf %182, %186 : vector<16x512xf32>
    %cst_71 = arith.constant 0.797884583 : f32
    %188 = vector.broadcast %cst_71 : f32 to vector<16x512xf32>
    %189 = arith.mulf %188, %187 : vector<16x512xf32>
    %190 = math.tanh %189 : vector<16x512xf32>
    %cst_72 = arith.constant 1.000000e+00 : f32
    %191 = vector.broadcast %cst_72 : f32 to vector<16x512xf32>
    %192 = arith.addf %191, %190 : vector<16x512xf32>
    %cst_73 = arith.constant 5.000000e-01 : f32
    %193 = vector.broadcast %cst_73 : f32 to vector<16x512xf32>
    %194 = arith.mulf %193, %192 : vector<16x512xf32>
    %195 = arith.mulf %182, %194 : vector<16x512xf32>
    %196 = arith.truncf %195 : vector<16x512xf32> to vector<16x512xbf16>
    %cst_74 = arith.constant dense<0.000000e+00> : vector<16x128xf32>
    %197 = tpu.matmul %196, %21, %cst_74 {dimension_numbers = #tpu.dot_dimension_numbers<[1], [0], [0], [1], [0, 0, 1, 1], [], []>} : vector<16x512xbf16>, vector<512x128xbf16>, vector<16x128xf32> -> vector<16x128xf32>
    %198 = arith.extf %22 : vector<1x128xbf16> to vector<1x128xf32>
    %199 = vector.broadcast %198 : vector<1x128xf32> to vector<16x128xf32>
    %200 = arith.addf %197, %199 : vector<16x128xf32>
    %201 = arith.addf %153, %200 : vector<16x128xf32>
    %202 = arith.truncf %201 : vector<16x128xf32> to vector<16x128xbf16>
    %c0_75 = arith.constant 0 : index
    %c0_76 = arith.constant 0 : index
    %203 = vector.load %arg16[%c0_75, %c0_76] : memref<128x128xbf16, #tpu.memory_space<vmem>>, vector<128x128xbf16>
    %cst_77 = arith.constant dense<0.000000e+00> : vector<16x128xf32>
    %204 = tpu.matmul %202, %203, %cst_77 {dimension_numbers = #tpu.dot_dimension_numbers<[1], [0], [0], [1], [0, 0, 1, 1], [], []>} : vector<16x128xbf16>, vector<128x128xbf16>, vector<16x128xf32> -> vector<16x128xf32>
    %c0_78 = arith.constant 0 : index
    %c0_79 = arith.constant 0 : index
    %205 = vector.load %arg17[%c0_78, %c0_79] : memref<1x128xbf16, #tpu.memory_space<vmem>>, vector<1x128xbf16>
    %206 = arith.extf %205 : vector<1x128xbf16> to vector<1x128xf32>
    %207 = vector.broadcast %206 : vector<1x128xf32> to vector<16x128xf32>
    %208 = arith.addf %204, %207 : vector<16x128xf32>
    %209 = arith.truncf %208 : vector<16x128xf32> to vector<16x128xbf16>
    %c0_80 = arith.constant 0 : index
    %c0_81 = arith.constant 0 : index
    %210 = vector.load %arg18[%c0_80, %c0_81] : memref<16x128xbf16, #tpu.memory_space<vmem>>, vector<16x128xbf16>
    tpu.vector_store %arg18[%c0_80, %c0_81], %209 {strides = array<i32>} : memref<16x128xbf16, #tpu.memory_space<vmem>>, vector<16x128xbf16>,
    return
  }
}

module attributes {stable_mosaic.version = 11 : i64} {
  func.func @_lm_kernel(%arg0: memref<32x128xbf16, #tpu.memory_space<vmem>>, %arg1: memref<1x128xbf16, #tpu.memory_space<vmem>>, %arg2: memref<1x128xbf16, #tpu.memory_space<vmem>>, %arg3: memref<128x384xbf16, #tpu.memory_space<vmem>>, %arg4: memref<1x384xbf16, #tpu.memory_space<vmem>>, %arg5: memref<128x128xbf16, #tpu.memory_space<vmem>>, %arg6: memref<1x128xbf16, #tpu.memory_space<vmem>>, %arg7: memref<1x128xbf16, #tpu.memory_space<vmem>>, %arg8: memref<1x128xbf16, #tpu.memory_space<vmem>>, %arg9: memref<128x512xbf16, #tpu.memory_space<vmem>>, %arg10: memref<1x512xbf16, #tpu.memory_space<vmem>>, %arg11: memref<512x128xbf16, #tpu.memory_space<vmem>>, %arg12: memref<1x128xbf16, #tpu.memory_space<vmem>>, %arg13: memref<1x128xbf16, #tpu.memory_space<vmem>>, %arg14: memref<1x128xbf16, #tpu.memory_space<vmem>>, %arg15: memref<128x128xbf16, #tpu.memory_space<vmem>>, %arg16: memref<1x128xbf16, #tpu.memory_space<vmem>>, %arg17: memref<2x128xf32, #tpu.memory_space<vmem>>, %arg18: memref<2x1xi32, #tpu.memory_space<vmem>>) attributes {dimension_semantics = [], scalar_prefetch = 0 : i64, scratch_operands = 0 : i64, tpu.core_type = #tpu.core_type<tc>} {
    %c0 = arith.constant 0 : index
    %c0_0 = arith.constant 0 : index
    %0 = vector.load %arg0[%c0, %c0_0] : memref<32x128xbf16, #tpu.memory_space<vmem>>, vector<32x128xbf16>
    %1 = arith.extf %0 : vector<32x128xbf16> to vector<32x128xf32>
    %c0_1 = arith.constant 0 : index
    %c0_2 = arith.constant 0 : index
    %2 = vector.load %arg1[%c0_1, %c0_2] : memref<1x128xbf16, #tpu.memory_space<vmem>>, vector<1x128xbf16>
    %c0_3 = arith.constant 0 : index
    %c0_4 = arith.constant 0 : index
    %3 = vector.load %arg2[%c0_3, %c0_4] : memref<1x128xbf16, #tpu.memory_space<vmem>>, vector<1x128xbf16>
    %c0_5 = arith.constant 0 : index
    %c0_6 = arith.constant 0 : index
    %4 = vector.load %arg3[%c0_5, %c0_6] : memref<128x384xbf16, #tpu.memory_space<vmem>>, vector<128x384xbf16>
    %c0_7 = arith.constant 0 : index
    %c0_8 = arith.constant 0 : index
    %5 = vector.load %arg4[%c0_7, %c0_8] : memref<1x384xbf16, #tpu.memory_space<vmem>>, vector<1x384xbf16>
    %c0_9 = arith.constant 0 : index
    %c0_10 = arith.constant 0 : index
    %6 = vector.load %arg5[%c0_9, %c0_10] : memref<128x128xbf16, #tpu.memory_space<vmem>>, vector<128x128xbf16>
    %c0_11 = arith.constant 0 : index
    %c0_12 = arith.constant 0 : index
    %7 = vector.load %arg6[%c0_11, %c0_12] : memref<1x128xbf16, #tpu.memory_space<vmem>>, vector<1x128xbf16>
    %c0_13 = arith.constant 0 : index
    %c0_14 = arith.constant 0 : index
    %8 = vector.load %arg7[%c0_13, %c0_14] : memref<1x128xbf16, #tpu.memory_space<vmem>>, vector<1x128xbf16>
    %c0_15 = arith.constant 0 : index
    %c0_16 = arith.constant 0 : index
    %9 = vector.load %arg8[%c0_15, %c0_16] : memref<1x128xbf16, #tpu.memory_space<vmem>>, vector<1x128xbf16>
    %c0_17 = arith.constant 0 : index
    %c0_18 = arith.constant 0 : index
    %10 = vector.load %arg9[%c0_17, %c0_18] : memref<128x512xbf16, #tpu.memory_space<vmem>>, vector<128x512xbf16>
    %c0_19 = arith.constant 0 : index
    %c0_20 = arith.constant 0 : index
    %11 = vector.load %arg10[%c0_19, %c0_20] : memref<1x512xbf16, #tpu.memory_space<vmem>>, vector<1x512xbf16>
    %c0_21 = arith.constant 0 : index
    %c0_22 = arith.constant 0 : index
    %12 = vector.load %arg11[%c0_21, %c0_22] : memref<512x128xbf16, #tpu.memory_space<vmem>>, vector<512x128xbf16>
    %c0_23 = arith.constant 0 : index
    %c0_24 = arith.constant 0 : index
    %13 = vector.load %arg12[%c0_23, %c0_24] : memref<1x128xbf16, #tpu.memory_space<vmem>>, vector<1x128xbf16>
    %cst = arith.constant dense<0.000000e+00> : vector<32xf32>
    %14 = vector.multi_reduction <add>, %1, %cst [1] : vector<32x128xf32> to vector<32xf32>
    %15 = vector.shape_cast %14 : vector<32xf32> to vector<32x1xf32>
    %cst_25 = arith.constant 1.280000e+02 : f32
    %16 = vector.broadcast %cst_25 : f32 to vector<32x1xf32>
    %17 = arith.divf %15, %16 : vector<32x1xf32>
    %18 = vector.broadcast %17 : vector<32x1xf32> to vector<32x128xf32>
    %19 = arith.subf %1, %18 : vector<32x128xf32>
    %20 = arith.mulf %19, %19 : vector<32x128xf32>
    %cst_26 = arith.constant dense<0.000000e+00> : vector<32xf32>
    %21 = vector.multi_reduction <add>, %20, %cst_26 [1] : vector<32x128xf32> to vector<32xf32>
    %22 = vector.shape_cast %21 : vector<32xf32> to vector<32x1xf32>
    %cst_27 = arith.constant 1.280000e+02 : f32
    %23 = vector.broadcast %cst_27 : f32 to vector<32x1xf32>
    %24 = arith.divf %22, %23 : vector<32x1xf32>
    %25 = vector.broadcast %17 : vector<32x1xf32> to vector<32x128xf32>
    %26 = arith.subf %1, %25 : vector<32x128xf32>
    %cst_28 = arith.constant 9.99999974E-6 : f32
    %27 = vector.broadcast %cst_28 : f32 to vector<32x1xf32>
    %28 = arith.addf %24, %27 : vector<32x1xf32>
    %29 = math.rsqrt %28 : vector<32x1xf32>
    %30 = vector.broadcast %29 : vector<32x1xf32> to vector<32x128xf32>
    %31 = arith.mulf %26, %30 : vector<32x128xf32>
    %32 = arith.extf %2 : vector<1x128xbf16> to vector<1x128xf32>
    %33 = vector.broadcast %32 : vector<1x128xf32> to vector<32x128xf32>
    %34 = arith.mulf %31, %33 : vector<32x128xf32>
    %35 = arith.extf %3 : vector<1x128xbf16> to vector<1x128xf32>
    %36 = vector.broadcast %35 : vector<1x128xf32> to vector<32x128xf32>
    %37 = arith.addf %34, %36 : vector<32x128xf32>
    %38 = arith.truncf %37 : vector<32x128xf32> to vector<32x128xbf16>
    %cst_29 = arith.constant dense<0.000000e+00> : vector<32x384xf32>
    %39 = tpu.matmul %38, %4, %cst_29 {dimension_numbers = #tpu.dot_dimension_numbers<[1], [0], [0], [1], [0, 0, 1, 1], [], []>} : vector<32x128xbf16>, vector<128x384xbf16>, vector<32x384xf32> -> vector<32x384xf32>
    %40 = arith.extf %5 : vector<1x384xbf16> to vector<1x384xf32>
    %41 = vector.broadcast %40 : vector<1x384xf32> to vector<32x384xf32>
    %42 = arith.addf %39, %41 : vector<32x384xf32>
    %43 = arith.truncf %42 : vector<32x384xf32> to vector<32x384xbf16>
    %44 = tpu.iota {dimensions = array<i32: 0>} : vector<32x32xi32>
    %45 = tpu.iota {dimensions = array<i32: 1>} : vector<32x32xi32>
    %46 = arith.sitofp %44 : vector<32x32xi32> to vector<32x32xf32>
    %cst_30 = arith.constant 5.000000e-01 : f32
    %47 = vector.broadcast %cst_30 : f32 to vector<32x32xf32>
    %48 = arith.addf %46, %47 : vector<32x32xf32>
    %cst_31 = arith.constant 0.0833333358 : f32
    %49 = vector.broadcast %cst_31 : f32 to vector<32x32xf32>
    %50 = arith.mulf %48, %49 : vector<32x32xf32>
    %51 = math.floor %50 : vector<32x32xf32>
    %52 = arith.sitofp %45 : vector<32x32xi32> to vector<32x32xf32>
    %cst_32 = arith.constant 5.000000e-01 : f32
    %53 = vector.broadcast %cst_32 : f32 to vector<32x32xf32>
    %54 = arith.addf %52, %53 : vector<32x32xf32>
    %cst_33 = arith.constant 0.0833333358 : f32
    %55 = vector.broadcast %cst_33 : f32 to vector<32x32xf32>
    %56 = arith.mulf %54, %55 : vector<32x32xf32>
    %57 = math.floor %56 : vector<32x32xf32>
    %58 = arith.cmpf oeq, %51, %57 : vector<32x32xf32>
    %59 = arith.cmpi sge, %44, %45 : vector<32x32xi32>
    %60 = arith.andi %58, %59 : vector<32x32xi1>
    %cst_34 = arith.constant 0.000000e+00 : f32
    %cst_35 = arith.constant -1.000000e+30 : f32
    %61 = vector.broadcast %cst_34 : f32 to vector<32x32xf32>
    %62 = vector.broadcast %cst_35 : f32 to vector<32x32xf32>
    %63 = arith.select %60, %61, %62 : vector<32x32xi1>, vector<32x32xf32>
    %64 = vector.extract_strided_slice %43 {offsets = [0, 0], sizes = [32, 32], strides = [1, 1]} : vector<32x384xbf16> to vector<32x32xbf16>
    %65 = vector.extract_strided_slice %43 {offsets = [0, 128], sizes = [32, 32], strides = [1, 1]} : vector<32x384xbf16> to vector<32x32xbf16>
    %66 = vector.extract_strided_slice %43 {offsets = [0, 256], sizes = [32, 32], strides = [1, 1]} : vector<32x384xbf16> to vector<32x32xbf16>
    %cst_36 = arith.constant dense<0.000000e+00> : vector<32x32xf32>
    %67 = tpu.matmul %64, %65, %cst_36 {dimension_numbers = #tpu.dot_dimension_numbers<[1], [1], [0], [0], [0, 0, 1, 0], [], []>} : vector<32x32xbf16>, vector<32x32xbf16>, vector<32x32xf32> -> vector<32x32xf32>
    %cst_37 = arith.constant 0.176776692 : f32
    %68 = vector.broadcast %cst_37 : f32 to vector<32x32xf32>
    %69 = arith.mulf %67, %68 : vector<32x32xf32>
    %70 = arith.addf %69, %63 : vector<32x32xf32>
    %cst_38 = arith.constant dense<0xFF800000> : vector<32xf32>
    %71 = vector.multi_reduction <maximumf>, %70, %cst_38 [1] : vector<32x32xf32> to vector<32xf32>
    %72 = vector.shape_cast %71 : vector<32xf32> to vector<32x1xf32>
    %73 = vector.broadcast %72 : vector<32x1xf32> to vector<32x32xf32>
    %74 = arith.subf %70, %73 : vector<32x32xf32>
    %75 = math.exp %74 : vector<32x32xf32>
    %cst_39 = arith.constant dense<0.000000e+00> : vector<32xf32>
    %76 = vector.multi_reduction <add>, %75, %cst_39 [1] : vector<32x32xf32> to vector<32xf32>
    %77 = vector.shape_cast %76 : vector<32xf32> to vector<32x1xf32>
    %78 = tpu.reciprocal %77 {approx = true} : vector<32x1xf32> -> vector<32x1xf32>
    %79 = vector.broadcast %78 : vector<32x1xf32> to vector<32x32xf32>
    %80 = arith.mulf %75, %79 : vector<32x32xf32>
    %81 = arith.truncf %80 : vector<32x32xf32> to vector<32x32xbf16>
    %cst_40 = arith.constant dense<0.000000e+00> : vector<32x32xf32>
    %82 = tpu.matmul %81, %66, %cst_40 {dimension_numbers = #tpu.dot_dimension_numbers<[1], [0], [0], [1], [0, 0, 1, 1], [], []>} : vector<32x32xbf16>, vector<32x32xbf16>, vector<32x32xf32> -> vector<32x32xf32>
    %83 = vector.extract_strided_slice %43 {offsets = [0, 32], sizes = [32, 32], strides = [1, 1]} : vector<32x384xbf16> to vector<32x32xbf16>
    %84 = vector.extract_strided_slice %43 {offsets = [0, 160], sizes = [32, 32], strides = [1, 1]} : vector<32x384xbf16> to vector<32x32xbf16>
    %85 = vector.extract_strided_slice %43 {offsets = [0, 288], sizes = [32, 32], strides = [1, 1]} : vector<32x384xbf16> to vector<32x32xbf16>
    %cst_41 = arith.constant dense<0.000000e+00> : vector<32x32xf32>
    %86 = tpu.matmul %83, %84, %cst_41 {dimension_numbers = #tpu.dot_dimension_numbers<[1], [1], [0], [0], [0, 0, 1, 0], [], []>} : vector<32x32xbf16>, vector<32x32xbf16>, vector<32x32xf32> -> vector<32x32xf32>
    %cst_42 = arith.constant 0.176776692 : f32
    %87 = vector.broadcast %cst_42 : f32 to vector<32x32xf32>
    %88 = arith.mulf %86, %87 : vector<32x32xf32>
    %89 = arith.addf %88, %63 : vector<32x32xf32>
    %cst_43 = arith.constant dense<0xFF800000> : vector<32xf32>
    %90 = vector.multi_reduction <maximumf>, %89, %cst_43 [1] : vector<32x32xf32> to vector<32xf32>
    %91 = vector.shape_cast %90 : vector<32xf32> to vector<32x1xf32>
    %92 = vector.broadcast %91 : vector<32x1xf32> to vector<32x32xf32>
    %93 = arith.subf %89, %92 : vector<32x32xf32>
    %94 = math.exp %93 : vector<32x32xf32>
    %cst_44 = arith.constant dense<0.000000e+00> : vector<32xf32>
    %95 = vector.multi_reduction <add>, %94, %cst_44 [1] : vector<32x32xf32> to vector<32xf32>
    %96 = vector.shape_cast %95 : vector<32xf32> to vector<32x1xf32>
    %97 = tpu.reciprocal %96 {approx = true} : vector<32x1xf32> -> vector<32x1xf32>
    %98 = vector.broadcast %97 : vector<32x1xf32> to vector<32x32xf32>
    %99 = arith.mulf %94, %98 : vector<32x32xf32>
    %100 = arith.truncf %99 : vector<32x32xf32> to vector<32x32xbf16>
    %cst_45 = arith.constant dense<0.000000e+00> : vector<32x32xf32>
    %101 = tpu.matmul %100, %85, %cst_45 {dimension_numbers = #tpu.dot_dimension_numbers<[1], [0], [0], [1], [0, 0, 1, 1], [], []>} : vector<32x32xbf16>, vector<32x32xbf16>, vector<32x32xf32> -> vector<32x32xf32>
    %102 = vector.extract_strided_slice %43 {offsets = [0, 64], sizes = [32, 32], strides = [1, 1]} : vector<32x384xbf16> to vector<32x32xbf16>
    %103 = vector.extract_strided_slice %43 {offsets = [0, 192], sizes = [32, 32], strides = [1, 1]} : vector<32x384xbf16> to vector<32x32xbf16>
    %104 = vector.extract_strided_slice %43 {offsets = [0, 320], sizes = [32, 32], strides = [1, 1]} : vector<32x384xbf16> to vector<32x32xbf16>
    %cst_46 = arith.constant dense<0.000000e+00> : vector<32x32xf32>
    %105 = tpu.matmul %102, %103, %cst_46 {dimension_numbers = #tpu.dot_dimension_numbers<[1], [1], [0], [0], [0, 0, 1, 0], [], []>} : vector<32x32xbf16>, vector<32x32xbf16>, vector<32x32xf32> -> vector<32x32xf32>
    %cst_47 = arith.constant 0.176776692 : f32
    %106 = vector.broadcast %cst_47 : f32 to vector<32x32xf32>
    %107 = arith.mulf %105, %106 : vector<32x32xf32>
    %108 = arith.addf %107, %63 : vector<32x32xf32>
    %cst_48 = arith.constant dense<0xFF800000> : vector<32xf32>
    %109 = vector.multi_reduction <maximumf>, %108, %cst_48 [1] : vector<32x32xf32> to vector<32xf32>
    %110 = vector.shape_cast %109 : vector<32xf32> to vector<32x1xf32>
    %111 = vector.broadcast %110 : vector<32x1xf32> to vector<32x32xf32>
    %112 = arith.subf %108, %111 : vector<32x32xf32>
    %113 = math.exp %112 : vector<32x32xf32>
    %cst_49 = arith.constant dense<0.000000e+00> : vector<32xf32>
    %114 = vector.multi_reduction <add>, %113, %cst_49 [1] : vector<32x32xf32> to vector<32xf32>
    %115 = vector.shape_cast %114 : vector<32xf32> to vector<32x1xf32>
    %116 = tpu.reciprocal %115 {approx = true} : vector<32x1xf32> -> vector<32x1xf32>
    %117 = vector.broadcast %116 : vector<32x1xf32> to vector<32x32xf32>
    %118 = arith.mulf %113, %117 : vector<32x32xf32>
    %119 = arith.truncf %118 : vector<32x32xf32> to vector<32x32xbf16>
    %cst_50 = arith.constant dense<0.000000e+00> : vector<32x32xf32>
    %120 = tpu.matmul %119, %104, %cst_50 {dimension_numbers = #tpu.dot_dimension_numbers<[1], [0], [0], [1], [0, 0, 1, 1], [], []>} : vector<32x32xbf16>, vector<32x32xbf16>, vector<32x32xf32> -> vector<32x32xf32>
    %121 = vector.extract_strided_slice %43 {offsets = [0, 96], sizes = [32, 32], strides = [1, 1]} : vector<32x384xbf16> to vector<32x32xbf16>
    %122 = vector.extract_strided_slice %43 {offsets = [0, 224], sizes = [32, 32], strides = [1, 1]} : vector<32x384xbf16> to vector<32x32xbf16>
    %123 = vector.extract_strided_slice %43 {offsets = [0, 352], sizes = [32, 32], strides = [1, 1]} : vector<32x384xbf16> to vector<32x32xbf16>
    %cst_51 = arith.constant dense<0.000000e+00> : vector<32x32xf32>
    %124 = tpu.matmul %121, %122, %cst_51 {dimension_numbers = #tpu.dot_dimension_numbers<[1], [1], [0], [0], [0, 0, 1, 0], [], []>} : vector<32x32xbf16>, vector<32x32xbf16>, vector<32x32xf32> -> vector<32x32xf32>
    %cst_52 = arith.constant 0.176776692 : f32
    %125 = vector.broadcast %cst_52 : f32 to vector<32x32xf32>
    %126 = arith.mulf %124, %125 : vector<32x32xf32>
    %127 = arith.addf %126, %63 : vector<32x32xf32>
    %cst_53 = arith.constant dense<0xFF800000> : vector<32xf32>
    %128 = vector.multi_reduction <maximumf>, %127, %cst_53 [1] : vector<32x32xf32> to vector<32xf32>
    %129 = vector.shape_cast %128 : vector<32xf32> to vector<32x1xf32>
    %130 = vector.broadcast %129 : vector<32x1xf32> to vector<32x32xf32>
    %131 = arith.subf %127, %130 : vector<32x32xf32>
    %132 = math.exp %131 : vector<32x32xf32>
    %cst_54 = arith.constant dense<0.000000e+00> : vector<32xf32>
    %133 = vector.multi_reduction <add>, %132, %cst_54 [1] : vector<32x32xf32> to vector<32xf32>
    %134 = vector.shape_cast %133 : vector<32xf32> to vector<32x1xf32>
    %135 = tpu.reciprocal %134 {approx = true} : vector<32x1xf32> -> vector<32x1xf32>
    %136 = vector.broadcast %135 : vector<32x1xf32> to vector<32x32xf32>
    %137 = arith.mulf %132, %136 : vector<32x32xf32>
    %138 = arith.truncf %137 : vector<32x32xf32> to vector<32x32xbf16>
    %cst_55 = arith.constant dense<0.000000e+00> : vector<32x32xf32>
    %139 = tpu.matmul %138, %123, %cst_55 {dimension_numbers = #tpu.dot_dimension_numbers<[1], [0], [0], [1], [0, 0, 1, 1], [], []>} : vector<32x32xbf16>, vector<32x32xbf16>, vector<32x32xf32> -> vector<32x32xf32>
    %140 = tpu.concatenate %82, %101, %120, %139 in 1 : vector<32x32xf32>, vector<32x32xf32>, vector<32x32xf32>, vector<32x32xf32> -> vector<32x128xf32>
    %141 = arith.truncf %140 : vector<32x128xf32> to vector<32x128xbf16>
    %cst_56 = arith.constant dense<0.000000e+00> : vector<32x128xf32>
    %142 = tpu.matmul %141, %6, %cst_56 {dimension_numbers = #tpu.dot_dimension_numbers<[1], [0], [0], [1], [0, 0, 1, 1], [], []>} : vector<32x128xbf16>, vector<128x128xbf16>, vector<32x128xf32> -> vector<32x128xf32>
    %143 = arith.addf %1, %142 : vector<32x128xf32>
    %144 = arith.extf %7 : vector<1x128xbf16> to vector<1x128xf32>
    %145 = vector.broadcast %144 : vector<1x128xf32> to vector<32x128xf32>
    %146 = arith.addf %143, %145 : vector<32x128xf32>
    %cst_57 = arith.constant dense<0.000000e+00> : vector<32xf32>
    %147 = vector.multi_reduction <add>, %146, %cst_57 [1] : vector<32x128xf32> to vector<32xf32>
    %148 = vector.shape_cast %147 : vector<32xf32> to vector<32x1xf32>
    %cst_58 = arith.constant 1.280000e+02 : f32
    %149 = vector.broadcast %cst_58 : f32 to vector<32x1xf32>
    %150 = arith.divf %148, %149 : vector<32x1xf32>
    %151 = vector.broadcast %150 : vector<32x1xf32> to vector<32x128xf32>
    %152 = arith.subf %146, %151 : vector<32x128xf32>
    %153 = arith.mulf %152, %152 : vector<32x128xf32>
    %cst_59 = arith.constant dense<0.000000e+00> : vector<32xf32>
    %154 = vector.multi_reduction <add>, %153, %cst_59 [1] : vector<32x128xf32> to vector<32xf32>
    %155 = vector.shape_cast %154 : vector<32xf32> to vector<32x1xf32>
    %cst_60 = arith.constant 1.280000e+02 : f32
    %156 = vector.broadcast %cst_60 : f32 to vector<32x1xf32>
    %157 = arith.divf %155, %156 : vector<32x1xf32>
    %158 = vector.broadcast %150 : vector<32x1xf32> to vector<32x128xf32>
    %159 = arith.subf %146, %158 : vector<32x128xf32>
    %cst_61 = arith.constant 9.99999974E-6 : f32
    %160 = vector.broadcast %cst_61 : f32 to vector<32x1xf32>
    %161 = arith.addf %157, %160 : vector<32x1xf32>
    %162 = math.rsqrt %161 : vector<32x1xf32>
    %163 = vector.broadcast %162 : vector<32x1xf32> to vector<32x128xf32>
    %164 = arith.mulf %159, %163 : vector<32x128xf32>
    %165 = arith.extf %8 : vector<1x128xbf16> to vector<1x128xf32>
    %166 = vector.broadcast %165 : vector<1x128xf32> to vector<32x128xf32>
    %167 = arith.mulf %164, %166 : vector<32x128xf32>
    %168 = arith.extf %9 : vector<1x128xbf16> to vector<1x128xf32>
    %169 = vector.broadcast %168 : vector<1x128xf32> to vector<32x128xf32>
    %170 = arith.addf %167, %169 : vector<32x128xf32>
    %171 = arith.truncf %170 : vector<32x128xf32> to vector<32x128xbf16>
    %cst_62 = arith.constant dense<0.000000e+00> : vector<32x512xf32>
    %172 = tpu.matmul %171, %10, %cst_62 {dimension_numbers = #tpu.dot_dimension_numbers<[1], [0], [0], [1], [0, 0, 1, 1], [], []>} : vector<32x128xbf16>, vector<128x512xbf16>, vector<32x512xf32> -> vector<32x512xf32>
    %173 = arith.extf %11 : vector<1x512xbf16> to vector<1x512xf32>
    %174 = vector.broadcast %173 : vector<1x512xf32> to vector<32x512xf32>
    %175 = arith.addf %172, %174 : vector<32x512xf32>
    %176 = arith.mulf %175, %175 : vector<32x512xf32>
    %177 = arith.mulf %175, %176 : vector<32x512xf32>
    %cst_63 = arith.constant 4.471500e-02 : f32
    %178 = vector.broadcast %cst_63 : f32 to vector<32x512xf32>
    %179 = arith.mulf %178, %177 : vector<32x512xf32>
    %180 = arith.addf %175, %179 : vector<32x512xf32>
    %cst_64 = arith.constant 0.797884583 : f32
    %181 = vector.broadcast %cst_64 : f32 to vector<32x512xf32>
    %182 = arith.mulf %181, %180 : vector<32x512xf32>
    %183 = math.tanh %182 : vector<32x512xf32>
    %cst_65 = arith.constant 1.000000e+00 : f32
    %184 = vector.broadcast %cst_65 : f32 to vector<32x512xf32>
    %185 = arith.addf %184, %183 : vector<32x512xf32>
    %cst_66 = arith.constant 5.000000e-01 : f32
    %186 = vector.broadcast %cst_66 : f32 to vector<32x512xf32>
    %187 = arith.mulf %186, %185 : vector<32x512xf32>
    %188 = arith.mulf %175, %187 : vector<32x512xf32>
    %189 = arith.truncf %188 : vector<32x512xf32> to vector<32x512xbf16>
    %cst_67 = arith.constant dense<0.000000e+00> : vector<32x128xf32>
    %190 = tpu.matmul %189, %12, %cst_67 {dimension_numbers = #tpu.dot_dimension_numbers<[1], [0], [0], [1], [0, 0, 1, 1], [], []>} : vector<32x512xbf16>, vector<512x128xbf16>, vector<32x128xf32> -> vector<32x128xf32>
    %191 = arith.extf %13 : vector<1x128xbf16> to vector<1x128xf32>
    %192 = vector.broadcast %191 : vector<1x128xf32> to vector<32x128xf32>
    %193 = arith.addf %190, %192 : vector<32x128xf32>
    %194 = arith.addf %146, %193 : vector<32x128xf32>
    %195 = vector.extract_strided_slice %194 {offsets = [11, 0], sizes = [1, 128], strides = [1, 1]} : vector<32x128xf32> to vector<1x128xf32>
    %196 = vector.extract_strided_slice %194 {offsets = [23, 0], sizes = [1, 128], strides = [1, 1]} : vector<32x128xf32> to vector<1x128xf32>
    %197 = tpu.concatenate %195, %196 in 0 : vector<1x128xf32>, vector<1x128xf32> -> vector<2x128xf32>
    %c0_68 = arith.constant 0 : index
    %c0_69 = arith.constant 0 : index
    %198 = vector.load %arg13[%c0_68, %c0_69] : memref<1x128xbf16, #tpu.memory_space<vmem>>, vector<1x128xbf16>
    %c0_70 = arith.constant 0 : index
    %c0_71 = arith.constant 0 : index
    %199 = vector.load %arg14[%c0_70, %c0_71] : memref<1x128xbf16, #tpu.memory_space<vmem>>, vector<1x128xbf16>
    %cst_72 = arith.constant dense<0.000000e+00> : vector<2xf32>
    %200 = vector.multi_reduction <add>, %197, %cst_72 [1] : vector<2x128xf32> to vector<2xf32>
    %201 = vector.shape_cast %200 : vector<2xf32> to vector<2x1xf32>
    %cst_73 = arith.constant 1.280000e+02 : f32
    %202 = vector.broadcast %cst_73 : f32 to vector<2x1xf32>
    %203 = arith.divf %201, %202 : vector<2x1xf32>
    %204 = vector.broadcast %203 : vector<2x1xf32> to vector<2x128xf32>
    %205 = arith.subf %197, %204 : vector<2x128xf32>
    %206 = arith.mulf %205, %205 : vector<2x128xf32>
    %cst_74 = arith.constant dense<0.000000e+00> : vector<2xf32>
    %207 = vector.multi_reduction <add>, %206, %cst_74 [1] : vector<2x128xf32> to vector<2xf32>
    %208 = vector.shape_cast %207 : vector<2xf32> to vector<2x1xf32>
    %cst_75 = arith.constant 1.280000e+02 : f32
    %209 = vector.broadcast %cst_75 : f32 to vector<2x1xf32>
    %210 = arith.divf %208, %209 : vector<2x1xf32>
    %211 = vector.broadcast %203 : vector<2x1xf32> to vector<2x128xf32>
    %212 = arith.subf %197, %211 : vector<2x128xf32>
    %cst_76 = arith.constant 9.99999974E-6 : f32
    %213 = vector.broadcast %cst_76 : f32 to vector<2x1xf32>
    %214 = arith.addf %210, %213 : vector<2x1xf32>
    %215 = math.rsqrt %214 : vector<2x1xf32>
    %216 = vector.broadcast %215 : vector<2x1xf32> to vector<2x128xf32>
    %217 = arith.mulf %212, %216 : vector<2x128xf32>
    %218 = arith.extf %198 : vector<1x128xbf16> to vector<1x128xf32>
    %219 = vector.broadcast %218 : vector<1x128xf32> to vector<2x128xf32>
    %220 = arith.mulf %217, %219 : vector<2x128xf32>
    %221 = arith.extf %199 : vector<1x128xbf16> to vector<1x128xf32>
    %222 = vector.broadcast %221 : vector<1x128xf32> to vector<2x128xf32>
    %223 = arith.addf %220, %222 : vector<2x128xf32>
    %224 = arith.truncf %223 : vector<2x128xf32> to vector<2x128xbf16>
    %c0_77 = arith.constant 0 : index
    %c0_78 = arith.constant 0 : index
    %225 = vector.load %arg15[%c0_77, %c0_78] : memref<128x128xbf16, #tpu.memory_space<vmem>>, vector<128x128xbf16>
    %cst_79 = arith.constant dense<0.000000e+00> : vector<2x128xf32>
    %226 = tpu.matmul %224, %225, %cst_79 {dimension_numbers = #tpu.dot_dimension_numbers<[1], [0], [0], [1], [0, 0, 1, 1], [], []>} : vector<2x128xbf16>, vector<128x128xbf16>, vector<2x128xf32> -> vector<2x128xf32>
    %c0_80 = arith.constant 0 : index
    %c0_81 = arith.constant 0 : index
    %227 = vector.load %arg16[%c0_80, %c0_81] : memref<1x128xbf16, #tpu.memory_space<vmem>>, vector<1x128xbf16>
    %228 = arith.extf %227 : vector<1x128xbf16> to vector<1x128xf32>
    %229 = vector.broadcast %228 : vector<1x128xf32> to vector<2x128xf32>
    %230 = arith.addf %226, %229 : vector<2x128xf32>
    %c0_82 = arith.constant 0 : index
    %c0_83 = arith.constant 0 : index
    %231 = vector.load %arg17[%c0_82, %c0_83] : memref<2x128xf32, #tpu.memory_space<vmem>>, vector<2x128xf32>
    tpu.vector_store %arg17[%c0_82, %c0_83], %230 {strides = array<i32>} : memref<2x128xf32, #tpu.memory_space<vmem>>, vector<2x128xf32>,
    %232 = tpu.iota {dimensions = array<i32: 1>} : vector<2x128xi32>
    %233 = arith.sitofp %232 : vector<2x128xi32> to vector<2x128xf32>
    %cst_84 = arith.constant dense<0xFF800000> : vector<2xf32>
    %234 = vector.multi_reduction <maximumf>, %230, %cst_84 [1] : vector<2x128xf32> to vector<2xf32>
    %235 = vector.shape_cast %234 : vector<2xf32> to vector<2x1xf32>
    %236 = vector.broadcast %235 : vector<2x1xf32> to vector<2x128xf32>
    %237 = arith.cmpf oge, %230, %236 : vector<2x128xf32>
    %cst_85 = arith.constant 1.280000e+02 : f32
    %238 = vector.broadcast %cst_85 : f32 to vector<2x128xf32>
    %239 = arith.select %237, %233, %238 : vector<2x128xi1>, vector<2x128xf32>
    %cst_86 = arith.constant dense<0x7F800000> : vector<2xf32>
    %240 = vector.multi_reduction <minimumf>, %239, %cst_86 [1] : vector<2x128xf32> to vector<2xf32>
    %241 = vector.shape_cast %240 : vector<2xf32> to vector<2x1xf32>
    %242 = arith.fptosi %241 : vector<2x1xf32> to vector<2x1xi32>
    %c0_87 = arith.constant 0 : index
    %c0_88 = arith.constant 0 : index
    %243 = vector.load %arg18[%c0_87, %c0_88] : memref<2x1xi32, #tpu.memory_space<vmem>>, vector<2x1xi32>
    tpu.vector_store %arg18[%c0_87, %c0_88], %242 {strides = array<i32>} : memref<2x1xi32, #tpu.memory_space<vmem>>, vector<2x1xi32>,
    return
  }
}

</mosaic_0001>

<bundles_post_ra>
// kernel: visualglm_forward.2
= control target key start
LH: loop header
LB: loop body
LE: loop exit
PB: predicated region body
PF: predicated region fallthrough
CT: control target
= control target key end

     0   :  { %s3856_s0 = inlined_call_operand.vmem [shape: bf16[16,192], index: 0, kind: input, shape index: {}]   ;;  %s3857_s1 = inlined_call_operand.hbm [shape: bf16[192,128], index: 1, kind: input, shape index: {}]   ;;  %s3858_s2 = inlined_call_operand.vmem [shape: bf16[1,128], index: 2, kind: input, shape index: {}]   ;;  %s3859_s3 = inlined_call_operand.vmem [shape: bf16[4,128], index: 3, kind: input, shape index: {}]   ;;  %s3860_s4 = inlined_call_operand.hbm [shape: bf16[1,128], index: 4, kind: input, shape index: {}]   ;;  %s3861_s5 = inlined_call_operand.hbm [shape: bf16[1,128], index: 5, kind: input, shape index: {}]   ;;  %s3862_s6 = inlined_call_operand.hbm [shape: bf16[128,384], index: 6, kind: input, shape index: {}]   ;;  %s3863_s7 = inlined_call_operand.hbm [shape: bf16[1,384], index: 7, kind: input, shape index: {}]   ;;  %s3864_s8 = inlined_call_operand.hbm [shape: bf16[128,128], index: 8, kind: input, shape index: {}]   ;;  %s3865_s9 = inlined_call_operand.hbm [shape: bf16[1,128], index: 9, kind: input, shape index: {}]   ;;  %s3866_s10 = inlined_call_operand.hbm [shape: bf16[1,128], index: 10, kind: input, shape index: {}]   ;;  %s3867_s11 = inlined_call_operand.hbm [shape: bf16[1,128], index: 11, kind: input, shape index: {}]   ;;  %s3868_s12 = inlined_call_operand.vmem [shape: bf16[128,512], index: 12, kind: input, shape index: {}]   ;;  %s3869_s13 = inlined_call_operand.hbm [shape: bf16[1,512], index: 13, kind: input, shape index: {}]   ;;  %s3870_s14 = inlined_call_operand.vmem [shape: bf16[512,128], index: 14, kind: input, shape index: {}]   ;;  %s3871_s15 = inlined_call_operand.hbm [shape: bf16[1,128], index: 15, kind: input, shape index: {}]   ;;  %s3872_s16 = inlined_call_operand.vmem [shape: bf16[128,128], index: 16, kind: input, shape index: {}]   ;;  %s3873_s17 = inlined_call_operand.vmem [shape: bf16[1,128], index: 17, kind: input, shape index: {}]   ;;  %s3874_s18 = inlined_call_operand.vmem [shape: bf16[16,128], index: 18, kind: output, shape index: {}]  }
   0x1   :  { %3877 = sst [smem:[#allocation25_spill]] %s3856_s0 }
   0x2   :  { %3878 = sst [smem:[#allocation26_spill]] %s3857_s1 }
   0x3   :  { %3879 = sst [smem:[#allocation27_spill]] %s3858_s2 }
   0x4   :  { %23 = vsyncpa [#allocation3], 0 }
   0x5   :  { %24 = vsyncpa [#allocation5], 0 }
   0x6   :  { %25 = vsyncpa [#allocation8], 0 }
   0x7   :  { %26 = vsyncpa [#allocation11], 0 }
   0x8   :  { %27 = vsyncpa [#allocation14], 0 }
   0x9   :  { %28 = vsyncpa [#allocation17], 0  ;;  %s3073_s27 = smov [#allocation4]   ;;  %s3074_s29 = smov [#allocation7]  }
   0xa   :  { %s53_s28 = sshll.u32 %s3073_s27, 4  ;;  %s72_s30 = sshll.u32 %s3074_s29, 4  ;;  %s54_s28 = int_to_ptr.vmem [resolvable:$true] %s53_s28  ;;  %s3189_s30 = int_to_ptr.vmem [resolvable:$true] %s72_s30 }
   0xb   :  { %s2819_s1 = scalar_lea.hbm %s3860_s4, 16 }
   0xc   :  { %p2820_p0 = scmp.ne.s32.totalorder %s3860_s4, %s2819_s1  ;;  %p2823_p1 = scmp.lt.u32.totalorder %s2819_s1, %s3860_s4 }
   0xe   :  { %p2825_p2 = pnand %p2823_p1, %p2820_p0 }
  0x10   :  { %2828 = shalt.err (!%p2825_p2)
}
  0x11   :  { %s2829_s23 = scalar_lea.vmem %s54_s28, 16  ;;  %s2833_s24 = scalar_lea.vmem %s54_s28, 32 }
  0x12   :  { %p2830_p3 = scmp.ne.s32.totalorder %s54_s28, %s2829_s23  ;;  %p2834_p4 = scmp.lt.s32.totalorder %s54_s28, %s54_s28 }
  0x13   :  { %p2835_p5 = scmp.lt.s32.totalorder %s2833_s24, %s2829_s23 }
  0x15   :  { %p2836_p6 = por %p2835_p5, %p2834_p4 }
  0x17   :  { %p2837_p7 = pnand %p2836_p6, %p2830_p3 }
  0x19   :  { %2840 = shalt.err (!%p2837_p7)
}
  0x1a   :  { %56 = dma.hbm_to_vmem [thread:$0]  %s3860_s4, 16, %s54_s28, [#allocation5]  }
  0x1b   :  { %s2841_s0 = scalar_lea.hbm %s3862_s6, 3072 }
  0x1c   :  { %p2842_p8 = scmp.ne.s32.totalorder %s3862_s6, %s2841_s0  ;;  %p2845_p9 = scmp.lt.u32.totalorder %s2841_s0, %s3862_s6 }
  0x1e   :  { %p2847_p10 = pnand %p2845_p9, %p2842_p8 }
  0x20   :  { %2850 = shalt.err (!%p2847_p10)
}
  0x21   :  { %s2851_s22 = scalar_lea.vmem %s3189_s30, 3072  ;;  %p2856_p12 = scmp.lt.s32.totalorder %s3189_s30, %s3189_s30 }
  0x22   :  { %p2852_p11 = scmp.ne.s32.totalorder %s3189_s30, %s2851_s22  ;;  %p2857_p13 = scmp.lt.s32.totalorder %s2851_s22, %s2851_s22 }
  0x24   :  { %p2858_p0 = por %p2857_p13, %p2856_p12 }
  0x26   :  { %p2859_p1 = pnand %p2858_p0, %p2852_p11 }
  0x28   :  { %2862 = shalt.err (!%p2859_p1)
}
  0x29   :  { %s3075_s4 = smov 192   ;;  %s3076_s28 = smov 12  }
  0x2a   :  { %78 = dma.hbm_to_vmem [thread:$0]  %s3862_s6, 3072, %s3189_s30, [#allocation8], %s3075_s4, %s3075_s4, %s3076_s28  }
  0x2b   :  { %s3077_s24 = smov [#allocation10]   ;;  %s3078_s26 = smov [#allocation13]  }
  0x2c   :  { %s94_s25 = sshll.u32 %s3077_s24, 4  ;;  %s117_s27 = sshll.u32 %s3078_s26, 4  ;;  %s95_s25 = int_to_ptr.vmem [resolvable:$true] %s94_s25  ;;  %s3220_s27 = int_to_ptr.vmem [resolvable:$true] %s117_s27 }
  0x2d   :  { %s2863_s19 = scalar_lea.hbm %s3864_s8, 1024 }
  0x2e   :  { %p2864_p2 = scmp.ne.s32.totalorder %s3864_s8, %s2863_s19  ;;  %p2867_p3 = scmp.lt.u32.totalorder %s2863_s19, %s3864_s8 }
  0x30   :  { %p2869_p4 = pnand %p2867_p3, %p2864_p2 }
  0x32   :  { %2872 = shalt.err (!%p2869_p4)
}
  0x33   :  { %s2873_s6 = scalar_lea.vmem %s95_s25, 1024  ;;  %p2878_p6 = scmp.lt.s32.totalorder %s95_s25, %s95_s25 }
  0x34   :  { %p2874_p5 = scmp.ne.s32.totalorder %s95_s25, %s2873_s6  ;;  %p2879_p7 = scmp.lt.s32.totalorder %s2873_s6, %s2873_s6 }
  0x36   :  { %p2880_p8 = por %p2879_p7, %p2878_p6 }
  0x38   :  { %p2881_p9 = pnand %p2880_p8, %p2874_p5 }
  0x3a   :  { %2884 = shalt.err (!%p2881_p9)
}
  0x3b   :  { %s3079_s30 = smov 64   ;;  %s3080_s4 = smov 4  }
  0x3c   :  { %100 = dma.hbm_to_vmem [thread:$0]  %s3864_s8, 1024, %s95_s25, [#allocation11], %s3079_s30, %s3079_s30, %s3080_s4  }
  0x3d   :  { %s2885_s26 = scalar_lea.hbm %s3866_s10, 16 }
  0x3e   :  { %p2886_p10 = scmp.ne.s32.totalorder %s3866_s10, %s2885_s26  ;;  %p2889_p11 = scmp.lt.u32.totalorder %s2885_s26, %s3866_s10 }
  0x40   :  { %p2891_p12 = pnand %p2889_p11, %p2886_p10 }
  0x42   :  { %2894 = shalt.err (!%p2891_p12)
}
  0x43   :  { %s2895_s20 = scalar_lea.vmem %s3220_s27, 16  ;;  %s2899_s8 = scalar_lea.vmem %s3220_s27, 32 }
  0x44   :  { %p2896_p13 = scmp.ne.s32.totalorder %s3220_s27, %s2895_s20  ;;  %p2900_p0 = scmp.lt.s32.totalorder %s3220_s27, %s3220_s27 }
  0x45   :  { %p2901_p1 = scmp.lt.s32.totalorder %s2899_s8, %s2895_s20 }
  0x47   :  { %p2902_p2 = por %p2901_p1, %p2900_p0 }
  0x49   :  { %p2903_p3 = pnand %p2902_p2, %p2896_p13 }
  0x4b   :  { %2906 = shalt.err (!%p2903_p3)
}
  0x4c   :  { %120 = dma.hbm_to_vmem [thread:$0]  %s3866_s10, 16, %s3220_s27, [#allocation14]  }
  0x4d   :  { %s3081_s22 = smov [#allocation16]   ;;  %s3082_s28 = smov [#allocation2]  }
  0x4e   :  { %s139_s6 = sshll.u32 %s3081_s22, 4  ;;  %s36_s2 = sshll.u32 %s3082_s28, 4  ;;  %s140_s6 = int_to_ptr.vmem [resolvable:$true] %s139_s6  ;;  %s3255_s2 = int_to_ptr.vmem [resolvable:$true] %s36_s2 }
  0x4f   :  { %s2907_s26 = scalar_lea.hbm %s3869_s13, 64 }
  0x50   :  { %p2908_p4 = scmp.ne.s32.totalorder %s3869_s13, %s2907_s26  ;;  %p2911_p5 = scmp.lt.u32.totalorder %s2907_s26, %s3869_s13 }
  0x52   :  { %p2913_p6 = pnand %p2911_p5, %p2908_p4 }
  0x54   :  { %2916 = shalt.err (!%p2913_p6)
}
  0x55   :  { %s2917_s10 = scalar_lea.vmem %s140_s6, 64  ;;  %p2922_p8 = scmp.lt.s32.totalorder %s140_s6, %s140_s6 }
  0x56   :  { %p2918_p7 = scmp.ne.s32.totalorder %s140_s6, %s2917_s10  ;;  %p2923_p9 = scmp.lt.s32.totalorder %s2917_s10, %s2917_s10 }
  0x58   :  { %p2924_p10 = por %p2923_p9, %p2922_p8 }
  0x5a   :  { %p2925_p11 = pnand %p2924_p10, %p2918_p7 }
  0x5c   :  { %2928 = shalt.err (!%p2925_p11)
}
  0x5d   :  { %142 = dma.hbm_to_vmem [thread:$0]  %s3869_s13, 64, %s140_s6, [#allocation17]  }
  0x5e   :  { %s3880_s21 = sld [smem:[#allocation26_spill]] }
  0x64   :  { %s2929_s22 = scalar_lea.hbm %s3880_s21, 1536 }
  0x65   :  { %p2930_p12 = scmp.ne.s32.totalorder %s3880_s21, %s2929_s22  ;;  %p2933_p13 = scmp.lt.u32.totalorder %s2929_s22, %s3880_s21 }
  0x67   :  { %p2935_p0 = pnand %p2933_p13, %p2930_p12 }
  0x69   :  { %2938 = shalt.err (!%p2935_p0)
}
  0x6a   :  { %s2939_s29 = scalar_lea.vmem %s3255_s2, 1536  ;;  %p2944_p2 = scmp.lt.s32.totalorder %s3255_s2, %s3255_s2 }
  0x6b   :  { %p2940_p1 = scmp.ne.s32.totalorder %s3255_s2, %s2939_s29  ;;  %p2945_p3 = scmp.lt.s32.totalorder %s2939_s29, %s2939_s29 }
  0x6d   :  { %p2946_p4 = por %p2945_p3, %p2944_p2 }
  0x6f   :  { %p2947_p5 = pnand %p2946_p4, %p2940_p1 }
  0x71   :  { %2950 = shalt.err (!%p2947_p5)
}
  0x72   :  { %42 = dma.hbm_to_vmem [thread:$0]  %s3880_s21, 1536, %s3255_s2, [#allocation3], %s3079_s30, %s3079_s30, %s3080_s4  }
  0x73   :  { %s3083_s0 = smov [#allocation6]   ;;  %s3084_s1 = smov [#allocation9]  }
  0x74   :  { %s63_s19 = sshll.u32 %s3083_s0, 4  ;;  %s85_s10 = sshll.u32 %s3084_s1, 4  ;;  %s64_s19 = int_to_ptr.vmem [resolvable:$true] %s63_s19  ;;  %s86_s10 = int_to_ptr.vmem [resolvable:$true] %s85_s10 }
  0x75   :  { %s2951_s8 = scalar_lea.hbm %s3861_s5, 16 }
  0x76   :  { %p2952_p6 = scmp.ne.s32.totalorder %s3861_s5, %s2951_s8  ;;  %p2955_p7 = scmp.lt.u32.totalorder %s2951_s8, %s3861_s5 }
  0x78   :  { %p2957_p8 = pnand %p2955_p7, %p2952_p6 }
  0x7a   :  { %2960 = shalt.err (!%p2957_p8)
}
  0x7b   :  { %s2961_s4 = scalar_lea.vmem %s64_s19, 16  ;;  %s2965_s2 = scalar_lea.vmem %s64_s19, 32 }
  0x7c   :  { %p2962_p9 = scmp.ne.s32.totalorder %s64_s19, %s2961_s4  ;;  %p2966_p10 = scmp.lt.s32.totalorder %s64_s19, %s64_s19 }
  0x7d   :  { %p2967_p11 = scmp.lt.s32.totalorder %s2965_s2, %s2961_s4 }
  0x7f   :  { %p2968_p12 = por %p2967_p11, %p2966_p10 }
  0x81   :  { %p2969_p13 = pnand %p2968_p12, %p2962_p9 }
  0x83   :  { %2972 = shalt.err (!%p2969_p13)
}
  0x84   :  { %66 = dma.hbm_to_vmem [thread:$0]  %s3861_s5, 16, %s64_s19, [#allocation5]  }
  0x85   :  { %s2973_s13 = scalar_lea.hbm %s3863_s7, 48 }
  0x86   :  { %p2974_p0 = scmp.ne.s32.totalorder %s3863_s7, %s2973_s13  ;;  %p2977_p1 = scmp.lt.u32.totalorder %s2973_s13, %s3863_s7 }
  0x88   :  { %p2979_p2 = pnand %p2977_p1, %p2974_p0 }
  0x8a   :  { %2982 = shalt.err (!%p2979_p2)
}
  0x8b   :  { %s2983_s20 = scalar_lea.vmem %s86_s10, 48  ;;  %s2987_s8 = scalar_lea.vmem %s86_s10, 64 }
  0x8c   :  { %p2984_p3 = scmp.ne.s32.totalorder %s86_s10, %s2983_s20  ;;  %p2988_p4 = scmp.lt.s32.totalorder %s86_s10, %s86_s10 }
  0x8d   :  { %p2989_p5 = scmp.lt.s32.totalorder %s2987_s8, %s2983_s20 }
  0x8f   :  { %p2990_p6 = por %p2989_p5, %p2988_p4 }
  0x91   :  { %p2991_p7 = pnand %p2990_p6, %p2984_p3 }
  0x93   :  { %2994 = shalt.err (!%p2991_p7)
}
  0x94   :  { %88 = dma.hbm_to_vmem [thread:$0]  %s3863_s7, 48, %s86_s10, [#allocation8]  }
  0x95   :  { %s3085_s25 = smov [#allocation12]   ;;  %s3086_s28 = smov [#allocation15]  }
  0x96   :  { %s107_s22 = sshll.u32 %s3085_s25, 4  ;;  %s127_s23 = sshll.u32 %s3086_s28, 4  ;;  %s108_s22 = int_to_ptr.vmem [resolvable:$true] %s107_s22  ;;  %s128_s23 = int_to_ptr.vmem [resolvable:$true] %s127_s23 }
  0x97   :  { %s2995_s21 = scalar_lea.hbm %s3865_s9, 16 }
  0x98   :  { %p2996_p8 = scmp.ne.s32.totalorder %s3865_s9, %s2995_s21  ;;  %p2999_p9 = scmp.lt.u32.totalorder %s2995_s21, %s3865_s9 }
  0x9a   :  { %p3001_p10 = pnand %p2999_p9, %p2996_p8 }
  0x9c   :  { %3004 = shalt.err (!%p3001_p10)
}
  0x9d   :  { %s3005_s7 = scalar_lea.vmem %s108_s22, 16  ;;  %s3009_s10 = scalar_lea.vmem %s108_s22, 32 }
  0x9e   :  { %p3006_p11 = scmp.ne.s32.totalorder %s108_s22, %s3005_s7  ;;  %p3010_p12 = scmp.lt.s32.totalorder %s108_s22, %s108_s22 }
  0x9f   :  { %p3011_p13 = scmp.lt.s32.totalorder %s3009_s10, %s3005_s7 }
  0xa1   :  { %p3012_p0 = por %p3011_p13, %p3010_p12 }
  0xa3   :  { %p3013_p1 = pnand %p3012_p0, %p3006_p11 }
  0xa5   :  { %3016 = shalt.err (!%p3013_p1)
}
  0xa6   :  { %110 = dma.hbm_to_vmem [thread:$0]  %s3865_s9, 16, %s108_s22, [#allocation11]  }
  0xa7   :  { %s3017_s20 = scalar_lea.hbm %s3867_s11, 16 }
  0xa8   :  { %p3018_p2 = scmp.ne.s32.totalorder %s3867_s11, %s3017_s20  ;;  %p3021_p3 = scmp.lt.u32.totalorder %s3017_s20, %s3867_s11 }
  0xaa   :  { %p3023_p4 = pnand %p3021_p3, %p3018_p2 }
  0xac   :  { %3026 = shalt.err (!%p3023_p4)
}
  0xad   :  { %s3027_s28 = scalar_lea.vmem %s128_s23, 16  ;;  %s3031_s4 = scalar_lea.vmem %s128_s23, 32 }
  0xae   :  { %p3028_p5 = scmp.ne.s32.totalorder %s128_s23, %s3027_s28  ;;  %p3032_p6 = scmp.lt.s32.totalorder %s128_s23, %s128_s23 }
  0xaf   :  { %p3033_p7 = scmp.lt.s32.totalorder %s3031_s4, %s3027_s28 }
  0xb1   :  { %p3034_p8 = por %p3033_p7, %p3032_p6 }
  0xb3   :  { %p3035_p9 = pnand %p3034_p8, %p3028_p5 }
  0xb5   :  { %3038 = shalt.err (!%p3035_p9)
}
  0xb6   :  { %130 = dma.hbm_to_vmem [thread:$0]  %s3867_s11, 16, %s128_s23, [#allocation14]  }
  0xb7   :  { %s3087_s2 = smov [#allocation18]   ;;  %s3039_s29 = scalar_lea.hbm %s3871_s15, 16 }
  0xb8   :  { %s151_s21 = sshll.u32 %s3087_s2, 4  ;;  %p3040_p10 = scmp.ne.s32.totalorder %s3871_s15, %s3039_s29  ;;  %s152_s21 = int_to_ptr.vmem [resolvable:$true] %s151_s21 }
  0xb9   :  { %p3043_p11 = scmp.lt.u32.totalorder %s3039_s29, %s3871_s15 }
  0xbb   :  { %p3045_p12 = pnand %p3043_p11, %p3040_p10 }
  0xbd   :  { %3048 = shalt.err (!%p3045_p12)
}
  0xbe   :  { %s3049_s0 = scalar_lea.vmem %s152_s21, 16  ;;  %s3053_s11 = scalar_lea.vmem %s152_s21, 32 }
  0xbf   :  { %p3050_p13 = scmp.ne.s32.totalorder %s152_s21, %s3049_s0  ;;  %p3054_p0 = scmp.lt.s32.totalorder %s152_s21, %s152_s21 }
  0xc0   :  { %p3055_p1 = scmp.lt.s32.totalorder %s3053_s11, %s3049_s0 }
  0xc2   :  { %p3056_p2 = por %p3055_p1, %p3054_p0 }
  0xc4   :  { %p3057_p3 = pnand %p3056_p2, %p3050_p13 }
  0xc6   :  { %3060 = shalt.err (!%p3057_p3)
}
  0xc7   :  { %154 = dma.hbm_to_vmem [thread:$0]  %s3871_s15, 16, %s152_s21, [#allocation17]  }
  0xc8   :  { %3061 = dma.done.wait [#allocation3], 1536  }
  0xc9   :  { %3062 = vsyncadd [#allocation3], 4294965760 }
  0xca   :  { %3063 = dma.done.wait [#allocation5], 32  }
  0xcb   :  { %3064 = vsyncadd [#allocation5], 4294967264 }
  0xcc   :  { %3065 = dma.done.wait [#allocation8], 3120  }
  0xcd   :  { %3066 = vsyncadd [#allocation8], 4294964176 }
  0xce   :  { %3067 = dma.done.wait [#allocation11], 1040  }
  0xcf   :  { %3068 = vsyncadd [#allocation11], 4294966256 }
  0xd0   :  { %3069 = dma.done.wait [#allocation14], 32  }
  0xd1   :  { %3070 = vsyncadd [#allocation14], 4294967264 }
  0xd2   :  { %3071 = dma.done.wait [#allocation17], 80  }
  0xd3   :  { %3072 = vsyncadd [#allocation17], 4294967216  ;;  %v3088_v0 = vmov 0   ;;  %v2620_v1 = vld [vmem:[#allocation2] sm:$0xff]   ;;  %v2621_v2 = vld [vmem:[#allocation2 + $0x8] sm:$0xff]   ;;  %vm313_vm0 = vcmask 523264   ;;  %v228_v15 = vlaneseq }
  0xd4   :  { %317 = vmatprep.subr.bf16.mxu0 %v3088_v0  ;;  %739 = vmatprep.mubr.bf16.mxu1 %v3088_v0  ;;  %v2622_v3 = vld [vmem:[#allocation2 + $0x10] sm:$0xff]   ;;  %v2623_v4 = vld [vmem:[#allocation2 + $0x18] sm:$0xff]   ;;  %v2624_v5 = vld [vmem:[#allocation2 + $0x20] sm:$0xff]   ;;  %s3881_s20 = sld [smem:[#allocation25_spill]]  ;;  %s3882_s9 = sld [smem:[#allocation27_spill]]  ;;  %vm224_vm1 = vcmask 1043456  }
  0xd5   :  { %318 = vmatpush1.bf16.msra.mxu0 %v2620_v1  ;;  %v2625_v7 = vld [vmem:[#allocation2 + $0x28] sm:$0xff]   ;;  %v2626_v8 = vld [vmem:[#allocation2 + $0x30] sm:$0xff]   ;;  %v2627_v9 = vld [vmem:[#allocation2 + $0x38] sm:$0xff]   ;;  %v3373_v17 = vshrl.u32 %v228_v15, 7  ;;  %v3089_v53 = vmov 0.0   ;;  %vm3090_vm2 = vmmov 0  }
  0xd6   :  { %319 = vmatprep.subr.bf16.mxu0 %v3088_v0  ;;  %v2628_v10 = vld [vmem:[#allocation2 + $0x40] sm:$0xff]   ;;  %v2629_v11 = vld [vmem:[#allocation2 + $0x48] sm:$0xff]   ;;  %v2630_v12 = vld [vmem:[#allocation2 + $0x50] sm:$0xff]   ;;  %vm815_vm3 = vcmask 261120   ;;  %vm867_vm6 = vcmask 130048   ;;  %s3093_s22 = smov 32  }
  0xd7   :  { %v2631_v13 = vld [vmem:[#allocation2 + $0x58] sm:$0xff]   ;;  %v219_v16 = vld [vmem:[%s3859_s3] sm:$0x3]  ;;  %v3379_v21 = vsub.s32 0, %v3373_v17  ;;  %v2635_v33 = vld [vmem:[#allocation7 + $0x4] ss:$12 sps:$4 sm:$0xff]  }
  0xd8   :  { %v220_v19 = vunpack.c.l.bf16 %v219_v16  ;;  %v2637_v34 = vld [vmem:[#allocation7] ss:$12 sps:$4 sm:$0xff]   ;;  %v2638_v35 = vld [vmem:[#allocation7 + $0x1c] ss:$12 sps:$4 sm:$0xff]   ;;  %707 = vmatprep.subr.bf16.mxu1 %v2635_v33  ;;  %v2640_v36 = vld [vmem:[#allocation7 + $0x18] ss:$12 sps:$4 sm:$0xff]  }
  0xd9   :  { %320 = vmatpush1.bf16.msra.mxu0 %v2621_v2  ;;  %708 = vmatpush1.bf16.msra.mxu1 %v2637_v34  ;;  %v2641_v45 = vld [vmem:[#allocation7 + $0x34] ss:$12 sps:$4 sm:$0xff]   ;;  %v2643_v46 = vld [vmem:[#allocation7 + $0x30] ss:$12 sps:$4 sm:$0xff]   ;;  %v2644_v47 = vld [vmem:[#allocation7 + $0x4c] ss:$12 sps:$4 sm:$0xff]  }
  0xda   :  { %321 = vmatprep.subr.bf16.mxu0 %v3088_v0  ;;  %v2634_v6 = vld [vmem:[%s3881_s20 + $0x4] ss:$8 sps:$4 sm:$0xff]   ;;  %v2632_v14 = vld [vmem:[%s3881_s20] ss:$8 sps:$4 sm:$0xff]   ;;  %v222_v22 = vcombine.low %v220_v19, %v220_v19  ;;  %709 = vmatprep.subr.bf16.mxu1 %v2638_v35  ;;  %v2656_v56 = vld [vmem:[#allocation7 + $0xac] ss:$12 sps:$4 sm:$0xff]  }
  0xdb   :  { %2267 = vmatprep.mubr.msk.bf16.mxu0 %vm313_vm0, %v2634_v6  ;;  %v226_v18 = vld [vmem:[%s3882_s9] sm:$0x1]  ;;  %v2646_v48 = vld [vmem:[#allocation7 + $0x48] ss:$12 sps:$4 sm:$0xff]   ;;  %v2647_v49 = vld [vmem:[#allocation7 + $0x64] ss:$12 sps:$4 sm:$0xff]  }
  0xdc   :  { %v227_v20 = vunpack.c.l.bf16 %v226_v18  ;;  %v225_v24 = vsel %vm224_vm1, %v220_v19, %v222_v22  ;;  %v2649_v50 = vld [vmem:[#allocation7 + $0x60] ss:$12 sps:$4 sm:$0xff]   ;;  %v2650_v51 = vld [vmem:[#allocation7 + $0x7c] ss:$12 sps:$4 sm:$0xff]   ;;  %v2652_v52 = vld [vmem:[#allocation7 + $0x78] ss:$12 sps:$4 sm:$0xff]  }
  0xdd   :  { %322 = vmatpush1.bf16.msra.mxu0 %v2622_v3  ;;  %710 = vmatpush1.bf16.msra.mxu1 %v2640_v36  ;;  %v2653_v54 = vld [vmem:[#allocation7 + $0x94] ss:$12 sps:$4 sm:$0xff]   ;;  %v2655_v55 = vld [vmem:[#allocation7 + $0x90] ss:$12 sps:$4 sm:$0xff]   ;;  %s3092_s3 = smov 96   ;;  %vm1341_vm7 = vcmask 785408  }
  0xde   :  { %323 = vmatprep.subr.bf16.mxu0 %v3088_v0  ;;  %v231_v23 = vrot.slane %v227_v20, %v3379_v21  ;;  %711 = vmatprep.subr.bf16.mxu1 %v2641_v45  ;;  %v2658_v57 = vld [vmem:[#allocation7 + $0xa8] ss:$12 sps:$4 sm:$0xff]   ;;  %v360_v1 = vld [vmem:[#allocation4] sm:$0x1]  ;;  %v361_v3 = vld [vmem:[#allocation6] sm:$0x1] }
  0xdf   :  { %v535_v2 = vunpack.c.l.bf16 %v360_v1  ;;  %v2659_v16 = vld [vmem:[#allocation7 + $0x8] ss:$12 sps:$4 sm:$0xff]   ;;  %v2660_v19 = vld [vmem:[#allocation7 + $0x20] ss:$12 sps:$4 sm:$0xff]   ;;  %v2661_v20 = vld [vmem:[#allocation7 + $0x38] ss:$12 sps:$4 sm:$0xff]  }
  0xe0   :  { %v2662_v22 = vld [vmem:[#allocation7 + $0x50] ss:$12 sps:$4 sm:$0xff]  }
  0xe1   :  { %324 = vmatpush1.bf16.msra.mxu0 %v2623_v4  ;;  %712 = vmatpush1.bf16.msra.mxu1 %v2643_v46  ;;  %v539_v6 = vrot.slane %v535_v2, %v3379_v21 }
  0xe2   :  { %325 = vmatprep.subr.bf16.mxu0 %v3088_v0  ;;  %713 = vmatprep.subr.bf16.mxu1 %v2644_v47  ;;  %v562_v47 = vsub.s32 4, %v3373_v17 }
  0xe5   :  { %326 = vmatpush1.bf16.msra.mxu0 %v2624_v5  ;;  %714 = vmatpush1.bf16.msra.mxu1 %v2646_v48 }
  0xe6   :  { %327 = vmatprep.subr.bf16.mxu0 %v3088_v0  ;;  %715 = vmatprep.subr.bf16.mxu1 %v2647_v49 }
  0xe9   :  { %328 = vmatpush1.bf16.msra.mxu0 %v2625_v7  ;;  %716 = vmatpush1.bf16.msra.mxu1 %v2649_v50  ;;  %v542_v7 = vunpack.c.l.bf16 %v361_v3 }
  0xea   :  { %329 = vmatprep.subr.bf16.mxu0 %v3088_v0  ;;  %717 = vmatprep.subr.bf16.mxu1 %v2650_v51 }
  0xed   :  { %330 = vmatpush1.bf16.msra.mxu0 %v2626_v8  ;;  %718 = vmatpush1.bf16.msra.mxu1 %v2652_v52 }
  0xee   :  { %331 = vmatprep.subr.bf16.mxu0 %v3088_v0  ;;  %719 = vmatprep.subr.bf16.mxu1 %v2653_v54 }
  0xf1   :  { %332 = vmatpush1.bf16.msra.mxu0 %v2627_v9  ;;  %720 = vmatpush1.bf16.msra.mxu1 %v2655_v55 }
  0xf2   :  { %333 = vmatprep.subr.bf16.mxu0 %v3088_v0  ;;  %721 = vmatprep.subr.bf16.mxu1 %v2656_v56 }
  0xf5   :  { %334 = vmatpush1.bf16.msra.mxu0 %v2628_v10  ;;  %722 = vmatpush1.bf16.msra.mxu1 %v2658_v57 }
  0xf6   :  { %335 = vmatprep.subr.bf16.mxu0 %v3088_v0  ;;  %2476 = vmatprep.subr.bf16.mxu1 %v3089_v53 }
  0xf9   :  { %336 = vmatpush1.bf16.msra.mxu0 %v2629_v11  ;;  %v546_v11 = vrot.slane %v542_v7, %v3379_v21 }
  0xfa   :  { %337 = vmatprep.subr.bf16.mxu0 %v3088_v0 }
  0xfd   :  { %338 = vmatpush1.bf16.msra.mxu0 %v2630_v12 }
  0xfe   :  { %339 = vmatprep.subr.bf16.mxu0 %v3088_v0 }
 0x101   :  { %340 = vmatpush1.bf16.msra.mxu0 %v2631_v13 }
 0x102   :  { %2496 = vmatprep.subr.bf16.mxu0 %v3089_v53 }
 0x104   :  { %350 = vmatmul.mubr.bf16.vlgmr.msra.gmra.mrb[0].mxu0 %v2632_v14 }
 0x105   :  { %2498 = vmatprep.mubr.msk.bf16.mxu0 %vm3090_vm2, %v3089_v53 }
 0x1d7   :  { %v351_v25 = vpop.f32.mrb[0].mxu0 }
 0x1d8   :  { %v352_v26 = vadd.f32 %v351_v25, %v231_v23  ;;  %v353_v27 = vpop.f32.mrb[1].mxu0  ;;  %v2665_v25 = vld [vmem:[#allocation7 + $0x98] ss:$12 sps:$4 sm:$0xff]  }
 0x1d9   :  { %v354_v28 = vpop.f32.mrb[2].mxu0  ;;  %v394_v27 = vld [vmem:[#allocation9] sm:$0x7] }
 0x1da   :  { %v3382_v29 = vadd.f32 %v352_v26, %v225_v24  ;;  %v355_v30 = vadd.f32 %v354_v28, %v231_v23  ;;  %v356_v31 = vpop.f32.mrb[3].mxu0  ;;  %v2663_v23 = vld [vmem:[#allocation7 + $0x68] ss:$12 sps:$4 sm:$0xff]   ;;  %v2666_v26 = vld [vmem:[#allocation7 + $0xb0] ss:$12 sps:$4 sm:$0xff]   ;;  %v550_v28 = vunpack.c.l.bf16 %v394_v27 }
 0x1dc   :  { %512 = vadd.xlane.f32.xlu0 %v3382_v29  ;;  %v3385_v32 = vadd.f32 %v355_v30, %v225_v24  ;;  %v2664_v24 = vld [vmem:[#allocation7 + $0x80] ss:$12 sps:$4 sm:$0xff]   ;;  %v558_v30 = vsub.s32 2, %v3373_v17  ;;  %v555_v31 = vrot.slane %v550_v28, %v3379_v21  ;;  %v563_v48 = vrot.slane %v550_v28, %v562_v47 }
 0x1de   :  { %v559_v33 = vrot.slane %v550_v28, %v558_v30  ;;  %v570_v34 = vrot.slane %v555_v31, %v3379_v21  ;;  %v578_v49 = vrot.slane %v563_v48, %v3379_v21 }
 0x1e0   :  { %514 = vadd.xlane.f32.xlu0 %v3385_v32  ;;  %v574_v36 = vrot.slane %v559_v33, %v3379_v21 }
 0x269   :  { %v513_v37 = vpop.xlane.xlu0 %512 }
 0x26a   :  { %v517_v38 = vmul.f32 0.0078125, %v513_v37 }
 0x26c   :  { %v519_v39 = vsub.f32 %v3382_v29, %v517_v38 }
 0x26d   :  { %v515_v40 = vpop.xlane.xlu0 %514 }
 0x26e   :  { %v518_v41 = vmul.f32 0.0078125, %v515_v40  ;;  %v521_v42 = vmul.f32 %v519_v39, %v519_v39 }
 0x270   :  { %v520_v43 = vsub.f32 %v3385_v32, %v518_v41  ;;  %523 = vadd.xlane.f32.xlu1 %v521_v42 }
 0x272   :  { %v522_v44 = vmul.f32 %v520_v43, %v520_v43 }
 0x274   :  { %525 = vadd.xlane.f32.xlu1 %v522_v44 }
 0x2fd   :  { %v524_v58 = vpop.xlane.xlu1 %523 }
 0x2fe   :  { %v527_v59 = vmul.f32 0.0078125, %v524_v58  ;;  %v798_v58 = vand.u32 127, %v228_v15 }
 0x300   :  { %v529_v60 = vadd.f32 1e-05, %v527_v59  ;;  %v796_v59 = vadd.s32 8, %v3373_v17 }
 0x301   :  { %v526_v61 = vpop.xlane.xlu1 %525 }
 0x302   :  { %2763 = vrsqrt.f32 %v529_v60  ;;  %v528_v62 = vmul.f32 0.0078125, %v526_v61  ;;  %v799_v60 = vcvt.s32.f32 %v3373_v17  ;;  %v807_v61 = vcvt.s32.f32 %v798_v58 }
 0x304   :  { %v530_v63 = vadd.f32 1e-05, %v528_v62  ;;  %v800_v62 = vcvt.s32.f32 %v796_v59  ;;  %v808_v1 = vadd.f32 0.5, %v807_v61 }
 0x306   :  { %2765 = vrsqrt.f32 %v530_v63  ;;  %v801_v63 = vadd.f32 0.5, %v799_v60  ;;  %v802_v2 = vadd.f32 0.5, %v800_v62 }
 0x308   :  { %v803_v3 = vmul.f32 0.25, %v801_v63 }
 0x30c   :  { %v2764_v4 = vpop.eup %2763 }
 0x30d   :  { %v533_v5 = vmul.f32 %v2764_v4, %v519_v39  ;;  %v809_v4 = vmul.f32 0.25, %v808_v1 }
 0x30f   :  { %v540_v10 = vmul.f32 %v539_v6, %v533_v5  ;;  %v804_v5 = vmul.f32 0.25, %v802_v2  ;;  %v810_v7 = vfloor.f32 %v809_v4 }
 0x310   :  { %v2766_v8 = vpop.eup %2765 }
 0x311   :  { %v534_v9 = vmul.f32 %v2766_v8, %v520_v43  ;;  %v547_v13 = vadd.f32 %v546_v11, %v540_v10  ;;  %v806_v8 = vfloor.f32 %v804_v5  ;;  %v3091_v10 = vmov -1e+30  }
 0x313   :  { %v541_v12 = vmul.f32 %v539_v6, %v534_v9  ;;  %v805_v6 = vfloor.f32 %v803_v3  ;;  %vm812_vm5 = vcmp.eq.f32.partialorder %v806_v8, %v810_v7 }
 0x315   :  { %v548_v14 = vadd.f32 %v546_v11, %v541_v12  ;;  %vm811_vm4 = vcmp.eq.f32.partialorder %v805_v6, %v810_v7 }
 0x316   :  { %v3436_v15 = vsel %vm811_vm4, 0.0, %v3091_v10 }
 0x317   :  { %v549_v18 = vpack.c.bf16 %v548_v14, %v547_v13  ;;  %v3438_v14 = vsel %vm812_vm5, 0.0, %v3091_v10 }
 0x319   :  { %740 = vmatmul.mubr.bf16.vlgmr.msra.gmra.mrb[0].mxu1 %v549_v18 }
 0x31a   :  { %2477 = vmatpush3.bf16.msra.mxu1 %v2659_v16  ;;  %2492 = vmatprep.mubr.msk.bf16.mxu1 %vm3090_vm2, %v3089_v53 }
 0x31b   :  { %2478 = vmatprep.subr.bf16.mxu1 %v3089_v53 }
 0x31e   :  { %2479 = vmatpush3.bf16.msra.mxu1 %v2660_v19 }
 0x31f   :  { %2480 = vmatprep.subr.bf16.mxu1 %v3089_v53 }
 0x322   :  { %2481 = vmatpush3.bf16.msra.mxu1 %v2661_v20 }
 0x323   :  { %2482 = vmatprep.subr.bf16.mxu1 %v3089_v53 }
 0x326   :  { %2483 = vmatpush3.bf16.msra.mxu1 %v2662_v22 }
 0x327   :  { %2484 = vmatprep.subr.bf16.mxu1 %v3089_v53 }
 0x32a   :  { %2485 = vmatpush3.bf16.msra.mxu1 %v2663_v23 }
 0x32b   :  { %2486 = vmatprep.subr.bf16.mxu1 %v3089_v53 }
 0x32e   :  { %2487 = vmatpush3.bf16.msra.mxu1 %v2664_v24 }
 0x32f   :  { %2488 = vmatprep.subr.bf16.mxu1 %v3089_v53 }
 0x332   :  { %2489 = vmatpush3.bf16.msra.mxu1 %v2665_v25 }
 0x333   :  { %2490 = vmatprep.subr.bf16.mxu1 %v3089_v53 }
 0x336   :  { %2491 = vmatpush3.bf16.msra.mxu1 %v2666_v26 }
 0x337   :  { %2514 = vmatprep.subr.bf16.mxu1 %v3089_v53 }
 0x339   :  { %2493 = vmatmul.mubr.bf16.vlgmr.msra.gmra.mrb[4].mxu1 %v549_v18 }
 0x33a   :  { %2516 = vmatprep.mubr.msk.bf16.mxu1 %vm3090_vm2, %v3089_v53 }
 0x3ec   :  { %v741_v35 = vpop.f32.mrb[0].mxu1 }
 0x3ed   :  { %v743_v37 = vpop.f32.mrb[1].mxu1  ;;  %v742_v39 = vadd.f32 %v741_v35, %v570_v34 }
 0x3ee   :  { %v745_v38 = vpop.f32.mrb[2].mxu1  ;;  %v744_v42 = vadd.f32 %v743_v37, %v574_v36 }
 0x3ef   :  { %v746_v40 = vadd.f32 %v745_v38, %v570_v34  ;;  %v747_v41 = vpop.f32.mrb[3].mxu1 }
 0x3f0   :  { %v748_v43 = vadd.f32 %v747_v41, %v574_v36 }
 0x3f1   :  { %v3414_v44 = vpack.c.bf16 %v746_v40, %v742_v39 }
 0x3f2   :  { %v3416_v45 = vpack.c.bf16 %v748_v43, %v744_v42 }
 0x3f4   :  { %v820_v46 = vsel %vm815_vm3, %v3416_v45, 0 }
 0x3f5   :  { %2497 = vmatpush3.bf16.xpose.msra.mxu0 %v820_v46 }
 0x3f6   :  { %2502 = vmatprep.subr.bf16.mxu0 %v3089_v53 }
 0x3fc   :  { %2499 = vmatmul.mubr.msk.bf16.vlgmr.msra.gmra.mrb[4].mxu0 %vm815_vm3, %v3414_v44 }
 0x3fd   :  { %2504 = vmatprep.mubr.msk.bf16.mxu0 %vm3090_vm2, %v3089_v53 }
 0x40c   :  { %v784_v50 = vpop.f32.mrb[4].mxu1 }
 0x40d   :  { %v2494_v51 = vpop.f32.mrb[5].mxu1  ;;  %v785_v54 = vadd.f32 %v784_v50, %v578_v49 }
 0x40e   :  { %v787_v52 = vpop.f32.mrb[6].mxu1 }
 0x40f   :  { %v788_v55 = vadd.f32 %v787_v52, %v578_v49  ;;  %v2495_v56 = vpop.f32.mrb[7].mxu1 }
 0x411   :  { %v3429_v57 = vpack.c.bf16 %v788_v55, %v785_v54 }
 0x413   :  { %2503 = vmatpush3.bf16.msra.mxu0 %v3429_v57 }
 0x414   :  { %2508 = vmatprep.subr.bf16.mxu0 %v3089_v53 }
 0x4cf   :  { %v856_v9 = vpop.f32.mrb[4].mxu0 }
 0x4d0   :  { %v863_v11 = vmul.f32 0.17677669, %v856_v9  ;;  %v2500_v12 = vpop.f32.mrb[5].mxu0 }
 0x4d1   :  { %v859_v13 = vpop.f32.mrb[6].mxu0 }
 0x4d2   :  { %v864_v16 = vmul.f32 0.17677669, %v859_v13  ;;  %v2501_v18 = vpop.f32.mrb[7].mxu0  ;;  %v865_v19 = vadd.f32 %v863_v11, %v3436_v15 }
 0x4d4   :  { %v868_v20 = vsel %vm867_vm6, %v865_v19, -inf  ;;  %v866_v22 = vadd.f32 %v864_v16, %v3438_v14 }
 0x4d5   :  { %869 = vmax.xlane.f32.xlu0 %v868_v20 }
 0x4d6   :  { %v871_v23 = vsel %vm867_vm6, %v866_v22, -inf }
 0x4d7   :  { %872 = vmax.xlane.f32.xlu1 %v871_v23 }
 0x562   :  { %v870_v24 = vpop.xlane.xlu0 %869 }
 0x563   :  { %v874_v25 = vsub.f32 %v865_v19, %v870_v24 }
 0x564   :  { %v873_v26 = vpop.xlane.xlu1 %872 }
 0x565   :  { %v876_v27 = vmul.f32 1.442695, %v874_v25  ;;  %v875_v28 = vsub.f32 %v866_v22, %v873_v26 }
 0x567   :  { %2767 = vpow2.f32 %v876_v27  ;;  %v878_v31 = vmul.f32 1.442695, %v875_v28 }
 0x569   :  { %2769 = vpow2.f32 %v878_v31 }
 0x571   :  { %v2768_v33 = vpop.eup %2767 }
 0x572   :  { %v880_v34 = vsel %vm867_vm6, %v2768_v33, 0.0 }
 0x573   :  { %v2770_v35 = vpop.eup %2769  ;;  %881 = vadd.xlane.f32.xlu0 %v880_v34 }
 0x574   :  { %v883_v36 = vsel %vm867_vm6, %v2770_v35, 0.0 }
 0x575   :  { %884 = vadd.xlane.f32.xlu1 %v883_v36 }
 0x586   :  { %936 = vrot.lane.b32.xlu1 %v3414_v44, %s3092_s3 }
 0x589   :  { %939 = vrot.lane.b32.xlu0 %v3416_v45, %s3092_s3 }
 0x58a   :  { %1065 = vrot.lane.b32.xlu1 %v3416_v45, %s3079_s30 }
 0x58d   :  { %1190 = vrot.lane.b32.xlu0 %v3416_v45, %s3093_s22 }
 0x58e   :  { %1063 = vrot.lane.b32.xlu1 %v3414_v44, %s3079_s30 }
 0x592   :  { %1188 = vrot.lane.b32.xlu1 %v3414_v44, %s3093_s22 }
 0x600   :  { %v882_v37 = vpop.xlane.xlu0 %881 }
 0x601   :  { %2771 = vrcp.f32 %v882_v37 }
 0x602   :  { %v885_v38 = vpop.xlane.xlu1 %884 }
 0x603   :  { %2773 = vrcp.f32 %v885_v38 }
 0x604   :  { %v940_v43 = vpop.permute.xlu0 %939 }
 0x605   :  { %v945_v49 = vsel %vm815_vm3, %v940_v43, 0 }
 0x606   :  { %v937_v48 = vpop.permute.xlu1 %936 }
 0x608   :  { %v1191_v50 = vpop.permute.xlu0 %1190 }
 0x609   :  { %v1196_v52 = vsel %vm815_vm3, %v1191_v50, 0 }
 0x60a   :  { %v1066_v44 = vpop.permute.xlu1 %1065 }
 0x60b   :  { %v2772_v39 = vpop.eup %2771  ;;  %v1071_v45 = vsel %vm815_vm3, %v1066_v44, 0 }
 0x60c   :  { %v888_v41 = vmul.f32 %v2772_v39, %v2768_v33 }
 0x60d   :  { %v2774_v40 = vpop.eup %2773 }
 0x60e   :  { %v889_v42 = vmul.f32 %v2774_v40, %v2770_v35  ;;  %v1064_v51 = vpop.permute.xlu1 %1063 }
 0x610   :  { %v890_v46 = vpack.c.bf16 %v889_v42, %v888_v41 }
 0x612   :  { %2505 = vmatmul.mubr.msk.bf16.vlgmr.msra.gmra.mrb[8].mxu0 %vm867_vm6, %v890_v46  ;;  %v1189_v54 = vpop.permute.xlu1 %1188 }
 0x613   :  { %2509 = vmatpush3.bf16.xpose.msra.mxu0 %v945_v49  ;;  %2510 = vmatprep.mubr.msk.bf16.mxu0 %vm3090_vm2, %v3089_v53 }
 0x614   :  { %2520 = vmatprep.subr.bf16.mxu0 %v3089_v53 }
 0x61a   :  { %2511 = vmatmul.mubr.msk.bf16.vlgmr.msra.gmra.mrb[12].mxu0 %vm815_vm3, %v937_v48 }
 0x61b   :  { %2521 = vmatpush3.bf16.xpose.msra.mxu0 %v1071_v45  ;;  %2522 = vmatprep.mubr.msk.bf16.mxu0 %vm3090_vm2, %v3089_v53 }
 0x61c   :  { %2532 = vmatprep.subr.bf16.mxu0 %v3089_v53 }
 0x622   :  { %2523 = vmatmul.mubr.msk.bf16.vlgmr.msra.gmra.mrb[16].mxu0 %vm815_vm3, %v1064_v51 }
 0x623   :  { %2533 = vmatpush3.bf16.xpose.msra.mxu0 %v1196_v52  ;;  %2534 = vmatprep.mubr.msk.bf16.mxu0 %vm3090_vm2, %v3089_v53 }
 0x624   :  { %2544 = vmatprep.subr.bf16.mxu0 %v3089_v53 }
 0x62a   :  { %2535 = vmatmul.mubr.msk.bf16.vlgmr.msra.gmra.mrb[20].mxu0 %vm815_vm3, %v1189_v54 }
 0x62b   :  { %2560 = vmatprep.mubr.msk.bf16.mxu0 %vm3090_vm2, %v3089_v53 }
 0x6e5   :  { %v3476_v55 = vpop.f32.mrb[8].mxu0 }
 0x6e6   :  { %v2506_v56 = vpop.f32.mrb[9].mxu0 }
 0x6e7   :  { %v3478_v58 = vpop.f32.mrb[10].mxu0 }
 0x6e8   :  { %v2507_v59 = vpop.f32.mrb[11].mxu0 }
 0x6ed   :  { %v981_v60 = vpop.f32.mrb[12].mxu0 }
 0x6ee   :  { %v988_v61 = vmul.f32 0.17677669, %v981_v60  ;;  %v2512_v62 = vpop.f32.mrb[13].mxu0 }
 0x6ef   :  { %v984_v63 = vpop.f32.mrb[14].mxu0 }
 0x6f0   :  { %v989_v1 = vmul.f32 0.17677669, %v984_v63  ;;  %v2513_v2 = vpop.f32.mrb[15].mxu0  ;;  %v990_v3 = vadd.f32 %v988_v61, %v3436_v15 }
 0x6f2   :  { %v992_v4 = vsel %vm867_vm6, %v990_v3, -inf  ;;  %v991_v5 = vadd.f32 %v989_v1, %v3438_v14 }
 0x6f3   :  { %993 = vmax.xlane.f32.xlu0 %v992_v4 }
 0x6f4   :  { %v995_v6 = vsel %vm867_vm6, %v991_v5, -inf }
 0x6f5   :  { %996 = vmax.xlane.f32.xlu1 %v995_v6  ;;  %v1107_v7 = vpop.f32.mrb[16].mxu0 }
 0x6f6   :  { %v1114_v8 = vmul.f32 0.17677669, %v1107_v7  ;;  %v2524_v9 = vpop.f32.mrb[17].mxu0 }
 0x6f7   :  { %v1110_v10 = vpop.f32.mrb[18].mxu0 }
 0x6f8   :  { %v1115_v11 = vmul.f32 0.17677669, %v1110_v10  ;;  %v2525_v12 = vpop.f32.mrb[19].mxu0  ;;  %v1116_v13 = vadd.f32 %v1114_v8, %v3436_v15 }
 0x6fa   :  { %v1118_v16 = vsel %vm867_vm6, %v1116_v13, -inf  ;;  %v1117_v18 = vadd.f32 %v1115_v11, %v3438_v14 }
 0x6fb   :  { %1119 = vmax.xlane.f32.xlu0 %v1118_v16 }
 0x6fc   :  { %v1121_v23 = vsel %vm867_vm6, %v1117_v18, -inf }
 0x6fd   :  { %v1232_v19 = vpop.f32.mrb[20].mxu0 }
 0x6fe   :  { %v1239_v20 = vmul.f32 0.17677669, %v1232_v19  ;;  %v2536_v22 = vpop.f32.mrb[21].mxu0 }
 0x6ff   :  { %1122 = vmax.xlane.f32.xlu0 %v1121_v23  ;;  %v1235_v24 = vpop.f32.mrb[22].mxu0 }
 0x700   :  { %v1240_v25 = vmul.f32 0.17677669, %v1235_v24  ;;  %v2537_v26 = vpop.f32.mrb[23].mxu0  ;;  %v1241_v27 = vadd.f32 %v1239_v20, %v3436_v15 }
 0x702   :  { %v1243_v28 = vsel %vm867_vm6, %v1241_v27, -inf  ;;  %v1242_v31 = vadd.f32 %v1240_v25, %v3438_v14 }
 0x703   :  { %1244 = vmax.xlane.f32.xlu0 %v1243_v28 }
 0x704   :  { %v1246_v33 = vsel %vm867_vm6, %v1242_v31, -inf }
 0x705   :  { %1247 = vmax.xlane.f32.xlu1 %v1246_v33 }
 0x780   :  { %v994_v34 = vpop.xlane.xlu0 %993 }
 0x781   :  { %v998_v35 = vsub.f32 %v990_v3, %v994_v34 }
 0x782   :  { %v997_v36 = vpop.xlane.xlu1 %996 }
 0x783   :  { %v1000_v37 = vmul.f32 1.442695, %v998_v35  ;;  %v999_v38 = vsub.f32 %v991_v5, %v997_v36 }
 0x785   :  { %2775 = vpow2.f32 %v1000_v37  ;;  %v1002_v39 = vmul.f32 1.442695, %v999_v38  ;;  %v2667_v37 = vld [vmem:[#allocation10] sm:$0xff]  }
 0x786   :  { %2545 = vmatpush3.bf16.msra.mxu0 %v2667_v37 }
 0x787   :  { %2777 = vpow2.f32 %v1002_v39  ;;  %2546 = vmatprep.subr.bf16.mxu0 %v3089_v53 }
 0x788   :  { %v1120_v40 = vpop.xlane.xlu0 %1119 }
 0x789   :  { %v1124_v41 = vsub.f32 %v1116_v13, %v1120_v40  ;;  %v2668_v40 = vld [vmem:[#allocation10 + $0x8] sm:$0xff]  }
 0x78a   :  { %2547 = vmatpush3.bf16.msra.mxu0 %v2668_v40 }
 0x78b   :  { %v1126_v42 = vmul.f32 1.442695, %v1124_v41  ;;  %2548 = vmatprep.subr.bf16.mxu0 %v3089_v53 }
 0x78c   :  { %v1123_v15 = vpop.xlane.xlu0 %1122 }
 0x78d   :  { %2779 = vpow2.f32 %v1126_v42  ;;  %v1125_v43 = vsub.f32 %v1117_v18, %v1123_v15  ;;  %v2669_v42 = vld [vmem:[#allocation10 + $0x10] sm:$0xff]  }
 0x78e   :  { %2549 = vmatpush3.bf16.msra.mxu0 %v2669_v42  ;;  %v2692_v42 = vld [vmem:[%s3868_s12 + $0x4c] ss:$16 sps:$4 sm:$0xff]  }
 0x78f   :  { %v2776_v46 = vpop.eup %2775  ;;  %v1128_v14 = vmul.f32 1.442695, %v1125_v43  ;;  %2550 = vmatprep.subr.bf16.mxu0 %v3089_v53 }
 0x790   :  { %v1245_v48 = vpop.xlane.xlu0 %1244  ;;  %v1004_v49 = vsel %vm867_vm6, %v2776_v46, 0.0 }
 0x791   :  { %v2778_v44 = vpop.eup %2777  ;;  %2781 = vpow2.f32 %v1128_v14  ;;  %v1249_v45 = vsub.f32 %v1241_v27, %v1245_v48  ;;  %1005 = vadd.xlane.f32.xlu0 %v1004_v49  ;;  %v2670_v48 = vld [vmem:[#allocation10 + $0x18] sm:$0xff]   ;;  %v2671_v49 = vld [vmem:[#allocation10 + $0x20] sm:$0xff]  }
 0x792   :  { %v1007_v50 = vsel %vm867_vm6, %v2778_v44, 0.0  ;;  %v1248_v62 = vpop.xlane.xlu1 %1247  ;;  %2551 = vmatpush3.bf16.msra.mxu0 %v2670_v48  ;;  %v2693_v48 = vld [vmem:[%s3868_s12 + $0x60] ss:$16 sps:$4 sm:$0xff]  }
 0x793   :  { %v1251_v51 = vmul.f32 1.442695, %v1249_v45  ;;  %1008 = vadd.xlane.f32.xlu1 %v1007_v50  ;;  %v1250_v63 = vsub.f32 %v1242_v31, %v1248_v62  ;;  %2552 = vmatprep.subr.bf16.mxu0 %v3089_v53  ;;  %v2673_v45 = vld [vmem:[#allocation10 + $0x30] sm:$0xff]   ;;  %v2674_v50 = vld [vmem:[#allocation10 + $0x38] sm:$0xff]  }
 0x795   :  { %2783 = vpow2.f32 %v1251_v51  ;;  %v1253_v1 = vmul.f32 1.442695, %v1250_v63 }
 0x796   :  { %2553 = vmatpush3.bf16.msra.mxu0 %v2671_v49  ;;  %v2696_v49 = vld [vmem:[%s3868_s12 + $0x68] ss:$16 sps:$4 sm:$0xff]  }
 0x797   :  { %v2780_v52 = vpop.eup %2779  ;;  %2785 = vpow2.f32 %v1253_v1  ;;  %2554 = vmatprep.subr.bf16.mxu0 %v3089_v53 }
 0x798   :  { %v1130_v54 = vsel %vm867_vm6, %v2780_v52, 0.0 }
 0x799   :  { %1131 = vadd.xlane.f32.xlu0 %v1130_v54 }
 0x79b   :  { %v2782_v56 = vpop.eup %2781 }
 0x79c   :  { %v1133_v59 = vsel %vm867_vm6, %v2782_v56, 0.0 }
 0x79d   :  { %1134 = vadd.xlane.f32.xlu1 %v1133_v59 }
 0x79f   :  { %v2784_v60 = vpop.eup %2783 }
 0x7a0   :  { %v1255_v61 = vsel %vm867_vm6, %v2784_v60, 0.0 }
 0x7a1   :  { %1256 = vadd.xlane.f32.xlu0 %v1255_v61  ;;  %v2786_v2 = vpop.eup %2785 }
 0x7a2   :  { %v1258_v3 = vsel %vm867_vm6, %v2786_v2, 0.0 }
 0x7ae   :  { %1141 = vrot.lane.b32.xlu1 %v3429_v57, %s3079_s30 }
 0x7b7   :  { %1016 = vrot.lane.b32.xlu0 %v3429_v57, %s3092_s3 }
 0x7d2   :  { %1259 = vadd.xlane.f32.xlu1 %v1258_v3 }
 0x7e3   :  { %1266 = vrot.lane.b32.xlu1 %v3429_v57, %s3093_s22 }
 0x81e   :  { %v1006_v5 = vpop.xlane.xlu0 %1005 }
 0x820   :  { %v1009_v4 = vpop.xlane.xlu1 %1008 }
 0x821   :  { %2787 = vrcp.f32 %v1009_v4 }
 0x822   :  { %2789 = vrcp.f32 %v1006_v5 }
 0x826   :  { %v1132_v6 = vpop.xlane.xlu0 %1131 }
 0x82a   :  { %v1135_v7 = vpop.xlane.xlu1 %1134 }
 0x82b   :  { %2791 = vrcp.f32 %v1135_v7  ;;  %v2788_v8 = vpop.eup %2787 }
 0x82c   :  { %2793 = vrcp.f32 %v1132_v6  ;;  %v2790_v10 = vpop.eup %2789  ;;  %v1013_v11 = vmul.f32 %v2788_v8, %v2778_v44  ;;  %v2672_v44 = vld [vmem:[#allocation10 + $0x28] sm:$0xff]  }
 0x82d   :  { %v1012_v12 = vmul.f32 %v2790_v10, %v2776_v46  ;;  %2555 = vmatpush3.bf16.msra.mxu0 %v2672_v44  ;;  %v2701_v44 = vld [vmem:[%s3868_s12 + $0x84] ss:$16 sps:$4 sm:$0xff]  }
 0x82e   :  { %v1257_v9 = vpop.xlane.xlu0 %1256  ;;  %v1142_v57 = vpop.permute.xlu1 %1141  ;;  %2556 = vmatprep.subr.bf16.mxu0 %v3089_v53 }
 0x82f   :  { %v1014_v16 = vpack.c.bf16 %v1013_v11, %v1012_v12  ;;  %2795 = vrcp.f32 %v1257_v9 }
 0x831   :  { %2557 = vmatpush3.bf16.msra.mxu0 %v2673_v45  ;;  %v2704_v45 = vld [vmem:[%s3868_s12 + $0x8c] ss:$16 sps:$4 sm:$0xff]  }
 0x832   :  { %v1017_v13 = vpop.permute.xlu0 %1016  ;;  %2558 = vmatprep.subr.bf16.mxu0 %v3089_v53 }
 0x833   :  { %2515 = vmatpush3.bf16.msra.mxu1 %v1017_v13  ;;  %v411_v13 = vld [vmem:[#allocation12] sm:$0x1] }
 0x834   :  { %2526 = vmatprep.subr.bf16.mxu1 %v3089_v53 }
 0x835   :  { %v2792_v18 = vpop.eup %2791  ;;  %2559 = vmatpush3.bf16.msra.mxu0 %v2674_v50  ;;  %v2699_v50 = vld [vmem:[%s3868_s12 + $0x80] ss:$16 sps:$4 sm:$0xff]  }
 0x836   :  { %2517 = vmatmul.mubr.msk.bf16.vlgmr.msra.gmra.mrb[8].mxu1 %vm867_vm6, %v1014_v16  ;;  %v2794_v19 = vpop.eup %2793  ;;  %v1139_v20 = vmul.f32 %v2792_v18, %v2782_v56  ;;  %v1436_v16 = vunpack.c.l.bf16 %v411_v13  ;;  %v413_v13 = vld [vmem:[#allocation15] sm:$0x1] }
 0x837   :  { %2527 = vmatpush3.bf16.msra.mxu1 %v1142_v57  ;;  %2528 = vmatprep.mubr.msk.bf16.mxu1 %vm3090_vm2, %v3089_v53  ;;  %v1138_v22 = vmul.f32 %v2794_v19, %v2780_v52 }
 0x838   :  { %2538 = vmatprep.subr.bf16.mxu1 %v3089_v53  ;;  %v1440_v18 = vrot.slane %v1436_v16, %v3379_v21 }
 0x839   :  { %v1140_v23 = vpack.c.bf16 %v1139_v20, %v1138_v22  ;;  %v2796_v26 = vpop.eup %2795 }
 0x83a   :  { %v1263_v28 = vmul.f32 %v2796_v26, %v2784_v60  ;;  %v2683_v26 = vld [vmem:[%s3868_s12 + $0x24] ss:$16 sps:$4 sm:$0xff]  }
 0x83e   :  { %2529 = vmatmul.mubr.msk.bf16.vlgmr.msra.gmra.mrb[12].mxu1 %vm867_vm6, %v1140_v23 }
 0x83f   :  { %2540 = vmatprep.mubr.msk.bf16.mxu1 %vm3090_vm2, %v3089_v53 }
 0x85f   :  { %v1260_v24 = vpop.xlane.xlu1 %1259 }
 0x860   :  { %2797 = vrcp.f32 %v1260_v24 }
 0x863   :  { %v1267_v25 = vpop.permute.xlu1 %1266 }
 0x864   :  { %2539 = vmatpush3.bf16.msra.mxu1 %v1267_v25  ;;  %v2678_v25 = vld [vmem:[%s3868_s12 + $0x8] ss:$16 sps:$4 sm:$0xff]  }
 0x86a   :  { %v2798_v27 = vpop.eup %2797 }
 0x86b   :  { %v1264_v31 = vmul.f32 %v2798_v27, %v2786_v2  ;;  %v2686_v27 = vld [vmem:[%s3868_s12 + $0x2c] ss:$16 sps:$4 sm:$0xff]  }
 0x86d   :  { %v1265_v33 = vpack.c.bf16 %v1264_v31, %v1263_v28  ;;  %v2681_v28 = vld [vmem:[%s3868_s12 + $0x20] ss:$16 sps:$4 sm:$0xff]   ;;  %v2684_v31 = vld [vmem:[%s3868_s12 + $0x28] ss:$16 sps:$4 sm:$0xff]  }
 0x86f   :  { %2541 = vmatmul.mubr.msk.bf16.vlgmr.msra.gmra.mrb[16].mxu1 %vm867_vm6, %v1265_v33 }
 0x870   :  { %1710 = vmatprep.mubr.bf16.mxu1 %v3088_v0 }
 0x909   :  { %v1056_v34 = vpop.f32.mrb[8].mxu1 }
 0x90a   :  { %v2518_v35 = vpop.f32.mrb[9].mxu1 }
 0x90b   :  { %v1059_v36 = vpop.f32.mrb[10].mxu1 }
 0x90c   :  { %v2605_v38 = vpack.i.bf16 %v1059_v36, %v1056_v34  ;;  %v2519_v39 = vpop.f32.mrb[11].mxu1 }
 0x90e   :  { %2606 = vrot.lane.b32.xlu1 %v2605_v38, %s3093_s22 }
 0x911   :  { %v1181_v41 = vpop.f32.mrb[12].mxu1 }
 0x912   :  { %v2530_v15 = vpop.f32.mrb[13].mxu1 }
 0x913   :  { %v1184_v43 = vpop.f32.mrb[14].mxu1  ;;  %v2687_v15 = vld [vmem:[%s3868_s12 + $0x40] ss:$16 sps:$4 sm:$0xff]  }
 0x914   :  { %v2610_v46 = vpack.i.bf16 %v1184_v43, %v1181_v41  ;;  %v2531_v14 = vpop.f32.mrb[15].mxu1  ;;  %v2689_v41 = vld [vmem:[%s3868_s12 + $0x44] ss:$16 sps:$4 sm:$0xff]   ;;  %v2690_v43 = vld [vmem:[%s3868_s12 + $0x48] ss:$16 sps:$4 sm:$0xff]  }
 0x915   :  { %v2698_v14 = vld [vmem:[%s3868_s12 + $0x6c] ss:$16 sps:$4 sm:$0xff]  }
 0x916   :  { %2611 = vrot.lane.b32.xlu0 %v2610_v46, %s3079_s30  ;;  %v2695_v46 = vld [vmem:[%s3868_s12 + $0x64] ss:$16 sps:$4 sm:$0xff]  }
 0x942   :  { %v1306_v51 = vpop.f32.mrb[16].mxu1 }
 0x943   :  { %v2542_v52 = vpop.f32.mrb[17].mxu1 }
 0x944   :  { %v1309_v54 = vpop.f32.mrb[18].mxu1  ;;  %v2707_v52 = vld [vmem:[%s3868_s12 + $0xa4] ss:$16 sps:$4 sm:$0xff]  }
 0x945   :  { %v2615_v56 = vpack.i.bf16 %v1309_v54, %v1306_v51  ;;  %v2543_v59 = vpop.f32.mrb[19].mxu1  ;;  %v2702_v51 = vld [vmem:[%s3868_s12 + $0x88] ss:$16 sps:$4 sm:$0xff]   ;;  %v2710_v54 = vld [vmem:[%s3868_s12 + $0xac] ss:$16 sps:$4 sm:$0xff]  }
 0x946   :  { %v2708_v59 = vld [vmem:[%s3868_s12 + $0xa8] ss:$16 sps:$4 sm:$0xff]  }
 0x947   :  { %2616 = vrot.lane.b32.xlu1 %v2615_v56, %s3092_s3  ;;  %v2705_v56 = vld [vmem:[%s3868_s12 + $0xa0] ss:$16 sps:$4 sm:$0xff]  }
 0x980   :  { %v2607_v60 = vpop.permute.xlu1 %2606 }
 0x981   :  { %v2609_v62 = vunpack.i.h.bf16 %v2607_v60  ;;  %v2608_v63 = vunpack.i.l.bf16 %v2607_v60  ;;  %v2713_v60 = vld [vmem:[%s3868_s12 + $0xc4] ss:$16 sps:$4 sm:$0xff]  }
 0x983   :  { %v1338_v4 = vsel %vm815_vm3, %v3478_v58, %v2609_v62  ;;  %v1337_v5 = vsel %vm815_vm3, %v3476_v55, %v2608_v63  ;;  %v2711_v62 = vld [vmem:[%s3868_s12 + $0xc0] ss:$16 sps:$4 sm:$0xff]   ;;  %v2714_v63 = vld [vmem:[%s3868_s12 + $0xc8] ss:$16 sps:$4 sm:$0xff]  }
 0x988   :  { %v2612_v61 = vpop.permute.xlu0 %2611 }
 0x989   :  { %v2614_v1 = vunpack.i.h.bf16 %v2612_v61  ;;  %v2613_v2 = vunpack.i.l.bf16 %v2612_v61  ;;  %v2716_v61 = vld [vmem:[%s3868_s12 + $0xcc] ss:$16 sps:$4 sm:$0xff]  }
 0x98b   :  { %v1339_v8 = vsel %vm313_vm0, %v1337_v5, %v2613_v2  ;;  %v1340_v9 = vsel %vm313_vm0, %v1338_v4, %v2614_v1  ;;  %v2719_v1 = vld [vmem:[%s3868_s12 + $0xe4] ss:$16 sps:$4 sm:$0xff]   ;;  %v2722_v2 = vld [vmem:[%s3868_s12 + $0xec] ss:$16 sps:$4 sm:$0xff]   ;;  %v2720_v4 = vld [vmem:[%s3868_s12 + $0xe8] ss:$16 sps:$4 sm:$0xff]  }
 0x9b9   :  { %v2617_v3 = vpop.permute.xlu1 %2616 }
 0x9ba   :  { %v2619_v6 = vunpack.i.h.bf16 %v2617_v3  ;;  %v2618_v7 = vunpack.i.l.bf16 %v2617_v3  ;;  %v2717_v3 = vld [vmem:[%s3868_s12 + $0xe0] ss:$16 sps:$4 sm:$0xff]  }
 0x9bc   :  { %v1342_v10 = vsel %vm1341_vm7, %v1339_v8, %v2618_v7  ;;  %v1343_v11 = vsel %vm1341_vm7, %v1340_v9, %v2619_v6 }
 0x9bd   :  { %v1344_v12 = vpack.c.bf16 %v1343_v11, %v1342_v10  ;;  %v412_v11 = vld [vmem:[#allocation13] sm:$0x1] }
 0x9bf   :  { %2561 = vmatmul.mubr.bf16.vlgmr.msra.gmra.mrb[24].mxu0 %v1344_v12  ;;  %v1465_v12 = vunpack.c.l.bf16 %v412_v11 }
 0x9c0   :  { %1753 = vmatprep.mubr.bf16.mxu0 %v3088_v0  ;;  %v2675_v0 = vld [vmem:[%s3868_s12] ss:$16 sps:$4 sm:$0xff]  }
 0xa92   :  { %v1427_v58 = vpop.f32.mrb[24].mxu0 }
 0xa93   :  { %v1434_v57 = vadd.f32 %v1427_v58, %v3382_v29  ;;  %v2562_v55 = vpop.f32.mrb[25].mxu0  ;;  %v2677_v29 = vld [vmem:[%s3868_s12 + $0x4] ss:$16 sps:$4 sm:$0xff]   ;;  %v1469_v58 = vrot.slane %v1465_v12, %v3379_v21 }
 0xa94   :  { %v1430_v19 = vpop.f32.mrb[26].mxu0  ;;  %1678 = vmatprep.subr.bf16.mxu1 %v2677_v29 }
 0xa95   :  { %v3533_v20 = vadd.f32 %v1440_v18, %v1434_v57  ;;  %v1435_v22 = vadd.f32 %v1430_v19, %v3385_v32  ;;  %v2563_v23 = vpop.f32.mrb[27].mxu0  ;;  %v2680_v32 = vld [vmem:[%s3868_s12 + $0xc] ss:$16 sps:$4 sm:$0xff]   ;;  %1679 = vmatpush1.bf16.msra.mxu1 %v2675_v0  ;;  %v1472_v57 = vunpack.c.l.bf16 %v413_v13 }
 0xa96   :  { %1721 = vmatprep.subr.bf16.mxu0 %v2680_v32  ;;  %1680 = vmatprep.subr.bf16.mxu1 %v2683_v26  ;;  %v2723_v26 = vld [vmem:[%s3870_s14 + $0x40] sm:$0xff]  }
 0xa97   :  { %v3536_v24 = vadd.f32 %v1440_v18, %v1435_v22  ;;  %1443 = vadd.xlane.f32.xlu0 %v3533_v20  ;;  %1722 = vmatpush1.bf16.msra.mxu0 %v2678_v25  ;;  %v1476_v23 = vrot.slane %v1472_v57, %v3379_v21 }
 0xa98   :  { %1723 = vmatprep.subr.bf16.mxu0 %v2686_v27  ;;  %v2724_v27 = vld [vmem:[%s3870_s14 + $0xc0] sm:$0xff]  }
 0xa99   :  { %1445 = vadd.xlane.f32.xlu1 %v3536_v24  ;;  %1681 = vmatpush1.bf16.msra.mxu1 %v2681_v28  ;;  %v2725_v28 = vld [vmem:[%s3870_s14] sm:$0xff]  }
 0xa9a   :  { %1682 = vmatprep.subr.bf16.mxu1 %v2689_v41  ;;  %v2735_v41 = vld [vmem:[%s3870_s14 + $0x58] sm:$0xff]  }
 0xa9b   :  { %1724 = vmatpush1.bf16.msra.mxu0 %v2684_v31  ;;  %v2726_v31 = vld [vmem:[%s3870_s14 + $0x80] sm:$0xff]  }
 0xa9c   :  { %1725 = vmatprep.subr.bf16.mxu0 %v2692_v42  ;;  %v2736_v42 = vld [vmem:[%s3870_s14 + $0xd8] sm:$0xff]  }
 0xa9d   :  { %1683 = vmatpush1.bf16.msra.mxu1 %v2687_v15  ;;  %v2737_v15 = vld [vmem:[%s3870_s14 + $0x18] sm:$0xff]  }
 0xa9e   :  { %1684 = vmatprep.subr.bf16.mxu1 %v2695_v46  ;;  %v2739_v46 = vld [vmem:[%s3870_s14 + $0x60] sm:$0xff]  }
 0xa9f   :  { %1726 = vmatpush1.bf16.msra.mxu0 %v2690_v43  ;;  %v2738_v43 = vld [vmem:[%s3870_s14 + $0x98] sm:$0xff]  }
 0xaa0   :  { %1727 = vmatprep.subr.bf16.mxu0 %v2698_v14  ;;  %v2740_v14 = vld [vmem:[%s3870_s14 + $0xe0] sm:$0xff]  }
 0xaa1   :  { %1685 = vmatpush1.bf16.msra.mxu1 %v2693_v48  ;;  %v2741_v48 = vld [vmem:[%s3870_s14 + $0x20] sm:$0xff]  }
 0xaa2   :  { %1686 = vmatprep.subr.bf16.mxu1 %v2701_v44  ;;  %v2743_v44 = vld [vmem:[%s3870_s14 + $0x68] sm:$0xff]  }
 0xaa3   :  { %1728 = vmatpush1.bf16.msra.mxu0 %v2696_v49  ;;  %v2742_v49 = vld [vmem:[%s3870_s14 + $0xa0] sm:$0xff]  }
 0xaa4   :  { %1729 = vmatprep.subr.bf16.mxu0 %v2704_v45  ;;  %v2744_v45 = vld [vmem:[%s3870_s14 + $0xe8] sm:$0xff]  }
 0xaa5   :  { %1687 = vmatpush1.bf16.msra.mxu1 %v2699_v50  ;;  %v2745_v50 = vld [vmem:[%s3870_s14 + $0x28] sm:$0xff]  }
 0xaa6   :  { %1688 = vmatprep.subr.bf16.mxu1 %v2707_v52  ;;  %v2747_v52 = vld [vmem:[%s3870_s14 + $0x70] sm:$0xff]  }
 0xaa7   :  { %1730 = vmatpush1.bf16.msra.mxu0 %v2702_v51  ;;  %v2746_v51 = vld [vmem:[%s3870_s14 + $0xa8] sm:$0xff]  }
 0xaa8   :  { %1731 = vmatprep.subr.bf16.mxu0 %v2710_v54  ;;  %v2748_v54 = vld [vmem:[%s3870_s14 + $0xf0] sm:$0xff]  }
 0xaa9   :  { %1689 = vmatpush1.bf16.msra.mxu1 %v2705_v56  ;;  %v2749_v56 = vld [vmem:[%s3870_s14 + $0x30] sm:$0xff]  }
 0xaaa   :  { %1690 = vmatprep.subr.bf16.mxu1 %v2713_v60  ;;  %v2751_v60 = vld [vmem:[%s3870_s14 + $0x78] sm:$0xff]  }
 0xaab   :  { %1732 = vmatpush1.bf16.msra.mxu0 %v2708_v59  ;;  %v2750_v59 = vld [vmem:[%s3870_s14 + $0xb0] sm:$0xff]  }
 0xaac   :  { %1733 = vmatprep.subr.bf16.mxu0 %v2716_v61  ;;  %v2752_v61 = vld [vmem:[%s3870_s14 + $0xf8] sm:$0xff]  }
 0xaad   :  { %1691 = vmatpush1.bf16.msra.mxu1 %v2711_v62  ;;  %v2753_v62 = vld [vmem:[%s3870_s14 + $0x38] sm:$0xff]  }
 0xaae   :  { %1692 = vmatprep.subr.bf16.mxu1 %v2719_v1  ;;  %v446_v1 = vld [vmem:[#allocation16] sm:$0xf] }
 0xaaf   :  { %1734 = vmatpush1.bf16.msra.mxu0 %v2714_v63  ;;  %v2754_v63 = vld [vmem:[%s3870_s14 + $0xb8] sm:$0xff]  }
 0xab0   :  { %1735 = vmatprep.subr.bf16.mxu0 %v2722_v2  ;;  %v1480_v2 = vunpack.c.l.bf16 %v446_v1 }
 0xab1   :  { %1693 = vmatpush1.bf16.msra.mxu1 %v2717_v3  ;;  %v1496_v3 = vsub.s32 6, %v3373_v17 }
 0xab2   :  { %2423 = vmatprep.subr.bf16.mxu1 %v2723_v26 }
 0xab3   :  { %1736 = vmatpush1.bf16.msra.mxu0 %v2720_v4  ;;  %v1485_v4 = vrot.slane %v1480_v2, %v3379_v21 }
 0xab4   :  { %2445 = vmatprep.subr.bf16.mxu0 %v2724_v27 }
 0xb24   :  { %v1444_v33 = vpop.xlane.xlu0 %1443 }
 0xb25   :  { %v1447_v34 = vmul.f32 0.0078125, %v1444_v33  ;;  %v2727_v33 = vld [vmem:[%s3870_s14 + $0x48] sm:$0xff]  }
 0xb26   :  { %v1446_v35 = vpop.xlane.xlu1 %1445 }
 0xb27   :  { %v3565_v36 = vsub.f32 %v3533_v20, %v1447_v34  ;;  %v1448_v37 = vmul.f32 0.0078125, %v1446_v35  ;;  %v2728_v34 = vld [vmem:[%s3870_s14 + $0xc8] sm:$0xff]  }
 0xb28   :  { %v2729_v35 = vld [vmem:[%s3870_s14 + $0x8] sm:$0xff]  }
 0xb29   :  { %v3568_v38 = vsub.f32 %v3536_v24, %v1448_v37  ;;  %v1451_v39 = vmul.f32 %v3565_v36, %v3565_v36  ;;  %v2731_v37 = vld [vmem:[%s3870_s14 + $0x50] sm:$0xff]  }
 0xb2b   :  { %1453 = vadd.xlane.f32.xlu0 %v1451_v39  ;;  %v1452_v40 = vmul.f32 %v3568_v38, %v3568_v38  ;;  %v2733_v39 = vld [vmem:[%s3870_s14 + $0x10] sm:$0xff]  }
 0xb2f   :  { %1455 = vadd.xlane.f32.xlu0 %v1452_v40  ;;  %v2734_v40 = vld [vmem:[%s3870_s14 + $0x90] sm:$0xff]  }
 0xbb8   :  { %v1454_v5 = vpop.xlane.xlu0 %1453 }
 0xbb9   :  { %v1457_v6 = vmul.f32 0.0078125, %v1454_v5  ;;  %v1493_v5 = vrot.slane %v1480_v2, %v562_v47 }
 0xbbb   :  { %v1459_v7 = vadd.f32 1e-05, %v1457_v6  ;;  %v1489_v6 = vrot.slane %v1480_v2, %v558_v30 }
 0xbbc   :  { %v1456_v8 = vpop.xlane.xlu0 %1455 }
 0xbbd   :  { %2799 = vrsqrt.f32 %v1459_v7  ;;  %v1458_v9 = vmul.f32 0.0078125, %v1456_v8  ;;  %v1497_v7 = vrot.slane %v1480_v2, %v1496_v3  ;;  %v1505_v8 = vrot.slane %v1485_v4, %v3379_v21 }
 0xbbf   :  { %v1460_v10 = vadd.f32 1e-05, %v1458_v9  ;;  %v1513_v9 = vrot.slane %v1493_v5, %v3379_v21  ;;  %v1517_v11 = vrot.slane %v1497_v7, %v3379_v21 }
 0xbc1   :  { %2801 = vrsqrt.f32 %v1460_v10  ;;  %v1509_v10 = vrot.slane %v1489_v6, %v3379_v21 }
 0xbc7   :  { %v2800_v16 = vpop.eup %2799 }
 0xbc8   :  { %v1463_v18 = vmul.f32 %v2800_v16, %v3565_v36  ;;  %v2730_v36 = vld [vmem:[%s3870_s14 + $0x88] sm:$0xff]  }
 0xbca   :  { %v1470_v22 = vmul.f32 %v1469_v58, %v1463_v18 }
 0xbcb   :  { %v2802_v55 = vpop.eup %2801 }
 0xbcc   :  { %v1464_v19 = vmul.f32 %v2802_v55, %v3568_v38  ;;  %v1477_v29 = vadd.f32 %v1476_v23, %v1470_v22  ;;  %v2732_v38 = vld [vmem:[%s3870_s14 + $0xd0] sm:$0xff]  }
 0xbce   :  { %v1471_v0 = vmul.f32 %v1469_v58, %v1464_v19 }
 0xbd0   :  { %v1478_v25 = vadd.f32 %v1476_v23, %v1471_v0 }
 0xbd2   :  { %v1479_v32 = vpack.c.bf16 %v1478_v25, %v1477_v29 }
 0xbd4   :  { %1711 = vmatmul.mubr.bf16.vlgmr.msra.gmra.mrb[20].mxu1 %v1479_v32  ;;  %1754 = vmatmul.mubr.bf16.vlgmr.msra.gmra.mrb[28].mxu0 %v1479_v32 }
 0xbd5   :  { %2424 = vmatpush3.bf16.msra.mxu1 %v2725_v28  ;;  %2446 = vmatpush3.bf16.msra.mxu0 %v2726_v31 }
 0xbd6   :  { %2425 = vmatprep.subr.bf16.mxu1 %v2727_v33  ;;  %2447 = vmatprep.subr.bf16.mxu0 %v2728_v34 }
 0xbd9   :  { %2426 = vmatpush3.bf16.msra.mxu1 %v2729_v35  ;;  %2448 = vmatpush3.bf16.msra.mxu0 %v2730_v36 }
 0xbda   :  { %2427 = vmatprep.subr.bf16.mxu1 %v2731_v37  ;;  %2449 = vmatprep.subr.bf16.mxu0 %v2732_v38 }
 0xbdd   :  { %2428 = vmatpush3.bf16.msra.mxu1 %v2733_v39  ;;  %2450 = vmatpush3.bf16.msra.mxu0 %v2734_v40 }
 0xbde   :  { %2429 = vmatprep.subr.bf16.mxu1 %v2735_v41  ;;  %2451 = vmatprep.subr.bf16.mxu0 %v2736_v42 }
 0xbe1   :  { %2430 = vmatpush3.bf16.msra.mxu1 %v2737_v15  ;;  %2452 = vmatpush3.bf16.msra.mxu0 %v2738_v43 }
 0xbe2   :  { %2431 = vmatprep.subr.bf16.mxu1 %v2739_v46  ;;  %2453 = vmatprep.subr.bf16.mxu0 %v2740_v14 }
 0xbe5   :  { %2432 = vmatpush3.bf16.msra.mxu1 %v2741_v48  ;;  %2454 = vmatpush3.bf16.msra.mxu0 %v2742_v49 }
 0xbe6   :  { %2433 = vmatprep.subr.bf16.mxu1 %v2743_v44  ;;  %2455 = vmatprep.subr.bf16.mxu0 %v2744_v45 }
 0xbe9   :  { %2434 = vmatpush3.bf16.msra.mxu1 %v2745_v50  ;;  %2456 = vmatpush3.bf16.msra.mxu0 %v2746_v51 }
 0xbea   :  { %2435 = vmatprep.subr.bf16.mxu1 %v2747_v52  ;;  %2457 = vmatprep.subr.bf16.mxu0 %v2748_v54 }
 0xbed   :  { %2436 = vmatpush3.bf16.msra.mxu1 %v2749_v56  ;;  %2458 = vmatpush3.bf16.msra.mxu0 %v2750_v59 }
 0xbee   :  { %2437 = vmatprep.subr.bf16.mxu1 %v2751_v60  ;;  %2459 = vmatprep.subr.bf16.mxu0 %v2752_v61 }
 0xbf1   :  { %2438 = vmatpush3.bf16.msra.mxu1 %v2753_v62  ;;  %2460 = vmatpush3.bf16.msra.mxu0 %v2754_v63 }
 0xbf2   :  { %2564 = vmatprep.subr.bf16.mxu1 %v3089_v53 }
 0xca7   :  { %v1712_v12 = vpop.f32.mrb[20].mxu1  ;;  %v1755_v13 = vpop.f32.mrb[28].mxu0 }
 0xca8   :  { %v3757_v16 = vadd.f32 %v1712_v12, %v1505_v8  ;;  %v3759_v18 = vadd.f32 %v1755_v13, %v1513_v9  ;;  %v1714_v58 = vpop.f32.mrb[21].mxu1  ;;  %v1757_v47 = vpop.f32.mrb[29].mxu0 }
 0xca9   :  { %v3761_v57 = vadd.f32 %v1714_v58, %v1509_v10  ;;  %v3763_v17 = vadd.f32 %v1757_v47, %v1517_v11  ;;  %v1716_v30 = vpop.f32.mrb[22].mxu1  ;;  %v1759_v55 = vpop.f32.mrb[30].mxu0 }
 0xcaa   :  { %v1764_v19 = vmul.f32 %v3757_v16, %v3757_v16  ;;  %v1766_v22 = vmul.f32 %v3759_v18, %v3759_v18  ;;  %v3769_v23 = vadd.f32 %v1716_v30, %v1505_v8  ;;  %v3771_v0 = vadd.f32 %v1759_v55, %v1513_v9  ;;  %v1718_v29 = vpop.f32.mrb[23].mxu1  ;;  %v1761_v25 = vpop.f32.mrb[31].mxu0 }
 0xcab   :  { %v1765_v32 = vmul.f32 %v3761_v57, %v3761_v57  ;;  %v1767_v26 = vmul.f32 %v3763_v17, %v3763_v17  ;;  %v3777_v27 = vadd.f32 %v1718_v29, %v1509_v10  ;;  %v3779_v28 = vadd.f32 %v1761_v25, %v1517_v11 }
 0xcac   :  { %v1772_v31 = vmul.f32 %v1764_v19, %v3757_v16  ;;  %v1774_v33 = vmul.f32 %v1766_v22, %v3759_v18  ;;  %v1768_v34 = vmul.f32 %v3769_v23, %v3769_v23  ;;  %v1770_v35 = vmul.f32 %v3771_v0, %v3771_v0 }
 0xcad   :  { %v1773_v36 = vmul.f32 %v1765_v32, %v3761_v57  ;;  %v1775_v37 = vmul.f32 %v1767_v26, %v3763_v17  ;;  %v1769_v38 = vmul.f32 %v3777_v27, %v3777_v27  ;;  %v1771_v39 = vmul.f32 %v3779_v28, %v3779_v28 }
 0xcae   :  { %v1780_v40 = vmul.f32 0.044715, %v1772_v31  ;;  %v1782_v41 = vmul.f32 0.044715, %v1774_v33  ;;  %v1776_v42 = vmul.f32 %v1768_v34, %v3769_v23  ;;  %v1778_v15 = vmul.f32 %v1770_v35, %v3771_v0 }
 0xcaf   :  { %v1781_v43 = vmul.f32 0.044715, %v1773_v36  ;;  %v1783_v46 = vmul.f32 0.044715, %v1775_v37  ;;  %v1777_v14 = vmul.f32 %v1769_v38, %v3777_v27  ;;  %v1779_v48 = vmul.f32 %v1771_v39, %v3779_v28 }
 0xcb0   :  { %v1788_v49 = vadd.f32 %v1780_v40, %v3757_v16  ;;  %v1790_v44 = vadd.f32 %v1782_v41, %v3759_v18  ;;  %v1784_v45 = vmul.f32 0.044715, %v1776_v42  ;;  %v1786_v50 = vmul.f32 0.044715, %v1778_v15 }
 0xcb1   :  { %v1789_v51 = vadd.f32 %v1781_v43, %v3761_v57  ;;  %v1791_v52 = vadd.f32 %v1783_v46, %v3763_v17  ;;  %v1785_v54 = vmul.f32 0.044715, %v1777_v14  ;;  %v1787_v56 = vmul.f32 0.044715, %v1779_v48 }
 0xcb2   :  { %v1796_v59 = vmul.f32 0.7978846, %v1788_v49  ;;  %v1798_v60 = vmul.f32 0.7978846, %v1790_v44  ;;  %v1792_v61 = vadd.f32 %v1784_v45, %v3769_v23  ;;  %v1794_v62 = vadd.f32 %v1786_v50, %v3771_v0  ;;  %v2762_v50 = vld [vmem:[%s3872_s16 + $0x38] sm:$0xff]  }
 0xcb3   :  { %v1797_v63 = vmul.f32 0.7978846, %v1789_v51  ;;  %v1799_v1 = vmul.f32 0.7978846, %v1791_v52  ;;  %v1793_v2 = vadd.f32 %v1785_v54, %v3777_v27  ;;  %v1795_v3 = vadd.f32 %v1787_v56, %v3779_v28  ;;  %v511_v51 = vld [vmem:[#allocation18] sm:$0x1] }
 0xcb4   :  { %2803 = vtanh.f32 %v1796_v59  ;;  %v1800_v4 = vmul.f32 0.7978846, %v1792_v61  ;;  %v1802_v5 = vmul.f32 0.7978846, %v1794_v62  ;;  %v1840_v52 = vunpack.c.l.bf16 %v511_v51 }
 0xcb5   :  { %2805 = vtanh.f32 %v1798_v60  ;;  %v1801_v6 = vmul.f32 0.7978846, %v1793_v2  ;;  %v1803_v7 = vmul.f32 0.7978846, %v1795_v3 }
 0xcb6   :  { %2807 = vtanh.f32 %v1797_v63  ;;  %v1844_v56 = vrot.slane %v1840_v52, %v3379_v21 }
 0xcb7   :  { %2809 = vtanh.f32 %v1799_v1 }
 0xcb8   :  { %2811 = vtanh.f32 %v1800_v4 }
 0xcb9   :  { %2813 = vtanh.f32 %v1802_v5 }
 0xcba   :  { %2815 = vtanh.f32 %v1801_v6 }
 0xcbb   :  { %2817 = vtanh.f32 %v1803_v7 }
 0xcbe   :  { %v2804_v8 = vpop.eup %2803 }
 0xcbf   :  { %v2806_v9 = vpop.eup %2805  ;;  %v1812_v10 = vadd.f32 1.0, %v2804_v8 }
 0xcc0   :  { %v2808_v11 = vpop.eup %2807  ;;  %v1814_v12 = vadd.f32 1.0, %v2806_v9 }
 0xcc1   :  { %v2810_v13 = vpop.eup %2809  ;;  %v1813_v58 = vadd.f32 1.0, %v2808_v11  ;;  %v1820_v19 = vmul.f32 0.5, %v1812_v10 }
 0xcc2   :  { %v2812_v47 = vpop.eup %2811  ;;  %v1815_v30 = vadd.f32 1.0, %v2810_v13  ;;  %v1822_v25 = vmul.f32 0.5, %v1814_v12  ;;  %v2138_v13 = vld [vmem:[%s3873_s17] sm:$0x1] }
 0xcc3   :  { %v2814_v55 = vpop.eup %2813  ;;  %v1816_v22 = vadd.f32 1.0, %v2812_v47  ;;  %v1821_v34 = vmul.f32 0.5, %v1813_v58  ;;  %v1828_v38 = vmul.f32 %v1820_v19, %v3757_v16  ;;  %v2755_v16 = vld [vmem:[%s3872_s16] sm:$0xff]   ;;  %v2139_v58 = vunpack.c.l.bf16 %v2138_v13 }
 0xcc4   :  { %v2816_v29 = vpop.eup %2815  ;;  %v1818_v32 = vadd.f32 1.0, %v2814_v55  ;;  %v1823_v37 = vmul.f32 0.5, %v1815_v30  ;;  %v1830_v41 = vmul.f32 %v1822_v25, %v3759_v18  ;;  %v2756_v18 = vld [vmem:[%s3872_s16 + $0x8] sm:$0xff]  }
 0xcc5   :  { %v2818_v26 = vpop.eup %2817  ;;  %v1824_v31 = vmul.f32 0.5, %v1816_v22  ;;  %v1817_v33 = vadd.f32 1.0, %v2816_v29  ;;  %v1829_v43 = vmul.f32 %v1821_v34, %v3761_v57  ;;  %v2757_v57 = vld [vmem:[%s3872_s16 + $0x10] sm:$0xff]   ;;  %v2143_v47 = vrot.slane %v2139_v58, %v3379_v21 }
 0xcc6   :  { %v1826_v35 = vmul.f32 0.5, %v1818_v32  ;;  %v1819_v36 = vadd.f32 1.0, %v2818_v26  ;;  %v1831_v48 = vmul.f32 %v1823_v37, %v3763_v17  ;;  %v2758_v17 = vld [vmem:[%s3872_s16 + $0x18] sm:$0xff]  }
 0xcc7   :  { %v1832_v39 = vmul.f32 %v1824_v31, %v3769_v23  ;;  %v1825_v40 = vmul.f32 0.5, %v1817_v33 }
 0xcc8   :  { %v1834_v42 = vmul.f32 %v1826_v35, %v3771_v0  ;;  %v1827_v15 = vmul.f32 0.5, %v1819_v36  ;;  %v2759_v0 = vld [vmem:[%s3872_s16 + $0x20] sm:$0xff]  }
 0xcc9   :  { %v1833_v46 = vmul.f32 %v1825_v40, %v3777_v27  ;;  %v1836_v14 = vpack.c.bf16 %v1832_v39, %v1828_v38  ;;  %v2760_v27 = vld [vmem:[%s3872_s16 + $0x28] sm:$0xff]  }
 0xcca   :  { %v1835_v49 = vmul.f32 %v1827_v15, %v3779_v28  ;;  %v1838_v44 = vpack.c.bf16 %v1834_v42, %v1830_v41  ;;  %v2761_v28 = vld [vmem:[%s3872_s16 + $0x30] sm:$0xff]  }
 0xccb   :  { %v1837_v45 = vpack.c.bf16 %v1833_v46, %v1829_v43 }
 0xccc   :  { %v1839_v23 = vpack.c.bf16 %v1835_v49, %v1831_v48 }
 0xccd   :  { %2069 = vmatprep.mubr.bf16.mxu1 %v1837_v45 }
 0xcce   :  { %2110 = vmatprep.mubr.bf16.mxu0 %v1839_v23  ;;  %2070 = vmatmul.mubr.bf16.vlgmr.msra.gmra.mrb[24].mxu1 %v1836_v14 }
 0xccf   :  { %2111 = vmatmul.mubr.bf16.vlgmr.msra.gmra.mrb[32].mxu0 %v1838_v44  ;;  %2565 = vmatpush3.bf16.msra.mxu1 %v2755_v16 }
 0xcd0   :  { %2566 = vmatprep.subr.bf16.mxu1 %v3089_v53  ;;  %2580 = vmatprep.mubr.msk.bf16.mxu1 %vm3090_vm2, %v3089_v53 }
 0xcd3   :  { %2567 = vmatpush3.bf16.msra.mxu1 %v2756_v18 }
 0xcd4   :  { %2568 = vmatprep.subr.bf16.mxu1 %v3089_v53 }
 0xcd7   :  { %2569 = vmatpush3.bf16.msra.mxu1 %v2757_v57 }
 0xcd8   :  { %2570 = vmatprep.subr.bf16.mxu1 %v3089_v53 }
 0xcdb   :  { %2571 = vmatpush3.bf16.msra.mxu1 %v2758_v17 }
 0xcdc   :  { %2572 = vmatprep.subr.bf16.mxu1 %v3089_v53 }
 0xcdf   :  { %2573 = vmatpush3.bf16.msra.mxu1 %v2759_v0 }
 0xce0   :  { %2574 = vmatprep.subr.bf16.mxu1 %v3089_v53 }
 0xce3   :  { %2575 = vmatpush3.bf16.msra.mxu1 %v2760_v27 }
 0xce4   :  { %2576 = vmatprep.subr.bf16.mxu1 %v3089_v53 }
 0xce7   :  { %2577 = vmatpush3.bf16.msra.mxu1 %v2761_v28 }
 0xce8   :  { %2578 = vmatprep.subr.bf16.mxu1 %v3089_v53 }
 0xceb   :  { %2579 = vmatpush3.bf16.msra.mxu1 %v2762_v50 }
 0xda1   :  { %v2439_v54 = vpop.f32.mrb[24].mxu1 }
 0xda2   :  { %v2461_v59 = vpop.f32.mrb[32].mxu0  ;;  %v2440_v60 = vpop.f32.mrb[25].mxu1 }
 0xda3   :  { %v2441_v61 = vadd.f32 %v2440_v60, %v2439_v54  ;;  %v2462_v62 = vpop.f32.mrb[33].mxu0  ;;  %v2442_v63 = vpop.f32.mrb[26].mxu1 }
 0xda4   :  { %v2463_v1 = vadd.f32 %v2462_v62, %v2461_v59  ;;  %v2464_v2 = vpop.f32.mrb[34].mxu0  ;;  %v2443_v3 = vpop.f32.mrb[27].mxu1 }
 0xda5   :  { %v2072_v4 = vadd.f32 %v2441_v61, %v1844_v56  ;;  %v2444_v53 = vadd.f32 %v2443_v3, %v2442_v63  ;;  %v2465_v5 = vpop.f32.mrb[35].mxu0 }
 0xda6   :  { %v2466_v6 = vadd.f32 %v2465_v5, %v2464_v2 }
 0xda7   :  { %v2113_v7 = vadd.f32 %v2463_v1, %v2072_v4  ;;  %v2075_v8 = vadd.f32 %v2444_v53, %v1844_v56 }
 0xda9   :  { %v2116_v9 = vadd.f32 %v2466_v6, %v2075_v8  ;;  %v2119_v10 = vadd.f32 %v2113_v7, %v3533_v20 }
 0xdab   :  { %v2120_v11 = vadd.f32 %v2116_v9, %v3536_v24 }
 0xdad   :  { %v2121_v12 = vpack.c.bf16 %v2120_v11, %v2119_v10 }
 0xdaf   :  { %2581 = vmatmul.mubr.bf16.vlgmr.msra.gmra.mrb[28].mxu1 %v2121_v12 }
 0xe82   :  { %v2226_v30 = vpop.f32.mrb[28].mxu1 }
 0xe83   :  { %v2582_v55 = vpop.f32.mrb[29].mxu1  ;;  %v2227_v22 = vadd.f32 %v2226_v30, %v2143_v47 }
 0xe84   :  { %v2229_v19 = vpop.f32.mrb[30].mxu1 }
 0xe85   :  { %v2230_v29 = vadd.f32 %v2229_v19, %v2143_v47  ;;  %v2583_v25 = vpop.f32.mrb[31].mxu1 }
 0xe87   :  { %v2387_v32 = vpack.c.bf16 %v2230_v29, %v2227_v22 }
 0xe89   :  { %2388 = vst [vmem:[%s3874_s18] sm:$0xff] %v2387_v32  }
 0xe8a   :  { %2247 = vsyncpa [#allocation3], 1 }
 0xe8b   :  { %2248 = vsyncpa [#allocation5], 1 }
 0xe8c   :  { %2249 = vsyncpa [#allocation8], 1 }
 0xe8d   :  { %2250 = vsyncpa [#allocation11], 1 }
 0xe8e   :  { %2251 = vsyncpa [#allocation14], 1 }
 0xe8f   :  { %2252 = vsyncpa [#allocation17], 1 }

// kernel: visualglm_forward.3
= control target key start
LH: loop header
LB: loop body
LE: loop exit
PB: predicated region body
PF: predicated region fallthrough
CT: control target
= control target key end

     0   :  { %s4101_s0 = inlined_call_operand.vmem [shape: bf16[32,128], index: 0, kind: input, shape index: {}]   ;;  %s4102_s1 = inlined_call_operand.vmem [shape: bf16[1,128], index: 1, kind: input, shape index: {}]   ;;  %s4103_s2 = inlined_call_operand.vmem [shape: bf16[1,128], index: 2, kind: input, shape index: {}]   ;;  %s4104_s3 = inlined_call_operand.vmem [shape: bf16[128,384], index: 3, kind: input, shape index: {}]   ;;  %s4105_s4 = inlined_call_operand.vmem [shape: bf16[1,384], index: 4, kind: input, shape index: {}]   ;;  %s4106_s5 = inlined_call_operand.vmem [shape: bf16[128,128], index: 5, kind: input, shape index: {}]   ;;  %s4107_s6 = inlined_call_operand.vmem [shape: bf16[1,128], index: 6, kind: input, shape index: {}]   ;;  %s4108_s7 = inlined_call_operand.vmem [shape: bf16[1,128], index: 7, kind: input, shape index: {}]   ;;  %s4109_s8 = inlined_call_operand.vmem [shape: bf16[1,128], index: 8, kind: input, shape index: {}]   ;;  %s4110_s9 = inlined_call_operand.vmem [shape: bf16[128,512], index: 9, kind: input, shape index: {}]   ;;  %s4111_s10 = inlined_call_operand.vmem [shape: bf16[1,512], index: 10, kind: input, shape index: {}]   ;;  %s4112_s11 = inlined_call_operand.vmem [shape: bf16[512,128], index: 11, kind: input, shape index: {}]   ;;  %s4113_s12 = inlined_call_operand.vmem [shape: bf16[1,128], index: 12, kind: input, shape index: {}]   ;;  %s4114_s13 = inlined_call_operand.vmem [shape: bf16[1,128], index: 13, kind: input, shape index: {}]   ;;  %s4115_s14 = inlined_call_operand.vmem [shape: bf16[1,128], index: 14, kind: input, shape index: {}]   ;;  %s4116_s15 = inlined_call_operand.vmem [shape: bf16[128,128], index: 15, kind: input, shape index: {}]   ;;  %s4117_s16 = inlined_call_operand.vmem [shape: bf16[1,128], index: 16, kind: input, shape index: {}]   ;;  %s4118_s17 = inlined_call_operand.hbm [shape: f32[2,128], index: 17, kind: output, shape index: {0}]   ;;  %s4119_s18 = inlined_call_operand.vmem [shape: s32[2,1], index: 18, kind: output, shape index: {1}]  }
   0x1   :  { %4121 = sst [smem:[#allocation5_spill]] %s4101_s0 }
   0x2   :  { %4122 = sst [smem:[#allocation6_spill]] %s4102_s1 }
   0x3   :  { %4123 = sst [smem:[#allocation7_spill]] %s4103_s2 }
   0x4   :  { %s4124_s29 = sld [smem:[#allocation5_spill]]  ;;  %v2904_v6 = vld [vmem:[%s4104_s3 + $0x4] ss:$12 sps:$4 sm:$0xff]   ;;  %v2906_v7 = vld [vmem:[%s4104_s3] ss:$12 sps:$4 sm:$0xff]  }
   0x5   :  { %v2907_v8 = vld [vmem:[%s4104_s3 + $0x1c] ss:$12 sps:$4 sm:$0xff]   ;;  %442 = vmatprep.subr.bf16.mxu0 %v2904_v6 }
   0x6   :  { %v2909_v9 = vld [vmem:[%s4104_s3 + $0x8] ss:$12 sps:$4 sm:$0xff]   ;;  %443 = vmatpush1.bf16.msra.mxu0 %v2906_v7 }
   0x7   :  { %2732 = vmatprep.subr.bf16.mxu1 %v2909_v9  ;;  %444 = vmatprep.subr.bf16.mxu0 %v2907_v8 }
   0x8   :  { %2733 = vmatpush3.bf16.msra.mxu1 %v2909_v9 }
   0xa   :  { %v2607_v0 = vld [vmem:[%s4124_s29] sm:$0xff]   ;;  %v2614_v1 = vld [vmem:[%s4124_s29 + $0x8] sm:$0xff]  }
   0xb   :  { %v3279_v2 = vunpack.c.l.bf16 %v2607_v0  ;;  %v3281_v3 = vunpack.c.l.bf16 %v2614_v1  ;;  %v3285_v4 = vunpack.c.h.bf16 %v2607_v0  ;;  %v3287_v5 = vunpack.c.h.bf16 %v2614_v1 }
   0xd   :  { %220 = vadd.xlane.f32.xlu0 %v3279_v2  ;;  %224 = vadd.xlane.f32.xlu1 %v3281_v3 }
  0x11   :  { %222 = vadd.xlane.f32.xlu0 %v3285_v4  ;;  %226 = vadd.xlane.f32.xlu1 %v3287_v5 }
  0x12   :  { %24 = vsyncpa [#allocation3], 0  ;;  %v2910_v26 = vld [vmem:[%s4104_s3 + $0x18] ss:$12 sps:$4 sm:$0xff]   ;;  %v2911_v27 = vld [vmem:[%s4104_s3 + $0x34] ss:$12 sps:$4 sm:$0xff]   ;;  %v266_v52 = vlaneseq }
  0x13   :  { %445 = vmatpush1.bf16.msra.mxu0 %v2910_v26  ;;  %v2913_v28 = vld [vmem:[%s4104_s3 + $0x20] ss:$12 sps:$4 sm:$0xff]   ;;  %v2914_v29 = vld [vmem:[%s4104_s3 + $0x30] ss:$12 sps:$4 sm:$0xff]   ;;  %v2917_v31 = vld [vmem:[%s4104_s3 + $0x38] ss:$12 sps:$4 sm:$0xff]  }
  0x14   :  { %446 = vmatprep.subr.bf16.mxu0 %v2911_v27  ;;  %2734 = vmatprep.subr.bf16.mxu1 %v2913_v28  ;;  %v2915_v30 = vld [vmem:[%s4104_s3 + $0x4c] ss:$12 sps:$4 sm:$0xff]   ;;  %v2918_v32 = vld [vmem:[%s4104_s3 + $0x48] ss:$12 sps:$4 sm:$0xff]   ;;  %v2919_v33 = vld [vmem:[%s4104_s3 + $0x64] ss:$12 sps:$4 sm:$0xff]  }
  0x15   :  { %2735 = vmatpush3.bf16.msra.mxu1 %v2913_v28  ;;  %v2921_v34 = vld [vmem:[%s4104_s3 + $0x50] ss:$12 sps:$4 sm:$0xff]   ;;  %v2922_v35 = vld [vmem:[%s4104_s3 + $0x60] ss:$12 sps:$4 sm:$0xff]   ;;  %v2925_v37 = vld [vmem:[%s4104_s3 + $0x68] ss:$12 sps:$4 sm:$0xff]  }
  0x16   :  { %2736 = vmatprep.subr.bf16.mxu1 %v2917_v31  ;;  %v2923_v36 = vld [vmem:[%s4104_s3 + $0x7c] ss:$12 sps:$4 sm:$0xff]   ;;  %v2926_v38 = vld [vmem:[%s4104_s3 + $0x78] ss:$12 sps:$4 sm:$0xff]   ;;  %v2927_v39 = vld [vmem:[%s4104_s3 + $0x94] ss:$12 sps:$4 sm:$0xff]  }
  0x17   :  { %447 = vmatpush1.bf16.msra.mxu0 %v2914_v29  ;;  %v2929_v40 = vld [vmem:[%s4104_s3 + $0x80] ss:$12 sps:$4 sm:$0xff]   ;;  %v3170_v41 = vmov 0   ;;  %v2930_v42 = vld [vmem:[%s4104_s3 + $0x90] ss:$12 sps:$4 sm:$0xff]   ;;  %v3385_v58 = vshrl.u32 %v266_v52, 7 }
  0x18   :  { %448 = vmatprep.subr.bf16.mxu0 %v2915_v30  ;;  %474 = vmatprep.mubr.bf16.mxu0 %v3170_v41  ;;  %v2931_v43 = vld [vmem:[%s4104_s3 + $0xac] ss:$12 sps:$4 sm:$0xff]   ;;  %v2934_v45 = vld [vmem:[%s4104_s3 + $0xa8] ss:$12 sps:$4 sm:$0xff]   ;;  %v2935_v46 = vld [vmem:[%s4104_s3 + $0xb0] ss:$12 sps:$4 sm:$0xff]  }
  0x19   :  { %2737 = vmatpush3.bf16.msra.mxu1 %v2917_v31  ;;  %v2933_v44 = vld [vmem:[%s4104_s3 + $0x98] ss:$12 sps:$4 sm:$0xff]   ;;  %s4125_s22 = sld [smem:[#allocation6_spill]]  ;;  %v3391_v63 = vsub.s32 0, %v3385_v58  ;;  %s4126_s24 = sld [smem:[#allocation7_spill]]  ;;  %v293_v29 = vsub.s32 2, %v3385_v58 }
  0x1a   :  { %2738 = vmatprep.subr.bf16.mxu1 %v2921_v34  ;;  %v297_v30 = vsub.s32 4, %v3385_v58  ;;  %vm593_vm0 = vcmask 261120   ;;  %s3173_s27 = smov 64   ;;  %s3174_s28 = smov 32   ;;  %vm1374_vm13 = vcmask 523264   ;;  %vm1379_vm14 = vcmask 785408  }
  0x1b   :  { %449 = vmatpush1.bf16.msra.mxu0 %v2918_v32  ;;  %vm2315_vm15 = vcmask 1040384  }
  0x1c   :  { %450 = vmatprep.subr.bf16.mxu0 %v2919_v33 }
  0x1d   :  { %2739 = vmatpush3.bf16.msra.mxu1 %v2921_v34 }
  0x1e   :  { %2740 = vmatprep.subr.bf16.mxu1 %v2925_v37 }
  0x1f   :  { %451 = vmatpush1.bf16.msra.mxu0 %v2922_v35  ;;  %v68_v60 = vld [vmem:[%s4125_s22] sm:$0x1] }
  0x20   :  { %452 = vmatprep.subr.bf16.mxu0 %v2923_v36  ;;  %v265_v62 = vunpack.c.l.bf16 %v68_v60  ;;  %v69_v0 = vld [vmem:[%s4126_s24] sm:$0x1] }
  0x21   :  { %2741 = vmatpush3.bf16.msra.mxu1 %v2925_v37  ;;  %v274_v8 = vunpack.c.l.bf16 %v69_v0 }
  0x22   :  { %2742 = vmatprep.subr.bf16.mxu1 %v2929_v40  ;;  %v269_v7 = vrot.slane %v265_v62, %v3391_v63 }
  0x23   :  { %453 = vmatpush1.bf16.msra.mxu0 %v2926_v38 }
  0x24   :  { %454 = vmatprep.subr.bf16.mxu0 %v2927_v39 }
  0x25   :  { %2743 = vmatpush3.bf16.msra.mxu1 %v2929_v40 }
  0x26   :  { %2744 = vmatprep.subr.bf16.mxu1 %v2933_v44 }
  0x27   :  { %455 = vmatpush1.bf16.msra.mxu0 %v2930_v42 }
  0x28   :  { %456 = vmatprep.subr.bf16.mxu0 %v2931_v43 }
  0x29   :  { %2745 = vmatpush3.bf16.msra.mxu1 %v2933_v44 }
  0x2a   :  { %2746 = vmatprep.subr.bf16.mxu1 %v2935_v46 }
  0x2b   :  { %457 = vmatpush1.bf16.msra.mxu0 %v2934_v45 }
  0x2d   :  { %2747 = vmatpush3.bf16.msra.mxu1 %v2935_v46 }
  0x9a   :  { %v221_v10 = vpop.xlane.xlu0 %220  ;;  %v225_v11 = vpop.xlane.xlu1 %224 }
  0x9b   :  { %v229_v12 = vmul.f32 0.0078125, %v221_v10  ;;  %v231_v13 = vmul.f32 0.0078125, %v225_v11 }
  0x9d   :  { %v3304_v14 = vsub.f32 %v3279_v2, %v229_v12  ;;  %v3307_v15 = vsub.f32 %v3281_v3, %v231_v13  ;;  %v278_v13 = vrot.slane %v274_v8, %v3391_v63 }
  0x9e   :  { %v223_v16 = vpop.xlane.xlu0 %222  ;;  %v227_v17 = vpop.xlane.xlu1 %226 }
  0x9f   :  { %v230_v18 = vmul.f32 0.0078125, %v223_v16  ;;  %v237_v19 = vmul.f32 %v3304_v14, %v3304_v14  ;;  %v232_v20 = vmul.f32 0.0078125, %v227_v17  ;;  %v239_v23 = vmul.f32 %v3307_v15, %v3307_v15 }
  0xa1   :  { %v3312_v21 = vsub.f32 %v3285_v4, %v230_v18  ;;  %241 = vadd.xlane.f32.xlu0 %v237_v19  ;;  %v3315_v22 = vsub.f32 %v3287_v5, %v232_v20 }
  0xa3   :  { %v238_v24 = vmul.f32 %v3312_v21, %v3312_v21  ;;  %v240_v25 = vmul.f32 %v3315_v22, %v3315_v22 }
  0xa5   :  { %245 = vadd.xlane.f32.xlu0 %v239_v23  ;;  %243 = vadd.xlane.f32.xlu1 %v238_v24 }
  0xa9   :  { %247 = vadd.xlane.f32.xlu1 %v240_v25 }
 0x12e   :  { %v242_v47 = vpop.xlane.xlu0 %241 }
 0x12f   :  { %v249_v48 = vmul.f32 0.0078125, %v242_v47 }
 0x131   :  { %v253_v49 = vadd.f32 1e-05, %v249_v48 }
 0x132   :  { %v244_v50 = vpop.xlane.xlu1 %243  ;;  %v246_v51 = vpop.xlane.xlu0 %245 }
 0x133   :  { %3032 = vrsqrt.f32 %v253_v49  ;;  %v250_v53 = vmul.f32 0.0078125, %v244_v50  ;;  %v251_v54 = vmul.f32 0.0078125, %v246_v51 }
 0x135   :  { %v254_v55 = vadd.f32 1e-05, %v250_v53  ;;  %v255_v56 = vadd.f32 1e-05, %v251_v54 }
 0x136   :  { %v248_v57 = vpop.xlane.xlu1 %247 }
 0x137   :  { %3034 = vrsqrt.f32 %v254_v55  ;;  %v252_v59 = vmul.f32 0.0078125, %v248_v57 }
 0x138   :  { %3036 = vrsqrt.f32 %v255_v56 }
 0x139   :  { %v256_v61 = vadd.f32 1e-05, %v252_v59 }
 0x13b   :  { %3038 = vrsqrt.f32 %v256_v61 }
 0x13d   :  { %v3033_v1 = vpop.eup %3032 }
 0x13e   :  { %v261_v6 = vmul.f32 %v3033_v1, %v3304_v14 }
 0x140   :  { %v270_v12 = vmul.f32 %v269_v7, %v261_v6 }
 0x141   :  { %v3035_v9 = vpop.eup %3034 }
 0x142   :  { %v3037_v10 = vpop.eup %3036  ;;  %v262_v11 = vmul.f32 %v3035_v9, %v3312_v21  ;;  %v279_v19 = vadd.f32 %v278_v13, %v270_v12  ;;  %v3445_v12 = vand.u32 127, %v266_v52 }
 0x143   :  { %v263_v16 = vmul.f32 %v3037_v10, %v3307_v15  ;;  %v102_v15 = vld [vmem:[%s4105_s4] sm:$0x7]  ;;  %s3172_s4 = smov 96  }
 0x144   :  { %v271_v17 = vmul.f32 %v269_v7, %v262_v11  ;;  %v285_v28 = vunpack.c.l.bf16 %v102_v15  ;;  %vm581_vm2 = vcmp.ge.s32.totalorder %v3385_v58, %v3445_v12 }
 0x145   :  { %v3039_v18 = vpop.eup %3038  ;;  %v272_v24 = vmul.f32 %v269_v7, %v263_v16  ;;  %v552_v16 = vadd.s32 8, %v3385_v58 }
 0x146   :  { %v280_v20 = vadd.f32 %v278_v13, %v271_v17  ;;  %v264_v23 = vmul.f32 %v3039_v18, %v3315_v22  ;;  %v290_v22 = vrot.slane %v285_v28, %v3391_v63  ;;  %v294_v31 = vrot.slane %v285_v28, %v293_v29 }
 0x147   :  { %v281_v26 = vadd.f32 %v278_v13, %v272_v24  ;;  %v298_v33 = vrot.slane %v285_v28, %v297_v30  ;;  %v557_v17 = vcvt.s32.f32 %v3385_v58  ;;  %v573_v18 = vcvt.s32.f32 %v3445_v12 }
 0x148   :  { %v283_v14 = vpack.c.bf16 %v280_v20, %v279_v19  ;;  %v273_v25 = vmul.f32 %v269_v7, %v264_v23  ;;  %v305_v32 = vrot.slane %v290_v22, %v3391_v63  ;;  %v309_v35 = vrot.slane %v294_v31, %v3391_v63 }
 0x149   :  { %v313_v42 = vrot.slane %v298_v33, %v3391_v63  ;;  %v554_v19 = vadd.s32 24, %v3385_v58  ;;  %v558_v23 = vcvt.s32.f32 %v552_v16  ;;  %v561_v24 = vadd.f32 0.5, %v557_v17 }
 0x14a   :  { %475 = vmatmul.mubr.bf16.vlgmr.msra.gmra.mrb[0].mxu0 %v283_v14  ;;  %2748 = vmatprep.mubr.bf16.mxu1 %v283_v14  ;;  %v282_v27 = vadd.f32 %v278_v13, %v273_v25  ;;  %v553_v13 = vadd.s32 16, %v3385_v58  ;;  %v574_v14 = vadd.f32 0.5, %v573_v18  ;;  %vm582_vm6 = vcmp.ge.s32.totalorder %v552_v16, %v3445_v12 }
 0x14b   :  { %484 = vmatprep.mubr.bf16.mxu0 %v3170_v41  ;;  %v560_v25 = vcvt.s32.f32 %v554_v19  ;;  %v562_v52 = vadd.f32 0.5, %v558_v23  ;;  %vm584_vm10 = vcmp.ge.s32.totalorder %v554_v19, %v3445_v12 }
 0x14c   :  { %v284_v21 = vpack.c.bf16 %v282_v27, %v281_v26  ;;  %v559_v20 = vcvt.s32.f32 %v553_v13  ;;  %v565_v27 = vmul.f32 0.083333336, %v561_v24  ;;  %vm583_vm4 = vcmp.ge.s32.totalorder %v553_v13, %v3445_v12 }
 0x14d   :  { %v564_v15 = vadd.f32 0.5, %v560_v25  ;;  %v566_v22 = vmul.f32 0.083333336, %v562_v52 }
 0x14e   :  { %2749 = vmatmul.mubr.bf16.vlgmr.msra.gmra.mrb[0].mxu1 %v284_v21  ;;  %v563_v26 = vadd.f32 0.5, %v559_v20  ;;  %v569_v31 = vfloor.f32 %v565_v27 }
 0x14f   :  { %v568_v33 = vmul.f32 0.083333336, %v564_v15 }
 0x150   :  { %v567_v28 = vmul.f32 0.083333336, %v563_v26 }
 0x152   :  { %485 = vmatmul.mubr.bf16.gmra.mrb[4].mxu0 %v284_v21  ;;  %v575_v21 = vmul.f32 0.083333336, %v574_v14 }
 0x21d   :  { %v476_v34 = vpop.f32.mrb[0].mxu0 }
 0x21e   :  { %v478_v36 = vpop.f32.mrb[1].mxu0  ;;  %v477_v38 = vadd.f32 %v476_v34, %v305_v32  ;;  %v571_v34 = vfloor.f32 %v567_v28 }
 0x21f   :  { %v480_v37 = vpop.f32.mrb[2].mxu0  ;;  %v479_v43 = vadd.f32 %v478_v36, %v309_v35  ;;  %v572_v36 = vfloor.f32 %v568_v33 }
 0x220   :  { %v481_v39 = vadd.f32 %v480_v37, %v305_v32  ;;  %v482_v40 = vpop.f32.mrb[3].mxu0 }
 0x221   :  { %v483_v44 = vadd.f32 %v482_v40, %v309_v35  ;;  %v2750_v45 = vpop.f32.mrb[0].mxu1 }
 0x222   :  { %v3416_v46 = vpack.c.bf16 %v481_v39, %v477_v38  ;;  %v529_v47 = vpop.f32.mrb[1].mxu1  ;;  %v538_v50 = vadd.f32 %v2750_v45, %v313_v42  ;;  %v3171_v39 = vmov -1e+30  }
 0x223   :  { %v3418_v48 = vpack.c.bf16 %v483_v44, %v479_v43  ;;  %v2751_v49 = vpop.f32.mrb[2].mxu1  ;;  %v530_v54 = vadd.f32 %v529_v47, %v313_v42 }
 0x224   :  { %v541_v51 = vadd.f32 %v2751_v49, %v313_v42  ;;  %v532_v53 = vpop.f32.mrb[3].mxu1  ;;  %2756 = vmatprep.mubr.msk.bf16.mxu0 %vm593_vm0, %v3416_v46 }
 0x225   :  { %v533_v55 = vadd.f32 %v532_v53, %v313_v42  ;;  %v486_v56 = vpop.f32.mrb[4].mxu0  ;;  %2856 = vmatprep.subr.msk.bf16.mxu0 %vm593_vm0, %v3418_v48  ;;  %v601_v57 = vsel %vm593_vm0, %v3418_v48, 0 }
 0x226   :  { %v3426_v59 = vpack.c.bf16 %v541_v51, %v538_v50  ;;  %v488_v60 = vpop.f32.mrb[5].mxu0  ;;  %2753 = vmatpush3.bf16.xpose.msra.mxu0 %v601_v57  ;;  %v487_v0 = vadd.f32 %v486_v56, %v305_v32 }
 0x227   :  { %v3428_v61 = vpack.c.bf16 %v533_v55, %v530_v54  ;;  %v490_v62 = vpop.f32.mrb[6].mxu0  ;;  %v489_v7 = vadd.f32 %v488_v60, %v309_v35 }
 0x228   :  { %v491_v1 = vadd.f32 %v490_v62, %v305_v32  ;;  %v492_v6 = vpop.f32.mrb[7].mxu0  ;;  %v576_v32 = vfloor.f32 %v575_v21 }
 0x229   :  { %v493_v8 = vadd.f32 %v492_v6, %v309_v35  ;;  %2760 = vmatprep.subr.bf16.mxu1 %v3428_v61  ;;  %v570_v35 = vfloor.f32 %v566_v22 }
 0x22a   :  { %v3431_v9 = vpack.c.bf16 %v491_v1, %v487_v0  ;;  %2761 = vmatpush3.bf16.msra.mxu1 %v3428_v61  ;;  %vm577_vm1 = vcmp.eq.f32.partialorder %v569_v31, %v576_v32  ;;  %vm579_vm3 = vcmp.eq.f32.partialorder %v571_v34, %v576_v32  ;;  %vm580_vm9 = vcmp.eq.f32.partialorder %v572_v36, %v576_v32 }
 0x22b   :  { %v3434_v10 = vpack.c.bf16 %v493_v8, %v489_v7  ;;  %2762 = vmatprep.subr.bf16.mxu1 %v3426_v59  ;;  %vm578_vm5 = vcmp.eq.f32.partialorder %v570_v35, %v576_v32  ;;  %vm585_vm7 = vmand %vm577_vm1, %vm581_vm2  ;;  %vm3176_vm1 = vmmov 0  }
 0x22c   :  { %vm587_vm8 = vmand %vm579_vm3, %vm583_vm4  ;;  %v3459_v40 = vsel %vm585_vm7, 0.0, %v3171_v39 }
 0x22d   :  { %2857 = vmatprep.subr.msk.bf16.mxu0 %vm593_vm0, %v3434_v10  ;;  %v604_v11 = vsel %vm593_vm0, %v3434_v10, 0  ;;  %vm586_vm11 = vmand %vm578_vm5, %vm582_vm6  ;;  %v3463_v49 = vsel %vm587_vm8, 0.0, %v3171_v39 }
 0x22e   :  { %2755 = vmatpush3.bf16.xpose.msra.mxu0 %v604_v11  ;;  %2763 = vmatpush3.bf16.msra.mxu1 %v3426_v59  ;;  %vm588_vm12 = vmand %vm580_vm9, %vm584_vm10  ;;  %v3461_v47 = vsel %vm586_vm11, 0.0, %v3171_v39 }
 0x22f   :  { %v3466_v54 = vsel %vm588_vm12, 0.0, %v3171_v39 }
 0x235   :  { %2757 = vmatmul.mubr.msk.bf16.vlgmr.msra.gmra.mrb[8].mxu0 %vm593_vm0, %v3431_v9 }
 0x308   :  { %v2758_v37 = vpop.f32.mrb[8].mxu0 }
 0x309   :  { %v640_v38 = vpop.f32.mrb[9].mxu0  ;;  %v657_v42 = vmul.f32 0.17677669, %v2758_v37 }
 0x30a   :  { %v655_v43 = vmul.f32 0.17677669, %v640_v38  ;;  %v2759_v44 = vpop.f32.mrb[10].mxu0 }
 0x30b   :  { %v643_v45 = vpop.f32.mrb[11].mxu0  ;;  %v658_v50 = vmul.f32 0.17677669, %v2759_v44  ;;  %v661_v57 = vadd.f32 %v657_v42, %v3463_v49 }
 0x30c   :  { %v656_v51 = vmul.f32 0.17677669, %v643_v45  ;;  %v659_v53 = vadd.f32 %v655_v43, %v3459_v40 }
 0x30d   :  { %v662_v62 = vadd.f32 %v658_v50, %v3466_v54  ;;  %v669_v0 = vsel %vm593_vm0, %v661_v57, -inf }
 0x30e   :  { %v663_v55 = vsel %vm593_vm0, %v659_v53, -inf  ;;  %v660_v56 = vadd.f32 %v656_v51, %v3461_v47 }
 0x30f   :  { %664 = vmax.xlane.f32.xlu0 %v663_v55  ;;  %v672_v1 = vsel %vm593_vm0, %v662_v62, -inf }
 0x310   :  { %v666_v60 = vsel %vm593_vm0, %v660_v56, -inf }
 0x311   :  { %667 = vmax.xlane.f32.xlu1 %v666_v60 }
 0x313   :  { %670 = vmax.xlane.f32.xlu0 %v669_v0 }
 0x315   :  { %673 = vmax.xlane.f32.xlu1 %v672_v1 }
 0x39c   :  { %v665_v6 = vpop.xlane.xlu0 %664 }
 0x39d   :  { %v675_v7 = vsub.f32 %v659_v53, %v665_v6 }
 0x39e   :  { %v668_v8 = vpop.xlane.xlu1 %667 }
 0x39f   :  { %v676_v11 = vsub.f32 %v660_v56, %v668_v8  ;;  %v679_v19 = vmul.f32 1.442695, %v675_v7 }
 0x3a0   :  { %v671_v13 = vpop.xlane.xlu0 %670 }
 0x3a1   :  { %v681_v16 = vmul.f32 1.442695, %v676_v11  ;;  %v677_v17 = vsub.f32 %v661_v57, %v671_v13 }
 0x3a2   :  { %v674_v20 = vpop.xlane.xlu1 %673 }
 0x3a3   :  { %3040 = vpow2.f32 %v681_v16  ;;  %v683_v23 = vmul.f32 1.442695, %v677_v17  ;;  %v678_v24 = vsub.f32 %v662_v62, %v674_v20 }
 0x3a5   :  { %3042 = vpow2.f32 %v683_v23  ;;  %v685_v14 = vmul.f32 1.442695, %v678_v24 }
 0x3a6   :  { %3044 = vpow2.f32 %v679_v19 }
 0x3a7   :  { %3046 = vpow2.f32 %v685_v14 }
 0x3ad   :  { %v3041_v25 = vpop.eup %3040 }
 0x3ae   :  { %v690_v26 = vsel %vm593_vm0, %v3041_v25, 0.0 }
 0x3af   :  { %v3043_v52 = vpop.eup %3042  ;;  %691 = vadd.xlane.f32.xlu1 %v690_v26 }
 0x3b0   :  { %v3045_v27 = vpop.eup %3044  ;;  %v693_v21 = vsel %vm593_vm0, %v3043_v52, 0.0 }
 0x3b1   :  { %v3047_v15 = vpop.eup %3046  ;;  %694 = vadd.xlane.f32.xlu0 %v693_v21  ;;  %v687_v22 = vsel %vm593_vm0, %v3045_v27, 0.0 }
 0x3b2   :  { %v696_v28 = vsel %vm593_vm0, %v3047_v15, 0.0 }
 0x3b3   :  { %697 = vadd.xlane.f32.xlu1 %v696_v28 }
 0x3b5   :  { %688 = vadd.xlane.f32.xlu0 %v687_v22 }
 0x3c4   :  { %774 = vrot.lane.b32.xlu1 %v3434_v10, %s3172_s4 }
 0x3c8   :  { %766 = vrot.lane.b32.xlu1 %v3416_v46, %s3172_s4 }
 0x3cb   :  { %772 = vrot.lane.b32.xlu0 %v3418_v48, %s3172_s4 }
 0x3cc   :  { %768 = vrot.lane.b32.xlu1 %v3431_v9, %s3172_s4 }
 0x43c   :  { %v692_v31 = vpop.xlane.xlu1 %691 }
 0x43d   :  { %3048 = vrcp.f32 %v692_v31 }
 0x43e   :  { %v695_v32 = vpop.xlane.xlu0 %694 }
 0x440   :  { %v698_v33 = vpop.xlane.xlu1 %697 }
 0x441   :  { %3050 = vrcp.f32 %v698_v33 }
 0x442   :  { %3052 = vrcp.f32 %v695_v32  ;;  %v689_v34 = vpop.xlane.xlu0 %688 }
 0x443   :  { %3054 = vrcp.f32 %v689_v34 }
 0x444   :  { %v775_v43 = vpop.permute.xlu1 %774 }
 0x445   :  { %v786_v57 = vsel %vm593_vm0, %v775_v43, 0 }
 0x446   :  { %v773_v35 = vpop.permute.xlu0 %772 }
 0x447   :  { %2858 = vmatprep.subr.msk.bf16.mxu1 %vm593_vm0, %v773_v35  ;;  %v3049_v36 = vpop.eup %3048  ;;  %v783_v55 = vsel %vm593_vm0, %v773_v35, 0 }
 0x448   :  { %v704_v45 = vmul.f32 %v3049_v36, %v3041_v25  ;;  %v767_v56 = vpop.permute.xlu1 %766 }
 0x44b   :  { %v3051_v37 = vpop.eup %3050 }
 0x44c   :  { %v3053_v38 = vpop.eup %3052  ;;  %v706_v42 = vmul.f32 %v3051_v37, %v3047_v15  ;;  %v769_v60 = vpop.permute.xlu1 %768 }
 0x44d   :  { %v3055_v39 = vpop.eup %3054  ;;  %v705_v50 = vmul.f32 %v3053_v38, %v3043_v52 }
 0x44e   :  { %v703_v44 = vmul.f32 %v3055_v39, %v3045_v27 }
 0x44f   :  { %v708_v53 = vpack.c.bf16 %v706_v42, %v705_v50 }
 0x450   :  { %v707_v51 = vpack.c.bf16 %v704_v45, %v703_v44 }
 0x452   :  { %2764 = vmatprep.mubr.msk.bf16.mxu1 %vm593_vm0, %v707_v51 }
 0x453   :  { %2765 = vmatmul.mubr.msk.bf16.vlgmr.msra.gmra.mrb[4].mxu1 %vm593_vm0, %v708_v53 }
 0x454   :  { %2769 = vmatpush3.bf16.xpose.msra.mxu1 %v783_v55  ;;  %2772 = vmatprep.mubr.msk.bf16.mxu1 %vm593_vm0, %v767_v56 }
 0x455   :  { %2859 = vmatprep.subr.msk.bf16.mxu1 %vm593_vm0, %v775_v43 }
 0x45c   :  { %2771 = vmatpush3.bf16.xpose.msra.mxu1 %v786_v57 }
 0x463   :  { %2773 = vmatmul.mubr.msk.bf16.vlgmr.msra.gmra.mrb[8].mxu1 %vm593_vm0, %v769_v60 }
 0x526   :  { %v3495_v62 = vpop.f32.mrb[4].mxu1 }
 0x527   :  { %v3497_v0 = vpop.f32.mrb[5].mxu1 }
 0x528   :  { %v3499_v1 = vpop.f32.mrb[6].mxu1 }
 0x529   :  { %v3501_v6 = vpop.f32.mrb[7].mxu1 }
 0x536   :  { %v2774_v7 = vpop.f32.mrb[8].mxu1 }
 0x537   :  { %v822_v8 = vpop.f32.mrb[9].mxu1  ;;  %v839_v11 = vmul.f32 0.17677669, %v2774_v7 }
 0x538   :  { %v837_v13 = vmul.f32 0.17677669, %v822_v8  ;;  %v2775_v16 = vpop.f32.mrb[10].mxu1 }
 0x539   :  { %v825_v17 = vpop.f32.mrb[11].mxu1  ;;  %v840_v23 = vmul.f32 0.17677669, %v2775_v16  ;;  %v843_v25 = vadd.f32 %v839_v11, %v3463_v49 }
 0x53a   :  { %v838_v19 = vmul.f32 0.17677669, %v825_v17  ;;  %v841_v20 = vadd.f32 %v837_v13, %v3459_v40 }
 0x53b   :  { %v851_v52 = vsel %vm593_vm0, %v843_v25, -inf  ;;  %v844_v27 = vadd.f32 %v840_v23, %v3466_v54 }
 0x53c   :  { %v845_v24 = vsel %vm593_vm0, %v841_v20, -inf  ;;  %v842_v14 = vadd.f32 %v838_v19, %v3461_v47 }
 0x53d   :  { %846 = vmax.xlane.f32.xlu0 %v845_v24  ;;  %v854_v21 = vsel %vm593_vm0, %v844_v27, -inf }
 0x53e   :  { %v848_v26 = vsel %vm593_vm0, %v842_v14, -inf }
 0x53f   :  { %849 = vmax.xlane.f32.xlu1 %v848_v26 }
 0x541   :  { %852 = vmax.xlane.f32.xlu0 %v851_v52 }
 0x545   :  { %855 = vmax.xlane.f32.xlu0 %v854_v21 }
 0x550   :  { %895 = vrot.lane.b32.xlu1 %v3426_v59, %s3172_s4 }
 0x5ca   :  { %v847_v15 = vpop.xlane.xlu0 %846 }
 0x5cb   :  { %v857_v28 = vsub.f32 %v841_v20, %v847_v15 }
 0x5cc   :  { %v850_v22 = vpop.xlane.xlu1 %849 }
 0x5cd   :  { %v861_v33 = vmul.f32 1.442695, %v857_v28  ;;  %v858_v34 = vsub.f32 %v842_v14, %v850_v22 }
 0x5ce   :  { %v853_v31 = vpop.xlane.xlu0 %852 }
 0x5cf   :  { %v859_v32 = vsub.f32 %v843_v25, %v853_v31  ;;  %v863_v38 = vmul.f32 1.442695, %v858_v34 }
 0x5d0   :  { %v896_v56 = vpop.permute.xlu1 %895 }
 0x5d1   :  { %v865_v35 = vmul.f32 1.442695, %v859_v32 }
 0x5d2   :  { %v856_v36 = vpop.xlane.xlu0 %855 }
 0x5d3   :  { %3056 = vpow2.f32 %v865_v35  ;;  %v860_v37 = vsub.f32 %v844_v27, %v856_v36 }
 0x5d4   :  { %3058 = vpow2.f32 %v861_v33 }
 0x5d5   :  { %v867_v39 = vmul.f32 1.442695, %v860_v37 }
 0x5d7   :  { %3060 = vpow2.f32 %v867_v39 }
 0x5d8   :  { %3062 = vpow2.f32 %v863_v38 }
 0x5dd   :  { %v3057_v42 = vpop.eup %3056 }
 0x5de   :  { %v875_v43 = vsel %vm593_vm0, %v3057_v42, 0.0  ;;  %v3059_v44 = vpop.eup %3058 }
 0x5df   :  { %876 = vadd.xlane.f32.xlu0 %v875_v43  ;;  %v869_v50 = vsel %vm593_vm0, %v3059_v44, 0.0 }
 0x5e1   :  { %v3061_v45 = vpop.eup %3060 }
 0x5e2   :  { %v878_v51 = vsel %vm593_vm0, %v3061_v45, 0.0  ;;  %v3063_v53 = vpop.eup %3062 }
 0x5e3   :  { %870 = vadd.xlane.f32.xlu0 %v869_v50  ;;  %879 = vadd.xlane.f32.xlu1 %v878_v51  ;;  %v872_v55 = vsel %vm593_vm0, %v3063_v53, 0.0 }
 0x5e7   :  { %873 = vadd.xlane.f32.xlu1 %v872_v55 }
 0x5f8   :  { %958 = vrot.lane.b32.xlu1 %v3418_v48, %s3173_s27 }
 0x5f9   :  { %893 = vrot.lane.b32.xlu0 %v3428_v61, %s3172_s4 }
 0x5fc   :  { %960 = vrot.lane.b32.xlu1 %v3434_v10, %s3173_s27 }
 0x5fd   :  { %954 = vrot.lane.b32.xlu0 %v3416_v46, %s3173_s27 }
 0x600   :  { %956 = vrot.lane.b32.xlu1 %v3431_v9, %s3173_s27 }
 0x66c   :  { %v877_v57 = vpop.xlane.xlu0 %876 }
 0x670   :  { %v871_v60 = vpop.xlane.xlu0 %870  ;;  %v880_v7 = vpop.xlane.xlu1 %879 }
 0x671   :  { %3064 = vrcp.f32 %v880_v7 }
 0x672   :  { %3066 = vrcp.f32 %v871_v60 }
 0x673   :  { %3068 = vrcp.f32 %v877_v57 }
 0x674   :  { %v894_v8 = vpop.permute.xlu0 %893  ;;  %v874_v11 = vpop.xlane.xlu1 %873 }
 0x675   :  { %3070 = vrcp.f32 %v874_v11  ;;  %2776 = vmatprep.subr.bf16.mxu0 %v894_v8 }
 0x676   :  { %2777 = vmatpush3.bf16.msra.mxu0 %v894_v8 }
 0x677   :  { %2778 = vmatprep.subr.bf16.mxu0 %v896_v56 }
 0x678   :  { %v959_v13 = vpop.permute.xlu1 %958  ;;  %v955_v27 = vpop.permute.xlu0 %954 }
 0x679   :  { %v969_v21 = vsel %vm593_vm0, %v959_v13, 0 }
 0x67a   :  { %2779 = vmatpush3.bf16.msra.mxu0 %v896_v56 }
 0x67b   :  { %2860 = vmatprep.subr.msk.bf16.mxu0 %vm593_vm0, %v959_v13  ;;  %v3065_v16 = vpop.eup %3064 }
 0x67c   :  { %v3067_v17 = vpop.eup %3066  ;;  %v888_v23 = vmul.f32 %v3065_v16, %v3061_v45  ;;  %v961_v15 = vpop.permute.xlu1 %960 }
 0x67d   :  { %v3069_v19 = vpop.eup %3068  ;;  %v885_v24 = vmul.f32 %v3067_v17, %v3059_v44  ;;  %v972_v28 = vsel %vm593_vm0, %v961_v15, 0 }
 0x67e   :  { %v887_v25 = vmul.f32 %v3069_v19, %v3057_v42 }
 0x67f   :  { %v3071_v20 = vpop.eup %3070 }
 0x680   :  { %v886_v14 = vmul.f32 %v3071_v20, %v3063_v53  ;;  %v890_v52 = vpack.c.bf16 %v888_v23, %v887_v25  ;;  %v957_v22 = vpop.permute.xlu1 %956 }
 0x682   :  { %v889_v26 = vpack.c.bf16 %v886_v14, %v885_v24 }
 0x684   :  { %2780 = vmatprep.mubr.msk.bf16.mxu0 %vm593_vm0, %v889_v26 }
 0x685   :  { %2781 = vmatmul.mubr.msk.bf16.vlgmr.msra.gmra.mrb[12].mxu0 %vm593_vm0, %v890_v52 }
 0x686   :  { %2785 = vmatpush3.bf16.xpose.msra.mxu0 %v969_v21  ;;  %2788 = vmatprep.mubr.msk.bf16.mxu0 %vm593_vm0, %v955_v27 }
 0x687   :  { %2861 = vmatprep.subr.msk.bf16.mxu0 %vm593_vm0, %v961_v15 }
 0x68e   :  { %2787 = vmatpush3.bf16.xpose.msra.mxu0 %v972_v28 }
 0x695   :  { %2789 = vmatmul.mubr.msk.bf16.vlgmr.msra.gmra.mrb[16].mxu0 %vm593_vm0, %v957_v22 }
 0x758   :  { %v3535_v31 = vpop.f32.mrb[12].mxu0 }
 0x759   :  { %v3537_v32 = vpop.f32.mrb[13].mxu0 }
 0x75a   :  { %v3539_v33 = vpop.f32.mrb[14].mxu0 }
 0x75b   :  { %v2879_v34 = vpack.i.bf16 %v3539_v33, %v3535_v31  ;;  %v3543_v35 = vpop.f32.mrb[15].mxu0 }
 0x75c   :  { %v2874_v36 = vpack.i.bf16 %v3543_v35, %v3537_v32 }
 0x768   :  { %v2790_v37 = vpop.f32.mrb[16].mxu0 }
 0x769   :  { %v1008_v38 = vpop.f32.mrb[17].mxu0  ;;  %v1025_v39 = vmul.f32 0.17677669, %v2790_v37 }
 0x76a   :  { %v1023_v42 = vmul.f32 0.17677669, %v1008_v38  ;;  %v2791_v43 = vpop.f32.mrb[18].mxu0 }
 0x76b   :  { %v1011_v44 = vpop.f32.mrb[19].mxu0  ;;  %v1026_v51 = vmul.f32 0.17677669, %v2791_v43  ;;  %v1029_v56 = vadd.f32 %v1025_v39, %v3463_v49 }
 0x76c   :  { %v1024_v45 = vmul.f32 0.17677669, %v1011_v44  ;;  %v1027_v50 = vadd.f32 %v1023_v42, %v3459_v40 }
 0x76d   :  { %v1037_v60 = vsel %vm593_vm0, %v1029_v56, -inf  ;;  %v1030_v7 = vadd.f32 %v1026_v51, %v3466_v54 }
 0x76e   :  { %v1031_v53 = vsel %vm593_vm0, %v1027_v50, -inf  ;;  %v1028_v55 = vadd.f32 %v1024_v45, %v3461_v47 }
 0x76f   :  { %1032 = vmax.xlane.f32.xlu0 %v1031_v53  ;;  %v1040_v8 = vsel %vm593_vm0, %v1030_v7, -inf }
 0x770   :  { %v1034_v57 = vsel %vm593_vm0, %v1028_v55, -inf }
 0x771   :  { %1035 = vmax.xlane.f32.xlu1 %v1034_v57 }
 0x773   :  { %1038 = vmax.xlane.f32.xlu0 %v1037_v60 }
 0x777   :  { %1041 = vmax.xlane.f32.xlu0 %v1040_v8 }
 0x782   :  { %1079 = vrot.lane.b32.xlu1 %v3426_v59, %s3173_s27 }
 0x7fc   :  { %v1033_v11 = vpop.xlane.xlu0 %1032 }
 0x7fd   :  { %v1043_v13 = vsub.f32 %v1027_v50, %v1033_v11 }
 0x7fe   :  { %v1036_v16 = vpop.xlane.xlu1 %1035 }
 0x7ff   :  { %v1047_v20 = vmul.f32 1.442695, %v1043_v13  ;;  %v1044_v23 = vsub.f32 %v1028_v55, %v1036_v16 }
 0x800   :  { %v1039_v17 = vpop.xlane.xlu0 %1038 }
 0x801   :  { %v1045_v19 = vsub.f32 %v1029_v56, %v1039_v17  ;;  %v1049_v26 = vmul.f32 1.442695, %v1044_v23 }
 0x802   :  { %v1080_v42 = vpop.permute.xlu1 %1079 }
 0x803   :  { %v1051_v24 = vmul.f32 1.442695, %v1045_v19 }
 0x804   :  { %v1042_v14 = vpop.xlane.xlu0 %1041 }
 0x805   :  { %3072 = vpow2.f32 %v1051_v24  ;;  %v1046_v25 = vsub.f32 %v1030_v7, %v1042_v14 }
 0x806   :  { %3074 = vpow2.f32 %v1047_v20 }
 0x807   :  { %v1053_v52 = vmul.f32 1.442695, %v1046_v25 }
 0x809   :  { %3076 = vpow2.f32 %v1053_v52 }
 0x80a   :  { %3078 = vpow2.f32 %v1049_v26 }
 0x80f   :  { %v3073_v27 = vpop.eup %3072 }
 0x810   :  { %v1061_v21 = vsel %vm593_vm0, %v3073_v27, 0.0  ;;  %v3075_v15 = vpop.eup %3074 }
 0x811   :  { %1062 = vadd.xlane.f32.xlu0 %v1061_v21  ;;  %v1055_v22 = vsel %vm593_vm0, %v3075_v15, 0.0 }
 0x813   :  { %v3077_v28 = vpop.eup %3076 }
 0x814   :  { %v1064_v37 = vsel %vm593_vm0, %v3077_v28, 0.0  ;;  %v3079_v38 = vpop.eup %3078 }
 0x815   :  { %1056 = vadd.xlane.f32.xlu0 %v1055_v22  ;;  %1065 = vadd.xlane.f32.xlu1 %v1064_v37  ;;  %v1058_v39 = vsel %vm593_vm0, %v3079_v38, 0.0 }
 0x819   :  { %1059 = vadd.xlane.f32.xlu1 %v1058_v39 }
 0x82a   :  { %1142 = vrot.lane.b32.xlu1 %v3418_v48, %s3174_s28 }
 0x82b   :  { %1077 = vrot.lane.b32.xlu0 %v3428_v61, %s3173_s27 }
 0x82e   :  { %1144 = vrot.lane.b32.xlu1 %v3434_v10, %s3174_s28 }
 0x82f   :  { %1138 = vrot.lane.b32.xlu0 %v3416_v46, %s3174_s28 }
 0x832   :  { %1140 = vrot.lane.b32.xlu1 %v3431_v9, %s3174_s28 }
 0x89e   :  { %v1063_v43 = vpop.xlane.xlu0 %1062 }
 0x8a2   :  { %v1057_v44 = vpop.xlane.xlu0 %1056  ;;  %v1066_v45 = vpop.xlane.xlu1 %1065 }
 0x8a3   :  { %3080 = vrcp.f32 %v1066_v45 }
 0x8a4   :  { %3082 = vrcp.f32 %v1057_v44 }
 0x8a5   :  { %3084 = vrcp.f32 %v1063_v43 }
 0x8a6   :  { %v1078_v48 = vpop.permute.xlu0 %1077  ;;  %v1060_v50 = vpop.xlane.xlu1 %1059 }
 0x8a7   :  { %3086 = vrcp.f32 %v1060_v50  ;;  %2792 = vmatprep.subr.bf16.mxu1 %v1078_v48 }
 0x8a8   :  { %2793 = vmatpush3.bf16.msra.mxu1 %v1078_v48 }
 0x8a9   :  { %2794 = vmatprep.subr.bf16.mxu1 %v1080_v42 }
 0x8aa   :  { %v1143_v10 = vpop.permute.xlu1 %1142  ;;  %v1139_v11 = vpop.permute.xlu0 %1138 }
 0x8ab   :  { %v1153_v13 = vsel %vm593_vm0, %v1143_v10, 0 }
 0x8ac   :  { %2795 = vmatpush3.bf16.msra.mxu1 %v1080_v42 }
 0x8ad   :  { %2862 = vmatprep.subr.msk.bf16.mxu1 %vm593_vm0, %v1143_v10  ;;  %v3081_v46 = vpop.eup %3080 }
 0x8ae   :  { %v3083_v51 = vpop.eup %3082  ;;  %v1074_v55 = vmul.f32 %v3081_v46, %v3077_v28  ;;  %v1145_v16 = vpop.permute.xlu1 %1144 }
 0x8af   :  { %v3085_v9 = vpop.eup %3084  ;;  %v1071_v56 = vmul.f32 %v3083_v51, %v3075_v15  ;;  %v1156_v17 = vsel %vm593_vm0, %v1145_v16, 0 }
 0x8b0   :  { %v1073_v60 = vmul.f32 %v3085_v9, %v3073_v27 }
 0x8b1   :  { %v3087_v53 = vpop.eup %3086 }
 0x8b2   :  { %v1072_v57 = vmul.f32 %v3087_v53, %v3079_v38  ;;  %v1076_v8 = vpack.c.bf16 %v1074_v55, %v1073_v60  ;;  %v1141_v19 = vpop.permute.xlu1 %1140 }
 0x8b4   :  { %v1075_v7 = vpack.c.bf16 %v1072_v57, %v1071_v56 }
 0x8b6   :  { %2796 = vmatprep.mubr.msk.bf16.mxu1 %vm593_vm0, %v1075_v7 }
 0x8b7   :  { %2797 = vmatmul.mubr.msk.bf16.vlgmr.msra.gmra.mrb[12].mxu1 %vm593_vm0, %v1076_v8 }
 0x8b8   :  { %2801 = vmatpush3.bf16.xpose.msra.mxu1 %v1153_v13  ;;  %2804 = vmatprep.mubr.msk.bf16.mxu1 %vm593_vm0, %v1139_v11 }
 0x8b9   :  { %2863 = vmatprep.subr.msk.bf16.mxu1 %vm593_vm0, %v1145_v16 }
 0x8c0   :  { %2803 = vmatpush3.bf16.xpose.msra.mxu1 %v1156_v17 }
 0x8c7   :  { %2805 = vmatmul.mubr.msk.bf16.vlgmr.msra.gmra.mrb[16].mxu1 %vm593_vm0, %v1141_v19 }
 0x8c8   :  { %1790 = vmatprep.mubr.bf16.mxu1 %v3170_v41 }
 0x98a   :  { %v2798_v20 = vpop.f32.mrb[12].mxu1 }
 0x98b   :  { %v1123_v23 = vpop.f32.mrb[13].mxu1 }
 0x98c   :  { %v2799_v24 = vpop.f32.mrb[14].mxu1 }
 0x98d   :  { %v2889_v14 = vpack.i.bf16 %v2799_v24, %v2798_v20  ;;  %v1126_v25 = vpop.f32.mrb[15].mxu1 }
 0x98e   :  { %v2884_v26 = vpack.i.bf16 %v1126_v25, %v1123_v23 }
 0x99a   :  { %v2806_v52 = vpop.f32.mrb[16].mxu1 }
 0x99b   :  { %v1192_v27 = vpop.f32.mrb[17].mxu1  ;;  %v1209_v21 = vmul.f32 0.17677669, %v2806_v52 }
 0x99c   :  { %v1207_v15 = vmul.f32 0.17677669, %v1192_v27  ;;  %v2807_v28 = vpop.f32.mrb[18].mxu1 }
 0x99d   :  { %v1195_v22 = vpop.f32.mrb[19].mxu1  ;;  %v1210_v39 = vmul.f32 0.17677669, %v2807_v28  ;;  %v1213_v44 = vadd.f32 %v1209_v21, %v3463_v49  ;;  %v2937_v28 = vld [vmem:[%s4106_s5 + $0x8] sm:$0xff]  }
 0x99e   :  { %v1208_v37 = vmul.f32 0.17677669, %v1195_v22  ;;  %v1211_v38 = vadd.f32 %v1207_v15, %v3459_v40  ;;  %v2936_v15 = vld [vmem:[%s4106_s5] sm:$0xff]   ;;  %v2938_v22 = vld [vmem:[%s4106_s5 + $0x10] sm:$0xff]  }
 0x99f   :  { %v1221_v48 = vsel %vm593_vm0, %v1213_v44, -inf  ;;  %v1214_v50 = vadd.f32 %v1210_v39, %v3466_v54  ;;  %v2941_v39 = vld [vmem:[%s4106_s5 + $0x28] sm:$0xff]  }
 0x9a0   :  { %v1215_v42 = vsel %vm593_vm0, %v1211_v38, -inf  ;;  %v1212_v43 = vadd.f32 %v1208_v37, %v3461_v47  ;;  %v2939_v37 = vld [vmem:[%s4106_s5 + $0x18] sm:$0xff]  }
 0x9a1   :  { %1216 = vmax.xlane.f32.xlu0 %v1215_v42  ;;  %v1224_v10 = vsel %vm593_vm0, %v1214_v50, -inf  ;;  %v2942_v42 = vld [vmem:[%s4106_s5 + $0x30] sm:$0xff]  }
 0x9a2   :  { %v1218_v45 = vsel %vm593_vm0, %v1212_v43, -inf }
 0x9a3   :  { %1219 = vmax.xlane.f32.xlu1 %v1218_v45 }
 0x9a5   :  { %1222 = vmax.xlane.f32.xlu0 %v1221_v48 }
 0x9a9   :  { %1225 = vmax.xlane.f32.xlu0 %v1224_v10 }
 0xa2e   :  { %v1217_v40 = vpop.xlane.xlu0 %1216 }
 0xa2f   :  { %v1227_v46 = vsub.f32 %v1211_v38, %v1217_v40  ;;  %v2940_v38 = vld [vmem:[%s4106_s5 + $0x20] sm:$0xff]  }
 0xa30   :  { %v1220_v51 = vpop.xlane.xlu1 %1219 }
 0xa31   :  { %v1231_v47 = vmul.f32 1.442695, %v1227_v46  ;;  %v1228_v55 = vsub.f32 %v1212_v43, %v1220_v51  ;;  %v2943_v43 = vld [vmem:[%s4106_s5 + $0x38] sm:$0xff]  }
 0xa32   :  { %v1223_v9 = vpop.xlane.xlu0 %1222 }
 0xa33   :  { %v1229_v53 = vsub.f32 %v1213_v44, %v1223_v9  ;;  %v1233_v60 = vmul.f32 1.442695, %v1228_v55 }
 0xa35   :  { %v1235_v49 = vmul.f32 1.442695, %v1229_v53 }
 0xa36   :  { %v1226_v56 = vpop.xlane.xlu0 %1225 }
 0xa37   :  { %3088 = vpow2.f32 %v1235_v49  ;;  %v1230_v57 = vsub.f32 %v1214_v50, %v1226_v56 }
 0xa38   :  { %3090 = vpow2.f32 %v1231_v47 }
 0xa39   :  { %v1237_v7 = vmul.f32 1.442695, %v1230_v57 }
 0xa3b   :  { %3092 = vpow2.f32 %v1237_v7 }
 0xa3c   :  { %3094 = vpow2.f32 %v1233_v60 }
 0xa41   :  { %v3089_v54 = vpop.eup %3088 }
 0xa42   :  { %v1245_v8 = vsel %vm593_vm0, %v3089_v54, 0.0  ;;  %v3091_v11 = vpop.eup %3090 }
 0xa43   :  { %1246 = vadd.xlane.f32.xlu0 %v1245_v8  ;;  %v1239_v16 = vsel %vm593_vm0, %v3091_v11, 0.0 }
 0xa45   :  { %v3093_v13 = vpop.eup %3092 }
 0xa46   :  { %v1248_v17 = vsel %vm593_vm0, %v3093_v13, 0.0  ;;  %v3095_v19 = vpop.eup %3094 }
 0xa47   :  { %1240 = vadd.xlane.f32.xlu0 %v1239_v16  ;;  %1249 = vadd.xlane.f32.xlu1 %v1248_v17  ;;  %v1242_v20 = vsel %vm593_vm0, %v3095_v19, 0.0 }
 0xa4b   :  { %1243 = vadd.xlane.f32.xlu1 %v1242_v20 }
 0xa5c   :  { %1263 = vrot.lane.b32.xlu1 %v3426_v59, %s3174_s28 }
 0xa5d   :  { %1261 = vrot.lane.b32.xlu0 %v3428_v61, %s3174_s28 }
 0xa60   :  { %2875 = vrot.lane.b32.xlu1 %v2874_v36, %s3174_s28 }
 0xa61   :  { %2885 = vrot.lane.b32.xlu0 %v2884_v26, %s3173_s27 }
 0xa64   :  { %2880 = vrot.lane.b32.xlu1 %v2879_v34, %s3174_s28 }
 0xa68   :  { %2890 = vrot.lane.b32.xlu1 %v2889_v14, %s3173_s27 }
 0xad0   :  { %v1247_v23 = vpop.xlane.xlu0 %1246 }
 0xad4   :  { %v1241_v24 = vpop.xlane.xlu0 %1240  ;;  %v1250_v59 = vpop.xlane.xlu1 %1249 }
 0xad5   :  { %3096 = vrcp.f32 %v1250_v59 }
 0xad6   :  { %3098 = vrcp.f32 %v1241_v24 }
 0xad7   :  { %3100 = vrcp.f32 %v1247_v23 }
 0xad8   :  { %v1262_v61 = vpop.permute.xlu0 %1261  ;;  %v1244_v25 = vpop.xlane.xlu1 %1243 }
 0xad9   :  { %3102 = vrcp.f32 %v1244_v25  ;;  %2808 = vmatprep.subr.bf16.mxu0 %v1262_v61 }
 0xada   :  { %2809 = vmatpush3.bf16.msra.mxu0 %v1262_v61 }
 0xadc   :  { %v1264_v32 = vpop.permute.xlu1 %1263  ;;  %v2886_v53 = vpop.permute.xlu0 %2885 }
 0xadd   :  { %2810 = vmatprep.subr.bf16.mxu0 %v1264_v32  ;;  %v2888_v7 = vunpack.i.h.bf16 %v2886_v53 }
 0xade   :  { %2811 = vmatpush3.bf16.msra.mxu0 %v1264_v32 }
 0xadf   :  { %v3097_v35 = vpop.eup %3096  ;;  %2816 = vmatprep.subr.bf16.mxu0 %v2936_v15 }
 0xae0   :  { %v3099_v36 = vpop.eup %3098  ;;  %v1258_v34 = vmul.f32 %v3097_v35, %v3093_v13  ;;  %v2876_v46 = vpop.permute.xlu1 %2875 }
 0xae1   :  { %v3101_v31 = vpop.eup %3100  ;;  %v1255_v14 = vmul.f32 %v3099_v36, %v3091_v11  ;;  %v2878_v47 = vunpack.i.h.bf16 %v2876_v46  ;;  %v2877_v55 = vunpack.i.l.bf16 %v2876_v46 }
 0xae2   :  { %v1257_v52 = vmul.f32 %v3101_v31, %v3089_v54  ;;  %v2887_v54 = vunpack.i.l.bf16 %v2886_v53 }
 0xae3   :  { %v3103_v33 = vpop.eup %3102  ;;  %v1371_v8 = vsel %vm593_vm0, %v3501_v6, %v2878_v47  ;;  %v1370_v11 = vsel %vm593_vm0, %v3497_v0, %v2877_v55 }
 0xae4   :  { %v1256_v26 = vmul.f32 %v3103_v33, %v3095_v19  ;;  %v1260_v21 = vpack.c.bf16 %v1258_v34, %v1257_v52  ;;  %v2881_v51 = vpop.permute.xlu1 %2880  ;;  %v1375_v32 = vsel %vm1374_vm13, %v1370_v11, %v2887_v54  ;;  %v119_v33 = vld [vmem:[%s4107_s6] sm:$0x1] }
 0xae5   :  { %v2883_v49 = vunpack.i.h.bf16 %v2881_v51  ;;  %v2882_v56 = vunpack.i.l.bf16 %v2881_v51  ;;  %v1487_v34 = vunpack.c.l.bf16 %v119_v33  ;;  %v2980_v33 = vld [vmem:[%s4110_s9 + $0xc0] ss:$16 sps:$4 sm:$0xff]  }
 0xae6   :  { %v1259_v27 = vpack.c.bf16 %v1256_v26, %v1255_v14 }
 0xae7   :  { %v1373_v16 = vsel %vm593_vm0, %v3499_v1, %v2883_v49  ;;  %v1372_v17 = vsel %vm593_vm0, %v3495_v62, %v2882_v56  ;;  %v1376_v1 = vsel %vm1374_vm13, %v1371_v8, %v2888_v7  ;;  %v1491_v26 = vrot.slane %v1487_v34, %v3391_v63  ;;  %v2983_v34 = vld [vmem:[%s4110_s9 + $0xc8] ss:$16 sps:$4 sm:$0xff]  }
 0xae8   :  { %2812 = vmatprep.mubr.msk.bf16.mxu0 %vm593_vm0, %v1259_v27  ;;  %v2891_v9 = vpop.permute.xlu1 %2890 }
 0xae9   :  { %2813 = vmatmul.mubr.msk.bf16.vlgmr.msra.gmra.mrb[20].mxu0 %vm593_vm0, %v1260_v21  ;;  %v2893_v57 = vunpack.i.h.bf16 %v2891_v9  ;;  %v2892_v60 = vunpack.i.l.bf16 %v2891_v9  ;;  %vm2319_vm0 = vcmask 1041408  }
 0xaea   :  { %2817 = vmatpush3.bf16.msra.mxu0 %v2936_v15 }
 0xaeb   :  { %2818 = vmatprep.subr.bf16.mxu0 %v2937_v28  ;;  %v1377_v24 = vsel %vm1374_vm13, %v1372_v17, %v2892_v60  ;;  %v1378_v59 = vsel %vm1374_vm13, %v1373_v16, %v2893_v57  ;;  %v2961_v16 = vld [vmem:[%s4110_s9 + $0x4c] ss:$16 sps:$4 sm:$0xff]   ;;  %v2956_v17 = vld [vmem:[%s4110_s9 + $0x40] ss:$16 sps:$4 sm:$0xff]  }
 0xaee   :  { %2819 = vmatpush3.bf16.msra.mxu0 %v2937_v28 }
 0xaef   :  { %2820 = vmatprep.subr.bf16.mxu0 %v2938_v22 }
 0xaf2   :  { %2821 = vmatpush3.bf16.msra.mxu0 %v2938_v22 }
 0xaf3   :  { %2822 = vmatprep.subr.bf16.mxu0 %v2939_v37 }
 0xaf6   :  { %2823 = vmatpush3.bf16.msra.mxu0 %v2939_v37 }
 0xaf7   :  { %2824 = vmatprep.subr.bf16.mxu0 %v2940_v38 }
 0xafa   :  { %2825 = vmatpush3.bf16.msra.mxu0 %v2940_v38 }
 0xafb   :  { %2826 = vmatprep.subr.bf16.mxu0 %v2941_v39 }
 0xafe   :  { %2827 = vmatpush3.bf16.msra.mxu0 %v2941_v39 }
 0xaff   :  { %2828 = vmatprep.subr.bf16.mxu0 %v2942_v42 }
 0xb02   :  { %2829 = vmatpush3.bf16.msra.mxu0 %v2942_v42 }
 0xb03   :  { %2830 = vmatprep.subr.bf16.mxu0 %v2943_v43 }
 0xb06   :  { %2831 = vmatpush3.bf16.msra.mxu0 %v2943_v43 }
 0xbbc   :  { %v2814_v44 = vpop.f32.mrb[20].mxu0 }
 0xbbd   :  { %v1307_v45 = vpop.f32.mrb[21].mxu0 }
 0xbbe   :  { %v2815_v48 = vpop.f32.mrb[22].mxu0 }
 0xbbf   :  { %v2899_v50 = vpack.i.bf16 %v2815_v48, %v2814_v44  ;;  %v1310_v10 = vpop.f32.mrb[23].mxu0  ;;  %v2952_v44 = vld [vmem:[%s4110_s9 + $0x24] ss:$16 sps:$4 sm:$0xff]   ;;  %v2950_v48 = vld [vmem:[%s4110_s9 + $0x20] ss:$16 sps:$4 sm:$0xff]  }
 0xbc0   :  { %v2894_v40 = vpack.i.bf16 %v1310_v10, %v1307_v45  ;;  %v2955_v45 = vld [vmem:[%s4110_s9 + $0x2c] ss:$16 sps:$4 sm:$0xff]  }
 0xbc1   :  { %2900 = vrot.lane.b32.xlu1 %v2899_v50, %s3172_s4  ;;  %v2953_v50 = vld [vmem:[%s4110_s9 + $0x28] ss:$16 sps:$4 sm:$0xff]  }
 0xbc2   :  { %2895 = vrot.lane.b32.xlu0 %v2894_v40, %s3172_s4 }
 0xc33   :  { %v2901_v13 = vpop.permute.xlu1 %2900 }
 0xc34   :  { %v2903_v19 = vunpack.i.h.bf16 %v2901_v13  ;;  %v2902_v20 = vunpack.i.l.bf16 %v2901_v13  ;;  %v2896_v23 = vpop.permute.xlu0 %2895  ;;  %v2958_v13 = vld [vmem:[%s4110_s9 + $0x44] ss:$16 sps:$4 sm:$0xff]  }
 0xc35   :  { %v2898_v61 = vunpack.i.h.bf16 %v2896_v23  ;;  %v2897_v6 = vunpack.i.l.bf16 %v2896_v23  ;;  %v2967_v23 = vld [vmem:[%s4110_s9 + $0x6c] ss:$16 sps:$4 sm:$0xff]  }
 0xc36   :  { %v1382_v25 = vsel %vm1379_vm14, %v1377_v24, %v2902_v20  ;;  %v1383_v0 = vsel %vm1379_vm14, %v1378_v59, %v2903_v19  ;;  %v2959_v19 = vld [vmem:[%s4110_s9 + $0x48] ss:$16 sps:$4 sm:$0xff]   ;;  %v2964_v20 = vld [vmem:[%s4110_s9 + $0x64] ss:$16 sps:$4 sm:$0xff]   ;;  %v2962_v24 = vld [vmem:[%s4110_s9 + $0x60] ss:$16 sps:$4 sm:$0xff]  }
 0xc37   :  { %v1385_v35 = vpack.c.bf16 %v1383_v0, %v1382_v25  ;;  %v1380_v62 = vsel %vm1379_vm14, %v1375_v32, %v2897_v6  ;;  %v1381_v36 = vsel %vm1379_vm14, %v1376_v1, %v2898_v61  ;;  %v2965_v59 = vld [vmem:[%s4110_s9 + $0x68] ss:$16 sps:$4 sm:$0xff]   ;;  %v2970_v61 = vld [vmem:[%s4110_s9 + $0x84] ss:$16 sps:$4 sm:$0xff]   ;;  %v2973_v6 = vld [vmem:[%s4110_s9 + $0x8c] ss:$16 sps:$4 sm:$0xff]  }
 0xc38   :  { %v1384_v31 = vpack.c.bf16 %v1381_v36, %v1380_v62  ;;  %v2968_v25 = vld [vmem:[%s4110_s9 + $0x80] ss:$16 sps:$4 sm:$0xff]   ;;  %v2971_v0 = vld [vmem:[%s4110_s9 + $0x88] ss:$16 sps:$4 sm:$0xff]   ;;  %v2976_v32 = vld [vmem:[%s4110_s9 + $0xa4] ss:$16 sps:$4 sm:$0xff]  }
 0xc39   :  { %v2979_v1 = vld [vmem:[%s4110_s9 + $0xac] ss:$16 sps:$4 sm:$0xff]   ;;  %v2977_v62 = vld [vmem:[%s4110_s9 + $0xa8] ss:$16 sps:$4 sm:$0xff]   ;;  %v2982_v36 = vld [vmem:[%s4110_s9 + $0xc4] ss:$16 sps:$4 sm:$0xff]  }
 0xc3a   :  { %2832 = vmatprep.mubr.bf16.mxu0 %v1384_v31  ;;  %v2985_v31 = vld [vmem:[%s4110_s9 + $0xcc] ss:$16 sps:$4 sm:$0xff]  }
 0xc3b   :  { %2833 = vmatmul.mubr.bf16.vlgmr.msra.gmra.mrb[24].mxu0 %v1385_v35  ;;  %v2974_v35 = vld [vmem:[%s4110_s9 + $0xa0] ss:$16 sps:$4 sm:$0xff]  }
 0xc3c   :  { %1843 = vmatprep.mubr.bf16.mxu0 %v3170_v41 }
 0xd0e   :  { %v2834_v14 = vpop.f32.mrb[24].mxu0 }
 0xd0f   :  { %v1468_v52 = vpop.f32.mrb[25].mxu0  ;;  %v1485_v28 = vadd.f32 %v2834_v14, %v3281_v3  ;;  %v2946_v3 = vld [vmem:[%s4110_s9 + $0x4] ss:$16 sps:$4 sm:$0xff]  }
 0xd10   :  { %v1483_v27 = vadd.f32 %v3279_v2, %v1468_v52  ;;  %v2835_v21 = vpop.f32.mrb[26].mxu0  ;;  %v2944_v2 = vld [vmem:[%s4110_s9] ss:$16 sps:$4 sm:$0xff]   ;;  %1758 = vmatprep.subr.bf16.mxu1 %v2946_v3  ;;  %v2988_v14 = vld [vmem:[%s4110_s9 + $0xe4] ss:$16 sps:$4 sm:$0xff]  }
 0xd11   :  { %v1471_v15 = vpop.f32.mrb[27].mxu0  ;;  %v3660_v39 = vadd.f32 %v1491_v26, %v1485_v28  ;;  %v1486_v42 = vadd.f32 %v2835_v21, %v3287_v5  ;;  %v2949_v5 = vld [vmem:[%s4110_s9 + $0xc] ss:$16 sps:$4 sm:$0xff]   ;;  %1759 = vmatpush1.bf16.msra.mxu1 %v2944_v2  ;;  %v2986_v52 = vld [vmem:[%s4110_s9 + $0xe0] ss:$16 sps:$4 sm:$0xff]  }
 0xd12   :  { %v1484_v22 = vadd.f32 %v3285_v4, %v1471_v15  ;;  %v1492_v37 = vadd.f32 %v1491_v26, %v1483_v27  ;;  %v2947_v4 = vld [vmem:[%s4110_s9 + $0x8] ss:$16 sps:$4 sm:$0xff]   ;;  %1811 = vmatprep.subr.bf16.mxu0 %v2949_v5  ;;  %1760 = vmatprep.subr.bf16.mxu1 %v2952_v44 }
 0xd13   :  { %v1495_v43 = vadd.f32 %v1491_v26, %v1486_v42  ;;  %1812 = vmatpush1.bf16.msra.mxu0 %v2947_v4  ;;  %v2989_v27 = vld [vmem:[%s4110_s9 + $0xe8] ss:$16 sps:$4 sm:$0xff]   ;;  %v120_v4 = vld [vmem:[%s4108_s7] sm:$0x1] }
 0xd14   :  { %v3658_v38 = vadd.f32 %v1491_v26, %v1484_v22  ;;  %1496 = vadd.xlane.f32.xlu0 %v1492_v37  ;;  %1813 = vmatprep.subr.bf16.mxu0 %v2955_v45  ;;  %v2991_v26 = vld [vmem:[%s4110_s9 + $0xec] ss:$16 sps:$4 sm:$0xff]   ;;  %v1540_v45 = vunpack.c.l.bf16 %v120_v4 }
 0xd15   :  { %1761 = vmatpush1.bf16.msra.mxu1 %v2950_v48  ;;  %v3021_v4 = vld [vmem:[%s4112_s11 + $0xf8] sm:$0xff]  }
 0xd16   :  { %1498 = vadd.xlane.f32.xlu1 %v3658_v38  ;;  %1762 = vmatprep.subr.bf16.mxu1 %v2958_v13 }
 0xd17   :  { %1814 = vmatpush1.bf16.msra.mxu0 %v2953_v50  ;;  %v121_v50 = vld [vmem:[%s4109_s8] sm:$0x1] }
 0xd18   :  { %1500 = vadd.xlane.f32.xlu0 %v3660_v39  ;;  %1815 = vmatprep.subr.bf16.mxu0 %v2961_v16 }
 0xd19   :  { %1763 = vmatpush1.bf16.msra.mxu1 %v2956_v17 }
 0xd1a   :  { %1764 = vmatprep.subr.bf16.mxu1 %v2964_v20 }
 0xd1b   :  { %1816 = vmatpush1.bf16.msra.mxu0 %v2959_v19 }
 0xd1c   :  { %1502 = vadd.xlane.f32.xlu0 %v1495_v43  ;;  %1817 = vmatprep.subr.bf16.mxu0 %v2967_v23 }
 0xd1d   :  { %1765 = vmatpush1.bf16.msra.mxu1 %v2962_v24 }
 0xd1e   :  { %1766 = vmatprep.subr.bf16.mxu1 %v2970_v61  ;;  %v2996_v61 = vld [vmem:[%s4112_s11 + $0x48] sm:$0xff]  }
 0xd1f   :  { %1818 = vmatpush1.bf16.msra.mxu0 %v2965_v59  ;;  %v2994_v59 = vld [vmem:[%s4112_s11] sm:$0xff]  }
 0xd20   :  { %1819 = vmatprep.subr.bf16.mxu0 %v2973_v6  ;;  %v2997_v6 = vld [vmem:[%s4112_s11 + $0xc8] sm:$0xff]  }
 0xd21   :  { %1767 = vmatpush1.bf16.msra.mxu1 %v2968_v25  ;;  %v2998_v25 = vld [vmem:[%s4112_s11 + $0x8] sm:$0xff]  }
 0xd22   :  { %1768 = vmatprep.subr.bf16.mxu1 %v2976_v32  ;;  %v3000_v32 = vld [vmem:[%s4112_s11 + $0x50] sm:$0xff]  }
 0xd23   :  { %1820 = vmatpush1.bf16.msra.mxu0 %v2971_v0  ;;  %v2999_v0 = vld [vmem:[%s4112_s11 + $0x88] sm:$0xff]  }
 0xd24   :  { %1821 = vmatprep.subr.bf16.mxu0 %v2979_v1  ;;  %v3001_v1 = vld [vmem:[%s4112_s11 + $0xd0] sm:$0xff]  }
 0xd25   :  { %1769 = vmatpush1.bf16.msra.mxu1 %v2974_v35  ;;  %v3002_v35 = vld [vmem:[%s4112_s11 + $0x10] sm:$0xff]  }
 0xd26   :  { %1770 = vmatprep.subr.bf16.mxu1 %v2982_v36  ;;  %v3004_v36 = vld [vmem:[%s4112_s11 + $0x58] sm:$0xff]  }
 0xd27   :  { %1822 = vmatpush1.bf16.msra.mxu0 %v2977_v62  ;;  %v3003_v62 = vld [vmem:[%s4112_s11 + $0x90] sm:$0xff]  }
 0xd28   :  { %1823 = vmatprep.subr.bf16.mxu0 %v2985_v31  ;;  %v3005_v31 = vld [vmem:[%s4112_s11 + $0xd8] sm:$0xff]  }
 0xd29   :  { %1771 = vmatpush1.bf16.msra.mxu1 %v2980_v33  ;;  %v3006_v33 = vld [vmem:[%s4112_s11 + $0x18] sm:$0xff]  }
 0xd2a   :  { %1772 = vmatprep.subr.bf16.mxu1 %v2988_v14  ;;  %v3008_v14 = vld [vmem:[%s4112_s11 + $0x60] sm:$0xff]  }
 0xd2b   :  { %1824 = vmatpush1.bf16.msra.mxu0 %v2983_v34  ;;  %v3007_v34 = vld [vmem:[%s4112_s11 + $0x98] sm:$0xff]  }
 0xd2c   :  { %1825 = vmatprep.subr.bf16.mxu0 %v2991_v26  ;;  %v3009_v26 = vld [vmem:[%s4112_s11 + $0xe0] sm:$0xff]  }
 0xd2d   :  { %1773 = vmatpush1.bf16.msra.mxu1 %v2986_v52  ;;  %v3010_v52 = vld [vmem:[%s4112_s11 + $0x20] sm:$0xff]  }
 0xd2f   :  { %1826 = vmatpush1.bf16.msra.mxu0 %v2989_v27  ;;  %v3011_v27 = vld [vmem:[%s4112_s11 + $0xa0] sm:$0xff]  }
 0xda1   :  { %v1497_v10 = vpop.xlane.xlu0 %1496 }
 0xda2   :  { %v1504_v40 = vmul.f32 0.0078125, %v1497_v10  ;;  %v1544_v10 = vrot.slane %v1540_v45, %v3391_v63  ;;  %v154_v45 = vld [vmem:[%s4111_s10] sm:$0xf] }
 0xda3   :  { %v1499_v46 = vpop.xlane.xlu1 %1498 }
 0xda4   :  { %v3689_v51 = vsub.f32 %v1492_v37, %v1504_v40  ;;  %v1505_v9 = vmul.f32 0.0078125, %v1499_v46  ;;  %v1549_v40 = vunpack.c.l.bf16 %v121_v50  ;;  %v1576_v50 = vsub.s32 6, %v3385_v58 }
 0xda5   :  { %v1501_v53 = vpop.xlane.xlu0 %1500 }
 0xda6   :  { %v3692_v47 = vsub.f32 %v3658_v38, %v1505_v9  ;;  %v1506_v55 = vmul.f32 0.0078125, %v1501_v53  ;;  %v1512_v49 = vmul.f32 %v3689_v51, %v3689_v51 }
 0xda8   :  { %v3697_v56 = vsub.f32 %v3660_v39, %v1506_v55  ;;  %1516 = vadd.xlane.f32.xlu0 %v1512_v49  ;;  %v1513_v57 = vmul.f32 %v3692_v47, %v3692_v47 }
 0xda9   :  { %v1503_v60 = vpop.xlane.xlu0 %1502 }
 0xdaa   :  { %v1507_v7 = vmul.f32 0.0078125, %v1503_v60  ;;  %1518 = vadd.xlane.f32.xlu1 %v1513_v57  ;;  %v1514_v54 = vmul.f32 %v3697_v56, %v3697_v56  ;;  %v1553_v57 = vrot.slane %v1549_v40, %v3391_v63 }
 0xdac   :  { %v3703_v8 = vsub.f32 %v1495_v43, %v1507_v7  ;;  %1520 = vadd.xlane.f32.xlu0 %v1514_v54 }
 0xdae   :  { %v1515_v11 = vmul.f32 %v3703_v8, %v3703_v8 }
 0xdb0   :  { %1522 = vadd.xlane.f32.xlu1 %v1515_v11 }
 0xe35   :  { %v1517_v21 = vpop.xlane.xlu0 %1516 }
 0xe36   :  { %v1524_v15 = vmul.f32 0.0078125, %v1517_v21  ;;  %v3012_v21 = vld [vmem:[%s4112_s11 + $0x68] sm:$0xff]  }
 0xe37   :  { %v1519_v28 = vpop.xlane.xlu1 %1518 }
 0xe38   :  { %v1528_v22 = vadd.f32 1e-05, %v1524_v15  ;;  %v1525_v37 = vmul.f32 0.0078125, %v1519_v28  ;;  %v3013_v15 = vld [vmem:[%s4112_s11 + $0xe8] sm:$0xff]  }
 0xe39   :  { %v1521_v42 = vpop.xlane.xlu0 %1520  ;;  %v3014_v28 = vld [vmem:[%s4112_s11 + $0x28] sm:$0xff]  }
 0xe3a   :  { %3104 = vrsqrt.f32 %v1528_v22  ;;  %v1529_v43 = vadd.f32 1e-05, %v1525_v37  ;;  %v1526_v2 = vmul.f32 0.0078125, %v1521_v42  ;;  %v3015_v22 = vld [vmem:[%s4112_s11 + $0xa8] sm:$0xff]   ;;  %v3016_v37 = vld [vmem:[%s4112_s11 + $0x70] sm:$0xff]  }
 0xe3b   :  { %v3017_v42 = vld [vmem:[%s4112_s11 + $0xf0] sm:$0xff]  }
 0xe3c   :  { %3106 = vrsqrt.f32 %v1529_v43  ;;  %v1530_v3 = vadd.f32 1e-05, %v1526_v2  ;;  %v3018_v43 = vld [vmem:[%s4112_s11 + $0x30] sm:$0xff]  }
 0xe3d   :  { %v1523_v5 = vpop.xlane.xlu1 %1522  ;;  %v3019_v2 = vld [vmem:[%s4112_s11 + $0xb0] sm:$0xff]  }
 0xe3e   :  { %3108 = vrsqrt.f32 %v1530_v3  ;;  %v1527_v44 = vmul.f32 0.0078125, %v1523_v5  ;;  %v3020_v3 = vld [vmem:[%s4112_s11 + $0x78] sm:$0xff]  }
 0xe3f   :  { %v3022_v5 = vld [vmem:[%s4112_s11 + $0x38] sm:$0xff]  }
 0xe40   :  { %v1531_v48 = vadd.f32 1e-05, %v1527_v44  ;;  %v3023_v44 = vld [vmem:[%s4112_s11 + $0xb8] sm:$0xff]  }
 0xe42   :  { %3110 = vrsqrt.f32 %v1531_v48  ;;  %v1560_v48 = vunpack.c.l.bf16 %v154_v45 }
 0xe44   :  { %v3105_v46 = vpop.eup %3104  ;;  %v1573_v40 = vrot.slane %v1560_v48, %v297_v30 }
 0xe45   :  { %v1536_v9 = vmul.f32 %v3105_v46, %v3689_v51  ;;  %v1569_v46 = vrot.slane %v1560_v48, %v293_v29 }
 0xe46   :  { %v3107_v53 = vpop.eup %3106 }
 0xe47   :  { %v1537_v55 = vmul.f32 %v3107_v53, %v3692_v47  ;;  %v1545_v49 = vmul.f32 %v1544_v10, %v1536_v9  ;;  %v1577_v9 = vrot.slane %v1560_v48, %v1576_v50 }
 0xe48   :  { %v3109_v60 = vpop.eup %3108 }
 0xe49   :  { %v1546_v7 = vmul.f32 %v1544_v10, %v1537_v55  ;;  %v1554_v54 = vadd.f32 %v1553_v57, %v1545_v49  ;;  %v1538_v13 = vmul.f32 %v3109_v60, %v3697_v56  ;;  %v2992_v56 = vld [vmem:[%s4112_s11 + $0x40] sm:$0xff]   ;;  %v3902_v55 = vrot.slane %v1573_v40, %v3391_v63 }
 0xe4a   :  { %2667 = vmatprep.subr.bf16.mxu1 %v2992_v56  ;;  %v3905_v49 = vrot.slane %v1569_v46, %v3391_v63 }
 0xe4b   :  { %v1555_v11 = vadd.f32 %v1553_v57, %v1546_v7  ;;  %v1547_v20 = vmul.f32 %v1544_v10, %v1538_v13 }
 0xe4c   :  { %v3111_v16 = vpop.eup %3110 }
 0xe4d   :  { %v1558_v17 = vpack.c.bf16 %v1555_v11, %v1554_v54  ;;  %v1539_v19 = vmul.f32 %v3111_v16, %v3703_v8  ;;  %v1556_v23 = vadd.f32 %v1553_v57, %v1547_v20  ;;  %v2993_v8 = vld [vmem:[%s4112_s11 + $0xc0] sm:$0xff]  }
 0xe4e   :  { %2695 = vmatprep.subr.bf16.mxu0 %v2993_v8 }
 0xe4f   :  { %1791 = vmatmul.mubr.bf16.vlgmr.msra.gmra.mrb[20].mxu1 %v1558_v17  ;;  %1844 = vmatmul.mubr.bf16.vlgmr.msra.gmra.mrb[28].mxu0 %v1558_v17  ;;  %v1548_v51 = vmul.f32 %v1544_v10, %v1539_v19  ;;  %v1565_v10 = vrot.slane %v1560_v48, %v3391_v63 }
 0xe50   :  { %1800 = vmatprep.mubr.bf16.mxu1 %v3170_v41  ;;  %1853 = vmatprep.mubr.bf16.mxu0 %v3170_v41  ;;  %v2995_v41 = vld [vmem:[%s4112_s11 + $0x80] sm:$0xff]  }
 0xe51   :  { %v1557_v47 = vadd.f32 %v1553_v57, %v1548_v51  ;;  %2668 = vmatpush3.bf16.msra.mxu1 %v2994_v59  ;;  %2696 = vmatpush3.bf16.msra.mxu0 %v2995_v41  ;;  %v3899_v53 = vrot.slane %v1565_v10, %v3391_v63  ;;  %v3908_v57 = vrot.slane %v1577_v9, %v3391_v63 }
 0xe52   :  { %2669 = vmatprep.subr.bf16.mxu1 %v2996_v61  ;;  %2697 = vmatprep.subr.bf16.mxu0 %v2997_v6 }
 0xe53   :  { %v1559_v24 = vpack.c.bf16 %v1557_v47, %v1556_v23 }
 0xe55   :  { %2670 = vmatpush3.bf16.msra.mxu1 %v2998_v25  ;;  %2698 = vmatpush3.bf16.msra.mxu0 %v2999_v0 }
 0xe56   :  { %2671 = vmatprep.subr.bf16.mxu1 %v3000_v32  ;;  %2699 = vmatprep.subr.bf16.mxu0 %v3001_v1 }
 0xe57   :  { %1801 = vmatmul.mubr.bf16.gmra.mrb[24].mxu1 %v1559_v24  ;;  %1854 = vmatmul.mubr.bf16.gmra.mrb[32].mxu0 %v1559_v24 }
 0xe59   :  { %2672 = vmatpush3.bf16.msra.mxu1 %v3002_v35  ;;  %2700 = vmatpush3.bf16.msra.mxu0 %v3003_v62 }
 0xe5a   :  { %2673 = vmatprep.subr.bf16.mxu1 %v3004_v36  ;;  %2701 = vmatprep.subr.bf16.mxu0 %v3005_v31 }
 0xe5d   :  { %2674 = vmatpush3.bf16.msra.mxu1 %v3006_v33  ;;  %2702 = vmatpush3.bf16.msra.mxu0 %v3007_v34 }
 0xe5e   :  { %2675 = vmatprep.subr.bf16.mxu1 %v3008_v14  ;;  %2703 = vmatprep.subr.bf16.mxu0 %v3009_v26 }
 0xe61   :  { %2676 = vmatpush3.bf16.msra.mxu1 %v3010_v52  ;;  %2704 = vmatpush3.bf16.msra.mxu0 %v3011_v27 }
 0xe62   :  { %2677 = vmatprep.subr.bf16.mxu1 %v3012_v21  ;;  %2705 = vmatprep.subr.bf16.mxu0 %v3013_v15 }
 0xe65   :  { %2678 = vmatpush3.bf16.msra.mxu1 %v3014_v28  ;;  %2706 = vmatpush3.bf16.msra.mxu0 %v3015_v22 }
 0xe66   :  { %2679 = vmatprep.subr.bf16.mxu1 %v3016_v37  ;;  %2707 = vmatprep.subr.bf16.mxu0 %v3017_v42 }
 0xe69   :  { %2680 = vmatpush3.bf16.msra.mxu1 %v3018_v43  ;;  %2708 = vmatpush3.bf16.msra.mxu0 %v3019_v2 }
 0xe6a   :  { %2681 = vmatprep.subr.bf16.mxu1 %v3020_v3  ;;  %2709 = vmatprep.subr.bf16.mxu0 %v3021_v4 }
 0xe6d   :  { %2682 = vmatpush3.bf16.msra.mxu1 %v3022_v5  ;;  %2710 = vmatpush3.bf16.msra.mxu0 %v3023_v44 }
 0xf22   :  { %v1792_v60 = vpop.f32.mrb[20].mxu1  ;;  %v1845_v7 = vpop.f32.mrb[28].mxu0 }
 0xf23   :  { %v3911_v30 = vadd.f32 %v1792_v60, %v3899_v53  ;;  %v3914_v58 = vadd.f32 %v1845_v7, %v3902_v55  ;;  %v1794_v29 = vpop.f32.mrb[21].mxu1  ;;  %v1847_v54 = vpop.f32.mrb[29].mxu0 }
 0xf24   :  { %v3917_v11 = vadd.f32 %v1794_v29, %v3905_v49  ;;  %v3920_v13 = vadd.f32 %v1847_v54, %v3908_v57  ;;  %v1796_v16 = vpop.f32.mrb[22].mxu1  ;;  %v1849_v17 = vpop.f32.mrb[30].mxu0 }
 0xf25   :  { %v1864_v19 = vmul.f32 %v3911_v30, %v3911_v30  ;;  %v1866_v20 = vmul.f32 %v3914_v58, %v3914_v58  ;;  %v3927_v51 = vadd.f32 %v1796_v16, %v3899_v53  ;;  %v3930_v47 = vadd.f32 %v1849_v17, %v3902_v55  ;;  %v1798_v23 = vpop.f32.mrb[23].mxu1  ;;  %v1851_v24 = vpop.f32.mrb[31].mxu0 }
 0xf26   :  { %v1865_v56 = vmul.f32 %v3917_v11, %v3917_v11  ;;  %v1867_v8 = vmul.f32 %v3920_v13, %v3920_v13  ;;  %v3937_v59 = vadd.f32 %v1798_v23, %v3905_v49  ;;  %v3940_v41 = vadd.f32 %v1851_v24, %v3908_v57 }
 0xf27   :  { %v1880_v61 = vmul.f32 %v1864_v19, %v3911_v30  ;;  %v1882_v6 = vmul.f32 %v1866_v20, %v3914_v58  ;;  %v1868_v25 = vmul.f32 %v3927_v51, %v3927_v51  ;;  %v1870_v0 = vmul.f32 %v3930_v47, %v3930_v47 }
 0xf28   :  { %v1881_v32 = vmul.f32 %v1865_v56, %v3917_v11  ;;  %v1883_v1 = vmul.f32 %v1867_v8, %v3920_v13  ;;  %v1869_v35 = vmul.f32 %v3937_v59, %v3937_v59  ;;  %v1871_v62 = vmul.f32 %v3940_v41, %v3940_v41 }
 0xf29   :  { %v1896_v36 = vmul.f32 0.044715, %v1880_v61  ;;  %v1898_v31 = vmul.f32 0.044715, %v1882_v6  ;;  %v1884_v33 = vmul.f32 %v1868_v25, %v3927_v51  ;;  %v1886_v34 = vmul.f32 %v1870_v0, %v3930_v47 }
 0xf2a   :  { %v1897_v14 = vmul.f32 0.044715, %v1881_v32  ;;  %v1899_v26 = vmul.f32 0.044715, %v1883_v1  ;;  %v1885_v52 = vmul.f32 %v1869_v35, %v3937_v59  ;;  %v1887_v27 = vmul.f32 %v1871_v62, %v3940_v41  ;;  %v1802_v21 = vpop.f32.mrb[24].mxu1  ;;  %v1855_v15 = vpop.f32.mrb[32].mxu0 }
 0xf2b   :  { %v1912_v28 = vadd.f32 %v1896_v36, %v3911_v30  ;;  %v1914_v22 = vadd.f32 %v1898_v31, %v3914_v58  ;;  %v1900_v37 = vmul.f32 0.044715, %v1884_v33  ;;  %v1902_v42 = vmul.f32 0.044715, %v1886_v34  ;;  %v1804_v43 = vpop.f32.mrb[25].mxu1  ;;  %v1857_v2 = vpop.f32.mrb[33].mxu0 }
 0xf2c   :  { %v1913_v3 = vadd.f32 %v1897_v14, %v3917_v11  ;;  %v1915_v4 = vadd.f32 %v1899_v26, %v3920_v13  ;;  %v1901_v5 = vmul.f32 0.044715, %v1885_v52  ;;  %v1903_v44 = vmul.f32 0.044715, %v1887_v27  ;;  %v1806_v45 = vpop.f32.mrb[26].mxu1  ;;  %v1859_v48 = vpop.f32.mrb[34].mxu0 }
 0xf2d   :  { %v1928_v50 = vmul.f32 0.7978846, %v1912_v28  ;;  %v1930_v10 = vmul.f32 0.7978846, %v1914_v22  ;;  %v1916_v40 = vadd.f32 %v1900_v37, %v3927_v51  ;;  %v1918_v46 = vadd.f32 %v1902_v42, %v3930_v47  ;;  %v1808_v9 = vpop.f32.mrb[27].mxu1  ;;  %v1861_v60 = vpop.f32.mrb[35].mxu0 }
 0xf2e   :  { %v1929_v7 = vmul.f32 0.7978846, %v1913_v3  ;;  %v1931_v29 = vmul.f32 0.7978846, %v1915_v4  ;;  %v1917_v54 = vadd.f32 %v1901_v5, %v3937_v59  ;;  %v1919_v16 = vadd.f32 %v1903_v44, %v3940_v41 }
 0xf2f   :  { %3112 = vtanh.f32 %v1928_v50  ;;  %v1932_v17 = vmul.f32 0.7978846, %v1916_v40  ;;  %v1934_v19 = vmul.f32 0.7978846, %v1918_v46  ;;  %v3967_v20 = vadd.f32 %v1802_v21, %v3899_v53 }
 0xf30   :  { %3114 = vtanh.f32 %v1930_v10  ;;  %v1933_v23 = vmul.f32 0.7978846, %v1917_v54  ;;  %v1935_v24 = vmul.f32 0.7978846, %v1919_v16  ;;  %v3970_v56 = vadd.f32 %v1855_v15, %v3902_v55 }
 0xf31   :  { %3116 = vtanh.f32 %v1929_v7  ;;  %v1872_v8 = vmul.f32 %v3967_v20, %v3967_v20  ;;  %v3975_v61 = vadd.f32 %v1804_v43, %v3905_v49  ;;  %v3978_v6 = vadd.f32 %v1857_v2, %v3908_v57 }
 0xf32   :  { %3118 = vtanh.f32 %v1931_v29  ;;  %v1874_v25 = vmul.f32 %v3970_v56, %v3970_v56  ;;  %v3983_v0 = vadd.f32 %v1806_v45, %v3899_v53  ;;  %v3986_v32 = vadd.f32 %v1859_v48, %v3902_v55 }
 0xf33   :  { %3120 = vtanh.f32 %v1932_v17  ;;  %v1888_v1 = vmul.f32 %v1872_v8, %v3967_v20  ;;  %v1873_v35 = vmul.f32 %v3975_v61, %v3975_v61  ;;  %v1875_v62 = vmul.f32 %v3978_v6, %v3978_v6 }
 0xf34   :  { %3122 = vtanh.f32 %v1934_v19  ;;  %v1890_v36 = vmul.f32 %v1874_v25, %v3970_v56  ;;  %v1876_v31 = vmul.f32 %v3983_v0, %v3983_v0  ;;  %v1878_v53 = vmul.f32 %v3986_v32, %v3986_v32 }
 0xf35   :  { %3124 = vtanh.f32 %v1933_v23  ;;  %v1904_v55 = vmul.f32 0.044715, %v1888_v1  ;;  %v1889_v33 = vmul.f32 %v1873_v35, %v3975_v61  ;;  %v1891_v34 = vmul.f32 %v1875_v62, %v3978_v6 }
 0xf36   :  { %3126 = vtanh.f32 %v1935_v24  ;;  %v1906_v14 = vmul.f32 0.044715, %v1890_v36  ;;  %v1892_v26 = vmul.f32 %v1876_v31, %v3983_v0  ;;  %v1894_v52 = vmul.f32 %v1878_v53, %v3986_v32 }
 0xf37   :  { %v1920_v27 = vadd.f32 %v1904_v55, %v3967_v20  ;;  %v1905_v21 = vmul.f32 0.044715, %v1889_v33  ;;  %v1907_v15 = vmul.f32 0.044715, %v1891_v34  ;;  %v4004_v28 = vadd.f32 %v1808_v9, %v3905_v49 }
 0xf38   :  { %v1922_v22 = vadd.f32 %v1906_v14, %v3970_v56  ;;  %v1908_v37 = vmul.f32 0.044715, %v1892_v26  ;;  %v1910_v42 = vmul.f32 0.044715, %v1894_v52  ;;  %v4008_v43 = vadd.f32 %v1861_v60, %v3908_v57 }
 0xf39   :  { %v3113_v2 = vpop.eup %3112  ;;  %v1936_v3 = vmul.f32 0.7978846, %v1920_v27  ;;  %v1921_v4 = vadd.f32 %v1905_v21, %v3975_v61  ;;  %v1923_v5 = vadd.f32 %v1907_v15, %v3978_v6  ;;  %v1877_v44 = vmul.f32 %v4004_v28, %v4004_v28 }
 0xf3a   :  { %v3115_v45 = vpop.eup %3114  ;;  %v1960_v48 = vadd.f32 1.0, %v3113_v2  ;;  %v1938_v49 = vmul.f32 0.7978846, %v1922_v22  ;;  %v1924_v50 = vadd.f32 %v1908_v37, %v3983_v0  ;;  %v1926_v10 = vadd.f32 %v1910_v42, %v3986_v32 }
 0xf3b   :  { %v3117_v40 = vpop.eup %3116  ;;  %v1962_v46 = vadd.f32 1.0, %v3115_v45  ;;  %3128 = vtanh.f32 %v1936_v3  ;;  %v1937_v57 = vmul.f32 0.7978846, %v1921_v4  ;;  %v1939_v9 = vmul.f32 0.7978846, %v1923_v5 }
 0xf3c   :  { %v3119_v60 = vpop.eup %3118  ;;  %v1976_v7 = vmul.f32 0.5, %v1960_v48  ;;  %3130 = vtanh.f32 %v1938_v49  ;;  %v1940_v29 = vmul.f32 0.7978846, %v1924_v50  ;;  %v1942_v54 = vmul.f32 0.7978846, %v1926_v10 }
 0xf3d   :  { %v3121_v16 = vpop.eup %3120  ;;  %v1978_v17 = vmul.f32 0.5, %v1962_v46  ;;  %3132 = vtanh.f32 %v1937_v57  ;;  %v1893_v19 = vmul.f32 %v1877_v44, %v4004_v28  ;;  %v1879_v23 = vmul.f32 %v4008_v43, %v4008_v43 }
 0xf3e   :  { %v3123_v24 = vpop.eup %3122  ;;  %v1992_v8 = vmul.f32 %v1976_v7, %v3911_v30  ;;  %v1964_v25 = vadd.f32 1.0, %v3121_v16  ;;  %3134 = vtanh.f32 %v1939_v9  ;;  %v1961_v1 = vadd.f32 1.0, %v3117_v40 }
 0xf3f   :  { %v3125_v35 = vpop.eup %3124  ;;  %v1994_v62 = vmul.f32 %v1978_v17, %v3914_v58  ;;  %v1966_v36 = vadd.f32 1.0, %v3123_v24  ;;  %3136 = vtanh.f32 %v1940_v29  ;;  %v1909_v31 = vmul.f32 0.044715, %v1893_v19 }
 0xf40   :  { %v3127_v53 = vpop.eup %3126  ;;  %v1980_v55 = vmul.f32 0.5, %v1964_v25  ;;  %3138 = vtanh.f32 %v1942_v54  ;;  %v1895_v33 = vmul.f32 %v1879_v23, %v4008_v43  ;;  %v1965_v34 = vadd.f32 1.0, %v3125_v35 }
 0xf41   :  { %v1982_v14 = vmul.f32 0.5, %v1966_v36  ;;  %v1925_v26 = vadd.f32 %v1909_v31, %v4004_v28  ;;  %v1977_v52 = vmul.f32 0.5, %v1961_v1  ;;  %v1963_v30 = vadd.f32 1.0, %v3119_v60 }
 0xf42   :  { %v1996_v27 = vmul.f32 %v1980_v55, %v3927_v51  ;;  %v1911_v21 = vmul.f32 0.044715, %v1895_v33  ;;  %v1981_v15 = vmul.f32 0.5, %v1965_v34  ;;  %v1967_v22 = vadd.f32 1.0, %v3127_v53 }
 0xf43   :  { %v1998_v58 = vmul.f32 %v1982_v14, %v3930_v47  ;;  %v1941_v37 = vmul.f32 0.7978846, %v1925_v26  ;;  %v1993_v42 = vmul.f32 %v1977_v52, %v3917_v11  ;;  %v1979_v2 = vmul.f32 0.5, %v1963_v30  ;;  %v219_v30 = vld [vmem:[%s4113_s12] sm:$0x1] }
 0xf44   :  { %v2008_v3 = vpack.c.bf16 %v1996_v27, %v1992_v8  ;;  %v1927_v4 = vadd.f32 %v1911_v21, %v4008_v43  ;;  %v1997_v5 = vmul.f32 %v1981_v15, %v3937_v59  ;;  %v1983_v44 = vmul.f32 0.5, %v1967_v22 }
 0xf45   :  { %v3129_v45 = vpop.eup %3128  ;;  %v2010_v48 = vpack.c.bf16 %v1998_v58, %v1994_v62  ;;  %3140 = vtanh.f32 %v1941_v37  ;;  %v1995_v51 = vmul.f32 %v1979_v2, %v3920_v13  ;;  %v2016_v27 = vunpack.c.l.bf16 %v219_v30  ;;  %v2362_v30 = vld [vmem:[%s4117_s16] sm:$0x1] }
 0xf46   :  { %v3131_v49 = vpop.eup %3130  ;;  %v1943_v50 = vmul.f32 0.7978846, %v1927_v4  ;;  %v2009_v10 = vpack.c.bf16 %v1997_v5, %v1993_v42  ;;  %v1999_v47 = vmul.f32 %v1983_v44, %v3940_v41  ;;  %v1968_v40 = vadd.f32 1.0, %v3129_v45 }
 0xf47   :  { %v3133_v46 = vpop.eup %3132  ;;  %v1970_v11 = vadd.f32 1.0, %v3131_v49  ;;  %v2020_v22 = vrot.slane %v2016_v27, %v3391_v63  ;;  %v2363_v27 = vunpack.c.l.bf16 %v2362_v30 }
 0xf48   :  { %v3135_v57 = vpop.eup %3134  ;;  %3142 = vtanh.f32 %v1943_v50  ;;  %2245 = vmatprep.mubr.bf16.mxu1 %v2009_v10  ;;  %v2011_v9 = vpack.c.bf16 %v1999_v47, %v1995_v51  ;;  %v1984_v29 = vmul.f32 0.5, %v1968_v40  ;;  %v1969_v16 = vadd.f32 1.0, %v3133_v46 }
 0xf49   :  { %v3137_v60 = vpop.eup %3136  ;;  %2246 = vmatmul.mubr.bf16.vlgmr.msra.gmra.mrb[28].mxu1 %v2008_v3  ;;  %v1986_v54 = vmul.f32 0.5, %v1970_v11  ;;  %v1971_v8 = vadd.f32 1.0, %v3135_v57 }
 0xf4a   :  { %v3139_v59 = vpop.eup %3138  ;;  %2292 = vmatprep.mubr.bf16.mxu0 %v2011_v9  ;;  %v1972_v7 = vadd.f32 1.0, %v3137_v60  ;;  %v2000_v41 = vmul.f32 %v1984_v29, %v3967_v20  ;;  %v1985_v62 = vmul.f32 0.5, %v1969_v16 }
 0xf4b   :  { %2293 = vmatmul.mubr.bf16.vlgmr.msra.gmra.mrb[36].mxu0 %v2010_v48  ;;  %v1974_v13 = vadd.f32 1.0, %v3139_v59  ;;  %v2002_v25 = vmul.f32 %v1986_v54, %v3970_v56  ;;  %v1987_v34 = vmul.f32 0.5, %v1971_v8  ;;  %v3175_v54 = vmov 0.0   ;;  %v3028_v8 = vld [vmem:[%s4116_s15 + $0x20] sm:$0xff]  }
 0xf4c   :  { %v1988_v17 = vmul.f32 0.5, %v1972_v7  ;;  %v2001_v14 = vmul.f32 %v1985_v62, %v3975_v61  ;;  %2836 = vmatprep.subr.bf16.mxu1 %v3175_v54 }
 0xf4d   :  { %v1990_v19 = vmul.f32 0.5, %v1974_v13  ;;  %v2003_v52 = vmul.f32 %v1987_v34, %v3978_v6  ;;  %v3024_v13 = vld [vmem:[%s4116_s15] sm:$0xff]  }
 0xf4e   :  { %v2004_v23 = vmul.f32 %v1988_v17, %v3983_v0  ;;  %2837 = vmatpush3.bf16.msra.mxu1 %v3024_v13 }
 0xf4f   :  { %v3141_v24 = vpop.eup %3140  ;;  %v2006_v1 = vmul.f32 %v1990_v19, %v3986_v32  ;;  %2838 = vmatprep.subr.bf16.mxu1 %v3175_v54 }
 0xf50   :  { %v1973_v35 = vadd.f32 1.0, %v3141_v24  ;;  %v2012_v36 = vpack.c.bf16 %v2004_v23, %v2000_v41  ;;  %v3026_v23 = vld [vmem:[%s4116_s15 + $0x10] sm:$0xff]   ;;  %v3027_v24 = vld [vmem:[%s4116_s15 + $0x18] sm:$0xff]  }
 0xf51   :  { %v2014_v31 = vpack.c.bf16 %v2006_v1, %v2002_v25  ;;  %v3029_v25 = vld [vmem:[%s4116_s15 + $0x28] sm:$0xff]   ;;  %v3030_v1 = vld [vmem:[%s4116_s15 + $0x30] sm:$0xff]  }
 0xf52   :  { %v3143_v53 = vpop.eup %3142  ;;  %v1989_v55 = vmul.f32 0.5, %v1973_v35  ;;  %v3031_v35 = vld [vmem:[%s4116_s15 + $0x38] sm:$0xff]  }
 0xf53   :  { %v1975_v33 = vadd.f32 1.0, %v3143_v53  ;;  %v2317_v53 = vld [vmem:[%s4114_s13] sm:$0x1]  ;;  %s3177_s13 = smov [#allocation2]  }
 0xf54   :  { %v2005_v20 = vmul.f32 %v1989_v55, %v4004_v28  ;;  %v2318_v55 = vld [vmem:[%s4115_s14] sm:$0x1]  ;;  %s2474_s14 = sshll.u32 %s3177_s13, 4  ;;  %s2475_s14 = int_to_ptr.vmem [resolvable:$true] %s2474_s14 }
 0xf55   :  { %v1991_v26 = vmul.f32 0.5, %v1975_v33  ;;  %v2333_v33 = vunpack.c.l.bf16 %v2317_v53  ;;  %v2339_v34 = vunpack.c.l.bf16 %v2318_v55  ;;  %s3146_s16 = scalar_lea.vmem %s2475_s14, 32  ;;  %p3151_p1 = scmp.lt.s32.totalorder %s2475_s14, %s2475_s14 }
 0xf56   :  { %v2013_v0 = vpack.c.bf16 %v2005_v20, %v2001_v14  ;;  %p3147_p0 = scmp.ne.s32.totalorder %s2475_s14, %s3146_s16  ;;  %p3152_p2 = scmp.lt.s32.totalorder %s3146_s16, %s3146_s16 }
 0xf57   :  { %v2007_v56 = vmul.f32 %v1991_v26, %v4008_v43  ;;  %v2337_v14 = vrot.slane %v2333_v33, %v3391_v63 }
 0xf58   :  { %2252 = vmatprep.mubr.bf16.mxu1 %v2013_v0  ;;  %v2343_v0 = vrot.slane %v2339_v34, %v3391_v63  ;;  %p3153_p3 = por %p3152_p2, %p3151_p1 }
 0xf59   :  { %v2015_v32 = vpack.c.bf16 %v2007_v56, %v2003_v52  ;;  %2253 = vmatmul.mubr.bf16.gmra.mrb[32].mxu1 %v2012_v36 }
 0xf5a   :  { %2852 = vmatprep.mubr.msk.bf16.mxu1 %vm3176_vm1, %v3175_v54  ;;  %p3154_p4 = pnand %p3153_p3, %p3147_p0 }
 0xf5b   :  { %2299 = vmatprep.mubr.bf16.mxu0 %v2015_v32 }
 0xf5c   :  { %2300 = vmatmul.mubr.bf16.gmra.mrb[40].mxu0 %v2014_v31 }
0x101c   :  { %v2683_v21 = vpop.f32.mrb[28].mxu1 }
0x101d   :  { %v2684_v61 = vpop.f32.mrb[29].mxu1  ;;  %v2367_v21 = vrot.slane %v2363_v27, %v3391_v63 }
0x101e   :  { %v2711_v15 = vpop.f32.mrb[36].mxu0  ;;  %v2686_v28 = vpop.f32.mrb[30].mxu1 }
0x101f   :  { %v2712_v58 = vpop.f32.mrb[37].mxu0  ;;  %v2687_v6 = vpop.f32.mrb[31].mxu1 }
0x1020   :  { %v2714_v37 = vpop.f32.mrb[38].mxu0  ;;  %v2688_v43 = vadd.f32 %v2687_v6, %v2686_v28 }
0x1021   :  { %v2715_v42 = vpop.f32.mrb[39].mxu0 }
0x1022   :  { %v2250_v2 = vadd.f32 %v2688_v43, %v2020_v22  ;;  %v2716_v3 = vadd.f32 %v2715_v42, %v2714_v37 }
0x1024   :  { %v2297_v4 = vadd.f32 %v2716_v3, %v2250_v2 }
0x1026   :  { %v2307_v11 = vadd.f32 %v2297_v4, %v3658_v38  ;;  %v3025_v38 = vld [vmem:[%s4116_s15 + $0x8] sm:$0xff]  }
0x1027   :  { %2839 = vmatpush3.bf16.msra.mxu1 %v3025_v38 }
0x1028   :  { %v2310_v60 = vrot.slane %v2307_v11, 3  ;;  %2840 = vmatprep.subr.bf16.mxu1 %v3175_v54 }
0x102b   :  { %2841 = vmatpush3.bf16.msra.mxu1 %v3026_v23 }
0x102c   :  { %v2689_v5 = vpop.f32.mrb[32].mxu1  ;;  %2842 = vmatprep.subr.bf16.mxu1 %v3175_v54 }
0x102d   :  { %v2690_v44 = vpop.f32.mrb[33].mxu1 }
0x102e   :  { %v2691_v45 = vadd.f32 %v2690_v44, %v2689_v5  ;;  %v2692_v48 = vpop.f32.mrb[34].mxu1 }
0x102f   :  { %v2717_v51 = vpop.f32.mrb[40].mxu0  ;;  %v2693_v49 = vpop.f32.mrb[35].mxu1  ;;  %2843 = vmatpush3.bf16.msra.mxu1 %v3027_v24 }
0x1030   :  { %v2255_v50 = vadd.f32 %v2691_v45, %v2020_v22  ;;  %v2718_v10 = vpop.f32.mrb[41].mxu0  ;;  %2844 = vmatprep.subr.bf16.mxu1 %v3175_v54 }
0x1031   :  { %v2719_v47 = vadd.f32 %v2718_v10, %v2717_v51  ;;  %v2720_v40 = vpop.f32.mrb[42].mxu0 }
0x1032   :  { %v2721_v46 = vpop.f32.mrb[43].mxu0 }
0x1033   :  { %v2302_v57 = vadd.f32 %v2719_v47, %v2255_v50  ;;  %2845 = vmatpush3.bf16.msra.mxu1 %v3028_v8 }
0x1034   :  { %2846 = vmatprep.subr.bf16.mxu1 %v3175_v54 }
0x1035   :  { %v2308_v9 = vadd.f32 %v2302_v57, %v3660_v39 }
0x1037   :  { %v2313_v59 = vrot.slane %v2308_v9, 6  ;;  %2847 = vmatpush3.bf16.msra.mxu1 %v3029_v25 }
0x1038   :  { %2848 = vmatprep.subr.bf16.mxu1 %v3175_v54 }
0x1039   :  { %v2316_v7 = vsel %vm2315_vm15, %v2310_v60, %v2313_v59 }
0x103a   :  { %v2320_v29 = vsel %vm2319_vm0, %v2316_v7, 0.0 }
0x103b   :  { %2321 = vadd.xlane.f32.xlu0 %v2320_v29  ;;  %2849 = vmatpush3.bf16.msra.mxu1 %v3030_v1 }
0x103c   :  { %2850 = vmatprep.subr.bf16.mxu1 %v3175_v54 }
0x103f   :  { %2851 = vmatpush3.bf16.msra.mxu1 %v3031_v35 }
0x10c8   :  { %v2322_v39 = vpop.xlane.xlu0 %2321 }
0x10c9   :  { %v2323_v16 = vmul.f32 0.0078125, %v2322_v39 }
0x10cb   :  { %v2324_v17 = vsub.f32 %v2316_v7, %v2323_v16 }
0x10cd   :  { %v2325_v19 = vmul.f32 %v2324_v17, %v2324_v17 }
0x10cf   :  { %v2326_v41 = vsel %vm2319_vm0, %v2325_v19, 0.0 }
0x10d0   :  { %2327 = vadd.xlane.f32.xlu1 %v2326_v41 }
0x115d   :  { %v2328_v62 = vpop.xlane.xlu1 %2327 }
0x115e   :  { %v2329_v36 = vmul.f32 0.0078125, %v2328_v62 }
0x1160   :  { %v2330_v31 = vadd.f32 1e-05, %v2329_v36 }
0x1162   :  { %3144 = vrsqrt.f32 %v2330_v31 }
0x116c   :  { %v3145_v20 = vpop.eup %3144 }
0x116d   :  { %v2332_v26 = vmul.f32 %v3145_v20, %v2324_v17 }
0x116f   :  { %v2338_v52 = vmul.f32 %v2337_v14, %v2332_v26 }
0x1171   :  { %v2344_v56 = vadd.f32 %v2343_v0, %v2338_v52 }
0x1173   :  { %v2345_v32 = vpack.c.bf16 %v2344_v56, %v2344_v56 }
0x1175   :  { %2853 = vmatmul.mubr.bf16.vlgmr.msra.gmra.mrb[36].mxu1 %v2345_v32 }
0x1248   :  { %v2450_v61 = vpop.f32.mrb[36].mxu1 }
0x1249   :  { %v2451_v15 = vadd.f32 %v2450_v61, %v2367_v21  ;;  %v2854_v28 = vpop.f32.mrb[37].mxu1 }
0x124a   :  { %v2453_v22 = vpop.f32.mrb[38].mxu1 }
0x124b   :  { %2456 = vst [vmem:[#allocation2] sm:$0x3] %v2451_v15  ;;  %v2855_v58 = vpop.f32.mrb[39].mxu1  ;;  %v2457_v6 = vsel %vm2319_vm0, %v2451_v15, -inf }
0x124c   :  { %2458 = vmax.xlane.f32.xlu0 %v2457_v6 }
0x12d9   :  { %v2459_v37 = vpop.xlane.xlu0 %2458 }
0x12da   :  { %vm2460_vm2 = vcmp.ge.f32.partialorder %v2451_v15, %v2459_v37 }
0x12db   :  { %v2461_v43 = vsel %vm2460_vm2, %v573_v18, 128.0 }
0x12dc   :  { %v2462_v42 = vsel %vm2319_vm0, %v2461_v43, inf }
0x12dd   :  { %2463 = vmin.xlane.f32.xlu1 %v2462_v42 }
0x12de   :  { %3157 = shalt.err (!%p3154_p4)
}
0x12df   :  { %s3158_s10 = scalar_lea.hbm %s4118_s17, 32 }
0x12e0   :  { %p3159_p5 = scmp.ne.s32.totalorder %s4118_s17, %s3158_s10  ;;  %p3162_p6 = scmp.lt.u32.totalorder %s3158_s10, %s4118_s17 }
0x12e2   :  { %p3164_p7 = pnand %p3162_p6, %p3159_p5 }
0x12e4   :  { %3167 = shalt.err (!%p3164_p7)
}
0x12e5   :  { %2477 = dma.vmem_to_hbm [thread:$0]  %s2475_s14, 32, %s4118_s17, [#allocation3]   ;;  %vm2466_vm3 = vcmask 1024  }
0x136a   :  { %v2464_v63 = vpop.xlane.xlu1 %2463 }
0x136b   :  { %v2864_v12 = vtrunc.f32 %v2464_v63 }
0x136d   :  { %v2865_v18 = vcvt.f32.s32 %v2864_v12 }
0x136f   :  { %2467 = vst.msk [vmem:[%s4119_s18] sm:$0x3] %vm2466_vm3, %v2865_v18 }
0x1370   :  { %3168 = dma.done.wait [#allocation3], 32  }
0x1371   :  { %3169 = vsyncadd [#allocation3], 4294967264 }
0x1372   :  { %2485 = vsyncpa [#allocation3], 1 }

</bundles_post_ra>
